<compile_context>
chip_gen: v5e
topology: v5e:2x2
jax: 0.10.0
libtpu: 0.0.40
codegen_flags: <defaults>
</compile_context>

<pallas_src>
import functools

import numpy as np
import jax
import jax.numpy as jnp
from jax.experimental import pallas as pl
from jax.experimental.pallas import tpu as pltpu

NUM_LAYERS = 4
SUBLANES = 8
FC1_OUT = 240
FC1_PAD = 256


def lstm_fc_kernel(x_ref,                      # (T*Bp, input_size)  time-major
                   wih0, whh0, b0,             # layer 0: (F,4H), (4H,4H), (1,4H)
                   wcat1, b1, wcat2, b2, wcat3, b3,   # layers 1..3: (8H,4H),(1,4H)
                   fc1_w, fc1_b, fc2_w, fc2_b,        # (4H,256),(1,256),(256,out),(1,out)
                   out_ref,                    # (Bp, output_size)
                   xproj_ref,                  # scratch (T*Bp, 4H)
                   *, seq_len, batch_pad, hidden):
    T, Bp, H = seq_len, batch_pad, hidden
    GH = 4 * H

    # ---- Layer-0 input projection for ALL timesteps in one batched MXU matmul,
    # completely off the recurrence chain (bias folded in). ----------------------
    xproj_ref[...] = (
        jnp.dot(x_ref[...], wih0[...], preferred_element_type=jnp.float32)
        + b0[...])

    wcat_refs = (None, wcat1, wcat2, wcat3)
    bias_refs = (None, b1, b2, b3)

    def cell(gates, c_prev):
        # Gate pre-activations in PyTorch column order [i | f | g | o]; g columns
        # were pre-scaled by 2 offline, so tanh(g) = 2*sigmoid(gates_g) - 1 and a
        # SINGLE EUP sigmoid pass covers all four gates.  c lives at the f-gate
        # block [H,2H): f*c needs no roll; i and g roll onto that block (XLU, can
        # run on both XLUs in parallel); the o roll is off the c chain.
        sig = jax.nn.sigmoid(gates)             # [  i   |  f  | sig(2g) |  o  ]
        gm = 2.0 * sig - 1.0                    # [  ..  |  .. | tanh(g) |  .. ]
        i_al = pltpu.roll(sig, H, 1)            # i: block 0 -> block 1
        g_al = pltpu.roll(gm, 3 * H, 1)         # g: block 2 -> block 1
        o_al = pltpu.roll(sig, 2 * H, 1)        # o: block 3 -> block 1
        c_new = sig * c_prev + i_al * g_al      # lanes [H,2H) hold f*c + i*g
        h_new = o_al * jnp.tanh(c_new)          # lanes [H,2H) hold o*tanh(c')
        return h_new, c_new

    # ---- Wavefront schedule: cell (l, t) runs at wavefront w = l + t.  It only
    # depends on cells of wavefront w-1, so the up-to-4 cells per wavefront are
    # independent and their tiny matmul/EUP/roll rounds overlap. ----------------
    h = [jnp.zeros((Bp, GH), jnp.float32) for _ in range(NUM_LAYERS)]
    c = [jnp.zeros((Bp, GH), jnp.float32) for _ in range(NUM_LAYERS)]
    for w in range(T + NUM_LAYERS - 1):
        new_h = list(h)
        new_c = list(c)
        for l in range(NUM_LAYERS):
            t = w - l
            if t < 0 or t >= T:
                continue
            if l == 0:
                gates = (xproj_ref[pl.ds(t * Bp, Bp), :]
                         + jnp.dot(h[0], whh0[...],
                                   preferred_element_type=jnp.float32))
            else:
                # Fused input-projection + recurrence: one K=8H matmul per cell.
                lhs = jnp.concatenate([h[l - 1], h[l]], axis=1)   # (Bp, 8H)
                gates = (jnp.dot(lhs, wcat_refs[l][...],
                                 preferred_element_type=jnp.float32)
                         + bias_refs[l][...])
            new_h[l], new_c[l] = cell(gates, c[l])
        h, c = new_h, new_c

    # ---- Head: last timestep of last layer -> fc1 -> fc2. ----------------------
    # h[-1] is valid at lanes [H,2H); fc1_w has its real rows there (rest zero),
    # and the 240 -> 256 lane padding keeps both head matmuls on unmasked vregs.
    y = jnp.dot(h[-1], fc1_w[...], preferred_element_type=jnp.float32) + fc1_b[...]
    y = jnp.dot(y, fc2_w[...], preferred_element_type=jnp.float32) + fc2_b[...]
    out_ref[...] = y.astype(out_ref.dtype)


def init_params(key, input_size, hidden_size, output_size):
    """Deterministic PyTorch-style U(-1/sqrt(H), 1/sqrt(H)) init (PyTorch weight
    orientation; LSTM biases pre-summed as b_ih + b_hh)."""
    params = {}
    k = 1.0 / np.sqrt(hidden_size)
    keys = jax.random.split(key, NUM_LAYERS * 4 + 4)
    ki = 0
    for layer in range(NUM_LAYERS):
        in_dim = input_size if layer == 0 else hidden_size
        params[f"w_ih_{layer}"] = jax.random.uniform(
            keys[ki], (4 * hidden_size, in_dim), jnp.float32, -k, k); ki += 1
        params[f"w_hh_{layer}"] = jax.random.uniform(
            keys[ki], (4 * hidden_size, hidden_size), jnp.float32, -k, k); ki += 1
        b_ih = jax.random.uniform(keys[ki], (4 * hidden_size,),
                                  jnp.float32, -k, k); ki += 1
        b_hh = jax.random.uniform(keys[ki], (4 * hidden_size,),
                                  jnp.float32, -k, k); ki += 1
        params[f"b_{layer}"] = b_ih + b_hh
    k1 = 1.0 / np.sqrt(hidden_size)
    params["fc1_w"] = jax.random.uniform(keys[ki], (FC1_OUT, hidden_size),
                                         jnp.float32, -k1, k1); ki += 1
    params["fc1_b"] = jax.random.uniform(keys[ki], (FC1_OUT,),
                                         jnp.float32, -k1, k1); ki += 1
    k2 = 1.0 / np.sqrt(float(FC1_OUT))
    params["fc2_w"] = jax.random.uniform(keys[ki], (output_size, FC1_OUT),
                                         jnp.float32, -k2, k2); ki += 1
    params["fc2_b"] = jax.random.uniform(keys[ki], (output_size,),
                                         jnp.float32, -k2, k2); ki += 1
    return params


def prepare_kernel_params(params):
    """One-time weight prep (hoisted out of the forward path):
      * transpose to (in_dim, out_dim) for row-major `x @ W` on the MXU,
      * pre-scale g-gate columns/bias by 2 (tanh via the single sigmoid pass),
      * zero-pad recurrent / upper-layer-input weights to the full 4H-lane frame
        with the real rows at the h-valid block [H, 2H),
      * stack [w_ih ; w_hh] for layers 1..3 into one (8H, 4H) matrix,
      * pad the fc head 240 -> 256 lanes."""
    H = params["w_hh_0"].shape[1]
    GH = 4 * H
    out_size = params["fc2_w"].shape[0]

    def prep_gate_w(w):                       # (4H, in) -> (in, 4H), g cols * 2
        wt = jnp.transpose(w)
        return wt.at[:, 2 * H:3 * H].multiply(2.0)

    def prep_gate_b(b):                       # (4H,) -> (1, 4H), g block * 2
        return b.at[2 * H:3 * H].multiply(2.0).reshape(1, GH)

    kp = []
    # Layer 0: w_ih stays dense (real input); w_hh zero-padded to the full frame.
    kp.append(prep_gate_w(params["w_ih_0"]))                              # (F, 4H)
    kp.append(jnp.zeros((GH, GH), jnp.float32)
              .at[H:2 * H, :].set(prep_gate_w(params["w_hh_0"])))         # (4H, 4H)
    kp.append(prep_gate_b(params["b_0"]))                                 # (1, 4H)
    # Layers 1..3: stacked [h_below ; h_self] weight, zero rows off the valid block.
    for l in range(1, NUM_LAYERS):
        wcat = jnp.zeros((2 * GH, GH), jnp.float32)
        wcat = wcat.at[H:2 * H, :].set(prep_gate_w(params[f"w_ih_{l}"]))
        wcat = wcat.at[GH + H:GH + 2 * H, :].set(prep_gate_w(params[f"w_hh_{l}"]))
        kp.append(wcat)                                                   # (8H, 4H)
        kp.append(prep_gate_b(params[f"b_{l}"]))                          # (1, 4H)
    # FC head: fc1 rows sit at the h-valid block; 240 -> 256 lane padding.
    kp.append(jnp.zeros((GH, FC1_PAD), jnp.float32)
              .at[H:2 * H, :FC1_OUT].set(jnp.transpose(params["fc1_w"])))  # (4H,256)
    kp.append(jnp.zeros((1, FC1_PAD), jnp.float32)
              .at[0, :FC1_OUT].set(params["fc1_b"]))                       # (1,256)
    kp.append(jnp.zeros((FC1_PAD, out_size), jnp.float32)
              .at[:FC1_OUT, :].set(jnp.transpose(params["fc2_w"])))        # (256,out)
    kp.append(params["fc2_b"].reshape(1, -1))                              # (1,out)
    return tuple(jax.device_put(w) for w in kp)


@jax.jit
def lstm_model_forward(x, kparams):
    """Pads the batch to a full sublane group, goes time-major, runs the kernel,
    and slices out the valid rows."""
    B, T, F = x.shape
    H = kparams[1].shape[0] // 4              # whh0 is (4H, 4H)
    output_size = kparams[-1].shape[1]        # fc2_b is (1, out)
    Bp = max(SUBLANES, ((B + SUBLANES - 1) // SUBLANES) * SUBLANES)

    x_p = jnp.pad(x.astype(jnp.float32), ((0, Bp - B), (0, 0), (0, 0)))
    x_tm = jnp.transpose(x_p, (1, 0, 2)).reshape(T * Bp, F)   # time-major, flat

    vmem = pl.BlockSpec(memory_space=pltpu.MemorySpace.VMEM)
    # NOTE (scaling): at realistic batch sizes add a leading grid axis over
    # Bp-sized batch blocks with dimension_semantics=("parallel",) so v7x's two
    # TensorCores share the work, chunk xproj over time if residency nears the
    # scoped-VMEM default, and raise pltpu.CompilerParams(vmem_limit_bytes=...).
    # At these shapes total VMEM use is < 1 MiB, so one invocation is optimal.
    out = pl.pallas_call(
        functools.partial(lstm_fc_kernel, seq_len=T, batch_pad=Bp, hidden=H),
        out_shape=jax.ShapeDtypeStruct((Bp, output_size), jnp.float32),
        in_specs=[vmem] * (1 + len(kparams)),
        out_specs=vmem,
        scratch_shapes=[
            pltpu.VMEM((T * Bp, 4 * H), jnp.float32),   # hoisted layer-0 projection
        ],
    )(x_tm, *kparams)
    return out[:B]


def reference_forward(x, params):
    """Pure-JAX reference with PyTorch LSTM semantics (for verification)."""
    B, T, _ = x.shape
    seq = x.astype(jnp.float32)
    H = params["w_hh_0"].shape[1]
    for layer in range(NUM_LAYERS):
        w_ih = params[f"w_ih_{layer}"]
        w_hh = params[f"w_hh_{layer}"]
        b = params[f"b_{layer}"]
        h = jnp.zeros((B, H), jnp.float32)
        c = jnp.zeros((B, H), jnp.float32)
        outs = []
        for t in range(T):
            gates = seq[:, t, :] @ w_ih.T + h @ w_hh.T + b
            i_g = jax.nn.sigmoid(gates[:, 0 * H:1 * H])
            f_g = jax.nn.sigmoid(gates[:, 1 * H:2 * H])
            g_g = jnp.tanh(gates[:, 2 * H:3 * H])
            o_g = jax.nn.sigmoid(gates[:, 3 * H:4 * H])
            c = f_g * c + i_g * g_g
            h = o_g * jnp.tanh(c)
            outs.append(h)
        seq = jnp.stack(outs, axis=1)
    last = seq[:, -1, :]
    y = last @ params["fc1_w"].T + params["fc1_b"]
    y = y @ params["fc2_w"].T + params["fc2_b"]
    return y


if __name__ == "__main__":
    # Small shapes consistent with the module's forward:
    batch, seq_len = 2, 8
    input_size, hidden_size, output_size = 16, 32, 10

    key = jax.random.PRNGKey(0)
    kx, kp = jax.random.split(key)
    x = jax.random.normal(kx, (batch, seq_len, input_size), dtype=jnp.float32)
    params = init_params(kp, input_size, hidden_size, output_size)
    kparams = prepare_kernel_params(params)   # one-time weight prep

    out = lstm_model_forward(x, kparams)
    out = jax.block_until_ready(out)

    ref = reference_forward(x, params)
    assert out.shape == (batch, output_size)
    np.testing.assert_allclose(np.asarray(out), np.asarray(ref),
                               rtol=1e-4, atol=1e-4)

    print("KERNEL_OK")
</pallas_src>

<mosaic_0001>
module attributes {stable_mosaic.version = 11 : i64} {
  func.func @lstm_fc_kernel(%arg0: memref<64x16xf32, #tpu.memory_space<vmem>>, %arg1: memref<16x128xf32, #tpu.memory_space<vmem>>, %arg2: memref<128x128xf32, #tpu.memory_space<vmem>>, %arg3: memref<1x128xf32, #tpu.memory_space<vmem>>, %arg4: memref<256x128xf32, #tpu.memory_space<vmem>>, %arg5: memref<1x128xf32, #tpu.memory_space<vmem>>, %arg6: memref<256x128xf32, #tpu.memory_space<vmem>>, %arg7: memref<1x128xf32, #tpu.memory_space<vmem>>, %arg8: memref<256x128xf32, #tpu.memory_space<vmem>>, %arg9: memref<1x128xf32, #tpu.memory_space<vmem>>, %arg10: memref<128x256xf32, #tpu.memory_space<vmem>>, %arg11: memref<1x256xf32, #tpu.memory_space<vmem>>, %arg12: memref<256x10xf32, #tpu.memory_space<vmem>>, %arg13: memref<1x10xf32, #tpu.memory_space<vmem>>, %arg14: memref<8x10xf32, #tpu.memory_space<vmem>>, %arg15: memref<64x128xf32, #tpu.memory_space<vmem>>) attributes {dimension_semantics = [], scalar_prefetch = 0 : i64, scratch_operands = 1 : i64, tpu.core_type = #tpu.core_type<tc>} {
    %c0 = arith.constant 0 : index
    %c0_0 = arith.constant 0 : index
    %0 = vector.load %arg0[%c0, %c0_0] : memref<64x16xf32, #tpu.memory_space<vmem>>, vector<64x16xf32>
    %c0_1 = arith.constant 0 : index
    %c0_2 = arith.constant 0 : index
    %1 = vector.load %arg1[%c0_1, %c0_2] : memref<16x128xf32, #tpu.memory_space<vmem>>, vector<16x128xf32>
    %cst = arith.constant dense<0.000000e+00> : vector<64x128xf32>
    %2 = tpu.matmul %0, %1, %cst {dimension_numbers = #tpu.dot_dimension_numbers<[1], [0], [0], [1], [0, 0, 1, 1], [], []>} : vector<64x16xf32>, vector<16x128xf32>, vector<64x128xf32> -> vector<64x128xf32>
    %c0_3 = arith.constant 0 : index
    %c0_4 = arith.constant 0 : index
    %3 = vector.load %arg3[%c0_3, %c0_4] : memref<1x128xf32, #tpu.memory_space<vmem>>, vector<1x128xf32>
    %4 = vector.broadcast %3 : vector<1x128xf32> to vector<64x128xf32>
    %5 = arith.addf %2, %4 : vector<64x128xf32>
    %c0_5 = arith.constant 0 : index
    %c0_6 = arith.constant 0 : index
    %6 = vector.load %arg15[%c0_5, %c0_6] : memref<64x128xf32, #tpu.memory_space<vmem>>, vector<64x128xf32>
    tpu.vector_store %arg15[%c0_5, %c0_6], %5 {strides = array<i32>} : memref<64x128xf32, #tpu.memory_space<vmem>>, vector<64x128xf32>,
    %cst_7 = arith.constant 0.000000e+00 : f32
    %7 = vector.broadcast %cst_7 : f32 to vector<8x128xf32>
    %cst_8 = arith.constant 0.000000e+00 : f32
    %8 = vector.broadcast %cst_8 : f32 to vector<8x128xf32>
    %cst_9 = arith.constant 0.000000e+00 : f32
    %9 = vector.broadcast %cst_9 : f32 to vector<8x128xf32>
    %cst_10 = arith.constant 0.000000e+00 : f32
    %10 = vector.broadcast %cst_10 : f32 to vector<8x128xf32>
    %cst_11 = arith.constant 0.000000e+00 : f32
    %11 = vector.broadcast %cst_11 : f32 to vector<8x128xf32>
    %cst_12 = arith.constant 0.000000e+00 : f32
    %12 = vector.broadcast %cst_12 : f32 to vector<8x128xf32>
    %cst_13 = arith.constant 0.000000e+00 : f32
    %13 = vector.broadcast %cst_13 : f32 to vector<8x128xf32>
    %cst_14 = arith.constant 0.000000e+00 : f32
    %14 = vector.broadcast %cst_14 : f32 to vector<8x128xf32>
    %c0_15 = arith.constant 0 : index
    %c0_16 = arith.constant 0 : index
    %15 = vector.load %arg15[%c0_15, %c0_16] : memref<64x128xf32, #tpu.memory_space<vmem>>, vector<8x128xf32>
    %c0_17 = arith.constant 0 : index
    %c0_18 = arith.constant 0 : index
    %16 = vector.load %arg2[%c0_17, %c0_18] : memref<128x128xf32, #tpu.memory_space<vmem>>, vector<128x128xf32>
    %cst_19 = arith.constant dense<0.000000e+00> : vector<8x128xf32>
    %17 = tpu.matmul %7, %16, %cst_19 {dimension_numbers = #tpu.dot_dimension_numbers<[1], [0], [0], [1], [0, 0, 1, 1], [], []>} : vector<8x128xf32>, vector<128x128xf32>, vector<8x128xf32> -> vector<8x128xf32>
    %18 = arith.addf %15, %17 : vector<8x128xf32>
    %19 = arith.negf %18 : vector<8x128xf32>
    %20 = math.exp %19 : vector<8x128xf32>
    %cst_20 = arith.constant 1.000000e+00 : f32
    %21 = vector.broadcast %cst_20 : f32 to vector<8x128xf32>
    %22 = arith.addf %21, %20 : vector<8x128xf32>
    %23 = arith.divf %21, %22 : vector<8x128xf32>
    %cst_21 = arith.constant 2.000000e+00 : f32
    %24 = vector.broadcast %cst_21 : f32 to vector<8x128xf32>
    %25 = arith.mulf %24, %23 : vector<8x128xf32>
    %cst_22 = arith.constant 1.000000e+00 : f32
    %26 = vector.broadcast %cst_22 : f32 to vector<8x128xf32>
    %27 = arith.subf %25, %26 : vector<8x128xf32>
    %c32_i32 = arith.constant 32 : i32
    %28 = tpu.dynamic_rotate %23 by %c32_i32 dim 1 : vector<8x128xf32>, i32 -> vector<8x128xf32>
    %c96_i32 = arith.constant 96 : i32
    %29 = tpu.dynamic_rotate %27 by %c96_i32 dim 1 : vector<8x128xf32>, i32 -> vector<8x128xf32>
    %c64_i32 = arith.constant 64 : i32
    %30 = tpu.dynamic_rotate %23 by %c64_i32 dim 1 : vector<8x128xf32>, i32 -> vector<8x128xf32>
    %31 = arith.mulf %23, %11 : vector<8x128xf32>
    %32 = arith.mulf %28, %29 : vector<8x128xf32>
    %33 = arith.addf %31, %32 : vector<8x128xf32>
    %34 = math.tanh %33 : vector<8x128xf32>
    %35 = arith.mulf %30, %34 : vector<8x128xf32>
    %c8 = arith.constant 8 : index
    %c0_23 = arith.constant 0 : index
    %36 = vector.load %arg15[%c8, %c0_23] : memref<64x128xf32, #tpu.memory_space<vmem>>, vector<8x128xf32>
    %c0_24 = arith.constant 0 : index
    %c0_25 = arith.constant 0 : index
    %37 = vector.load %arg2[%c0_24, %c0_25] : memref<128x128xf32, #tpu.memory_space<vmem>>, vector<128x128xf32>
    %cst_26 = arith.constant dense<0.000000e+00> : vector<8x128xf32>
    %38 = tpu.matmul %35, %37, %cst_26 {dimension_numbers = #tpu.dot_dimension_numbers<[1], [0], [0], [1], [0, 0, 1, 1], [], []>} : vector<8x128xf32>, vector<128x128xf32>, vector<8x128xf32> -> vector<8x128xf32>
    %39 = arith.addf %36, %38 : vector<8x128xf32>
    %40 = arith.negf %39 : vector<8x128xf32>
    %41 = math.exp %40 : vector<8x128xf32>
    %cst_27 = arith.constant 1.000000e+00 : f32
    %42 = vector.broadcast %cst_27 : f32 to vector<8x128xf32>
    %43 = arith.addf %42, %41 : vector<8x128xf32>
    %44 = arith.divf %42, %43 : vector<8x128xf32>
    %cst_28 = arith.constant 2.000000e+00 : f32
    %45 = vector.broadcast %cst_28 : f32 to vector<8x128xf32>
    %46 = arith.mulf %45, %44 : vector<8x128xf32>
    %cst_29 = arith.constant 1.000000e+00 : f32
    %47 = vector.broadcast %cst_29 : f32 to vector<8x128xf32>
    %48 = arith.subf %46, %47 : vector<8x128xf32>
    %c32_i32_30 = arith.constant 32 : i32
    %49 = tpu.dynamic_rotate %44 by %c32_i32_30 dim 1 : vector<8x128xf32>, i32 -> vector<8x128xf32>
    %c96_i32_31 = arith.constant 96 : i32
    %50 = tpu.dynamic_rotate %48 by %c96_i32_31 dim 1 : vector<8x128xf32>, i32 -> vector<8x128xf32>
    %c64_i32_32 = arith.constant 64 : i32
    %51 = tpu.dynamic_rotate %44 by %c64_i32_32 dim 1 : vector<8x128xf32>, i32 -> vector<8x128xf32>
    %52 = arith.mulf %44, %33 : vector<8x128xf32>
    %53 = arith.mulf %49, %50 : vector<8x128xf32>
    %54 = arith.addf %52, %53 : vector<8x128xf32>
    %55 = math.tanh %54 : vector<8x128xf32>
    %56 = arith.mulf %51, %55 : vector<8x128xf32>
    %57 = tpu.concatenate %35, %8 in 1 : vector<8x128xf32>, vector<8x128xf32> -> vector<8x256xf32>
    %c0_33 = arith.constant 0 : index
    %c0_34 = arith.constant 0 : index
    %58 = vector.load %arg4[%c0_33, %c0_34] : memref<256x128xf32, #tpu.memory_space<vmem>>, vector<256x128xf32>
    %cst_35 = arith.constant dense<0.000000e+00> : vector<8x128xf32>
    %59 = tpu.matmul %57, %58, %cst_35 {dimension_numbers = #tpu.dot_dimension_numbers<[1], [0], [0], [1], [0, 0, 1, 1], [], []>} : vector<8x256xf32>, vector<256x128xf32>, vector<8x128xf32> -> vector<8x128xf32>
    %c0_36 = arith.constant 0 : index
    %c0_37 = arith.constant 0 : index
    %60 = vector.load %arg5[%c0_36, %c0_37] : memref<1x128xf32, #tpu.memory_space<vmem>>, vector<1x128xf32>
    %61 = vector.broadcast %60 : vector<1x128xf32> to vector<8x128xf32>
    %62 = arith.addf %59, %61 : vector<8x128xf32>
    %63 = arith.negf %62 : vector<8x128xf32>
    %64 = math.exp %63 : vector<8x128xf32>
    %cst_38 = arith.constant 1.000000e+00 : f32
    %65 = vector.broadcast %cst_38 : f32 to vector<8x128xf32>
    %66 = arith.addf %65, %64 : vector<8x128xf32>
    %67 = arith.divf %65, %66 : vector<8x128xf32>
    %cst_39 = arith.constant 2.000000e+00 : f32
    %68 = vector.broadcast %cst_39 : f32 to vector<8x128xf32>
    %69 = arith.mulf %68, %67 : vector<8x128xf32>
    %cst_40 = arith.constant 1.000000e+00 : f32
    %70 = vector.broadcast %cst_40 : f32 to vector<8x128xf32>
    %71 = arith.subf %69, %70 : vector<8x128xf32>
    %c32_i32_41 = arith.constant 32 : i32
    %72 = tpu.dynamic_rotate %67 by %c32_i32_41 dim 1 : vector<8x128xf32>, i32 -> vector<8x128xf32>
    %c96_i32_42 = arith.constant 96 : i32
    %73 = tpu.dynamic_rotate %71 by %c96_i32_42 dim 1 : vector<8x128xf32>, i32 -> vector<8x128xf32>
    %c64_i32_43 = arith.constant 64 : i32
    %74 = tpu.dynamic_rotate %67 by %c64_i32_43 dim 1 : vector<8x128xf32>, i32 -> vector<8x128xf32>
    %75 = arith.mulf %67, %12 : vector<8x128xf32>
    %76 = arith.mulf %72, %73 : vector<8x128xf32>
    %77 = arith.addf %75, %76 : vector<8x128xf32>
    %78 = math.tanh %77 : vector<8x128xf32>
    %79 = arith.mulf %74, %78 : vector<8x128xf32>
    %c16 = arith.constant 16 : index
    %c0_44 = arith.constant 0 : index
    %80 = vector.load %arg15[%c16, %c0_44] : memref<64x128xf32, #tpu.memory_space<vmem>>, vector<8x128xf32>
    %c0_45 = arith.constant 0 : index
    %c0_46 = arith.constant 0 : index
    %81 = vector.load %arg2[%c0_45, %c0_46] : memref<128x128xf32, #tpu.memory_space<vmem>>, vector<128x128xf32>
    %cst_47 = arith.constant dense<0.000000e+00> : vector<8x128xf32>
    %82 = tpu.matmul %56, %81, %cst_47 {dimension_numbers = #tpu.dot_dimension_numbers<[1], [0], [0], [1], [0, 0, 1, 1], [], []>} : vector<8x128xf32>, vector<128x128xf32>, vector<8x128xf32> -> vector<8x128xf32>
    %83 = arith.addf %80, %82 : vector<8x128xf32>
    %84 = arith.negf %83 : vector<8x128xf32>
    %85 = math.exp %84 : vector<8x128xf32>
    %cst_48 = arith.constant 1.000000e+00 : f32
    %86 = vector.broadcast %cst_48 : f32 to vector<8x128xf32>
    %87 = arith.addf %86, %85 : vector<8x128xf32>
    %88 = arith.divf %86, %87 : vector<8x128xf32>
    %cst_49 = arith.constant 2.000000e+00 : f32
    %89 = vector.broadcast %cst_49 : f32 to vector<8x128xf32>
    %90 = arith.mulf %89, %88 : vector<8x128xf32>
    %cst_50 = arith.constant 1.000000e+00 : f32
    %91 = vector.broadcast %cst_50 : f32 to vector<8x128xf32>
    %92 = arith.subf %90, %91 : vector<8x128xf32>
    %c32_i32_51 = arith.constant 32 : i32
    %93 = tpu.dynamic_rotate %88 by %c32_i32_51 dim 1 : vector<8x128xf32>, i32 -> vector<8x128xf32>
    %c96_i32_52 = arith.constant 96 : i32
    %94 = tpu.dynamic_rotate %92 by %c96_i32_52 dim 1 : vector<8x128xf32>, i32 -> vector<8x128xf32>
    %c64_i32_53 = arith.constant 64 : i32
    %95 = tpu.dynamic_rotate %88 by %c64_i32_53 dim 1 : vector<8x128xf32>, i32 -> vector<8x128xf32>
    %96 = arith.mulf %88, %54 : vector<8x128xf32>
    %97 = arith.mulf %93, %94 : vector<8x128xf32>
    %98 = arith.addf %96, %97 : vector<8x128xf32>
    %99 = math.tanh %98 : vector<8x128xf32>
    %100 = arith.mulf %95, %99 : vector<8x128xf32>
    %101 = tpu.concatenate %56, %79 in 1 : vector<8x128xf32>, vector<8x128xf32> -> vector<8x256xf32>
    %c0_54 = arith.constant 0 : index
    %c0_55 = arith.constant 0 : index
    %102 = vector.load %arg4[%c0_54, %c0_55] : memref<256x128xf32, #tpu.memory_space<vmem>>, vector<256x128xf32>
    %cst_56 = arith.constant dense<0.000000e+00> : vector<8x128xf32>
    %103 = tpu.matmul %101, %102, %cst_56 {dimension_numbers = #tpu.dot_dimension_numbers<[1], [0], [0], [1], [0, 0, 1, 1], [], []>} : vector<8x256xf32>, vector<256x128xf32>, vector<8x128xf32> -> vector<8x128xf32>
    %c0_57 = arith.constant 0 : index
    %c0_58 = arith.constant 0 : index
    %104 = vector.load %arg5[%c0_57, %c0_58] : memref<1x128xf32, #tpu.memory_space<vmem>>, vector<1x128xf32>
    %105 = vector.broadcast %104 : vector<1x128xf32> to vector<8x128xf32>
    %106 = arith.addf %103, %105 : vector<8x128xf32>
    %107 = arith.negf %106 : vector<8x128xf32>
    %108 = math.exp %107 : vector<8x128xf32>
    %cst_59 = arith.constant 1.000000e+00 : f32
    %109 = vector.broadcast %cst_59 : f32 to vector<8x128xf32>
    %110 = arith.addf %109, %108 : vector<8x128xf32>
    %111 = arith.divf %109, %110 : vector<8x128xf32>
    %cst_60 = arith.constant 2.000000e+00 : f32
    %112 = vector.broadcast %cst_60 : f32 to vector<8x128xf32>
    %113 = arith.mulf %112, %111 : vector<8x128xf32>
    %cst_61 = arith.constant 1.000000e+00 : f32
    %114 = vector.broadcast %cst_61 : f32 to vector<8x128xf32>
    %115 = arith.subf %113, %114 : vector<8x128xf32>
    %c32_i32_62 = arith.constant 32 : i32
    %116 = tpu.dynamic_rotate %111 by %c32_i32_62 dim 1 : vector<8x128xf32>, i32 -> vector<8x128xf32>
    %c96_i32_63 = arith.constant 96 : i32
    %117 = tpu.dynamic_rotate %115 by %c96_i32_63 dim 1 : vector<8x128xf32>, i32 -> vector<8x128xf32>
    %c64_i32_64 = arith.constant 64 : i32
    %118 = tpu.dynamic_rotate %111 by %c64_i32_64 dim 1 : vector<8x128xf32>, i32 -> vector<8x128xf32>
    %119 = arith.mulf %111, %77 : vector<8x128xf32>
    %120 = arith.mulf %116, %117 : vector<8x128xf32>
    %121 = arith.addf %119, %120 : vector<8x128xf32>
    %122 = math.tanh %121 : vector<8x128xf32>
    %123 = arith.mulf %118, %122 : vector<8x128xf32>
    %124 = tpu.concatenate %79, %9 in 1 : vector<8x128xf32>, vector<8x128xf32> -> vector<8x256xf32>
    %c0_65 = arith.constant 0 : index
    %c0_66 = arith.constant 0 : index
    %125 = vector.load %arg6[%c0_65, %c0_66] : memref<256x128xf32, #tpu.memory_space<vmem>>, vector<256x128xf32>
    %cst_67 = arith.constant dense<0.000000e+00> : vector<8x128xf32>
    %126 = tpu.matmul %124, %125, %cst_67 {dimension_numbers = #tpu.dot_dimension_numbers<[1], [0], [0], [1], [0, 0, 1, 1], [], []>} : vector<8x256xf32>, vector<256x128xf32>, vector<8x128xf32> -> vector<8x128xf32>
    %c0_68 = arith.constant 0 : index
    %c0_69 = arith.constant 0 : index
    %127 = vector.load %arg7[%c0_68, %c0_69] : memref<1x128xf32, #tpu.memory_space<vmem>>, vector<1x128xf32>
    %128 = vector.broadcast %127 : vector<1x128xf32> to vector<8x128xf32>
    %129 = arith.addf %126, %128 : vector<8x128xf32>
    %130 = arith.negf %129 : vector<8x128xf32>
    %131 = math.exp %130 : vector<8x128xf32>
    %cst_70 = arith.constant 1.000000e+00 : f32
    %132 = vector.broadcast %cst_70 : f32 to vector<8x128xf32>
    %133 = arith.addf %132, %131 : vector<8x128xf32>
    %134 = arith.divf %132, %133 : vector<8x128xf32>
    %cst_71 = arith.constant 2.000000e+00 : f32
    %135 = vector.broadcast %cst_71 : f32 to vector<8x128xf32>
    %136 = arith.mulf %135, %134 : vector<8x128xf32>
    %cst_72 = arith.constant 1.000000e+00 : f32
    %137 = vector.broadcast %cst_72 : f32 to vector<8x128xf32>
    %138 = arith.subf %136, %137 : vector<8x128xf32>
    %c32_i32_73 = arith.constant 32 : i32
    %139 = tpu.dynamic_rotate %134 by %c32_i32_73 dim 1 : vector<8x128xf32>, i32 -> vector<8x128xf32>
    %c96_i32_74 = arith.constant 96 : i32
    %140 = tpu.dynamic_rotate %138 by %c96_i32_74 dim 1 : vector<8x128xf32>, i32 -> vector<8x128xf32>
    %c64_i32_75 = arith.constant 64 : i32
    %141 = tpu.dynamic_rotate %134 by %c64_i32_75 dim 1 : vector<8x128xf32>, i32 -> vector<8x128xf32>
    %142 = arith.mulf %134, %13 : vector<8x128xf32>
    %143 = arith.mulf %139, %140 : vector<8x128xf32>
    %144 = arith.addf %142, %143 : vector<8x128xf32>
    %145 = math.tanh %144 : vector<8x128xf32>
    %146 = arith.mulf %141, %145 : vector<8x128xf32>
    %c24 = arith.constant 24 : index
    %c0_76 = arith.constant 0 : index
    %147 = vector.load %arg15[%c24, %c0_76] : memref<64x128xf32, #tpu.memory_space<vmem>>, vector<8x128xf32>
    %c0_77 = arith.constant 0 : index
    %c0_78 = arith.constant 0 : index
    %148 = vector.load %arg2[%c0_77, %c0_78] : memref<128x128xf32, #tpu.memory_space<vmem>>, vector<128x128xf32>
    %cst_79 = arith.constant dense<0.000000e+00> : vector<8x128xf32>
    %149 = tpu.matmul %100, %148, %cst_79 {dimension_numbers = #tpu.dot_dimension_numbers<[1], [0], [0], [1], [0, 0, 1, 1], [], []>} : vector<8x128xf32>, vector<128x128xf32>, vector<8x128xf32> -> vector<8x128xf32>
    %150 = arith.addf %147, %149 : vector<8x128xf32>
    %151 = arith.negf %150 : vector<8x128xf32>
    %152 = math.exp %151 : vector<8x128xf32>
    %cst_80 = arith.constant 1.000000e+00 : f32
    %153 = vector.broadcast %cst_80 : f32 to vector<8x128xf32>
    %154 = arith.addf %153, %152 : vector<8x128xf32>
    %155 = arith.divf %153, %154 : vector<8x128xf32>
    %cst_81 = arith.constant 2.000000e+00 : f32
    %156 = vector.broadcast %cst_81 : f32 to vector<8x128xf32>
    %157 = arith.mulf %156, %155 : vector<8x128xf32>
    %cst_82 = arith.constant 1.000000e+00 : f32
    %158 = vector.broadcast %cst_82 : f32 to vector<8x128xf32>
    %159 = arith.subf %157, %158 : vector<8x128xf32>
    %c32_i32_83 = arith.constant 32 : i32
    %160 = tpu.dynamic_rotate %155 by %c32_i32_83 dim 1 : vector<8x128xf32>, i32 -> vector<8x128xf32>
    %c96_i32_84 = arith.constant 96 : i32
    %161 = tpu.dynamic_rotate %159 by %c96_i32_84 dim 1 : vector<8x128xf32>, i32 -> vector<8x128xf32>
    %c64_i32_85 = arith.constant 64 : i32
    %162 = tpu.dynamic_rotate %155 by %c64_i32_85 dim 1 : vector<8x128xf32>, i32 -> vector<8x128xf32>
    %163 = arith.mulf %155, %98 : vector<8x128xf32>
    %164 = arith.mulf %160, %161 : vector<8x128xf32>
    %165 = arith.addf %163, %164 : vector<8x128xf32>
    %166 = math.tanh %165 : vector<8x128xf32>
    %167 = arith.mulf %162, %166 : vector<8x128xf32>
    %168 = tpu.concatenate %100, %123 in 1 : vector<8x128xf32>, vector<8x128xf32> -> vector<8x256xf32>
    %c0_86 = arith.constant 0 : index
    %c0_87 = arith.constant 0 : index
    %169 = vector.load %arg4[%c0_86, %c0_87] : memref<256x128xf32, #tpu.memory_space<vmem>>, vector<256x128xf32>
    %cst_88 = arith.constant dense<0.000000e+00> : vector<8x128xf32>
    %170 = tpu.matmul %168, %169, %cst_88 {dimension_numbers = #tpu.dot_dimension_numbers<[1], [0], [0], [1], [0, 0, 1, 1], [], []>} : vector<8x256xf32>, vector<256x128xf32>, vector<8x128xf32> -> vector<8x128xf32>
    %c0_89 = arith.constant 0 : index
    %c0_90 = arith.constant 0 : index
    %171 = vector.load %arg5[%c0_89, %c0_90] : memref<1x128xf32, #tpu.memory_space<vmem>>, vector<1x128xf32>
    %172 = vector.broadcast %171 : vector<1x128xf32> to vector<8x128xf32>
    %173 = arith.addf %170, %172 : vector<8x128xf32>
    %174 = arith.negf %173 : vector<8x128xf32>
    %175 = math.exp %174 : vector<8x128xf32>
    %cst_91 = arith.constant 1.000000e+00 : f32
    %176 = vector.broadcast %cst_91 : f32 to vector<8x128xf32>
    %177 = arith.addf %176, %175 : vector<8x128xf32>
    %178 = arith.divf %176, %177 : vector<8x128xf32>
    %cst_92 = arith.constant 2.000000e+00 : f32
    %179 = vector.broadcast %cst_92 : f32 to vector<8x128xf32>
    %180 = arith.mulf %179, %178 : vector<8x128xf32>
    %cst_93 = arith.constant 1.000000e+00 : f32
    %181 = vector.broadcast %cst_93 : f32 to vector<8x128xf32>
    %182 = arith.subf %180, %181 : vector<8x128xf32>
    %c32_i32_94 = arith.constant 32 : i32
    %183 = tpu.dynamic_rotate %178 by %c32_i32_94 dim 1 : vector<8x128xf32>, i32 -> vector<8x128xf32>
    %c96_i32_95 = arith.constant 96 : i32
    %184 = tpu.dynamic_rotate %182 by %c96_i32_95 dim 1 : vector<8x128xf32>, i32 -> vector<8x128xf32>
    %c64_i32_96 = arith.constant 64 : i32
    %185 = tpu.dynamic_rotate %178 by %c64_i32_96 dim 1 : vector<8x128xf32>, i32 -> vector<8x128xf32>
    %186 = arith.mulf %178, %121 : vector<8x128xf32>
    %187 = arith.mulf %183, %184 : vector<8x128xf32>
    %188 = arith.addf %186, %187 : vector<8x128xf32>
    %189 = math.tanh %188 : vector<8x128xf32>
    %190 = arith.mulf %185, %189 : vector<8x128xf32>
    %191 = tpu.concatenate %123, %146 in 1 : vector<8x128xf32>, vector<8x128xf32> -> vector<8x256xf32>
    %c0_97 = arith.constant 0 : index
    %c0_98 = arith.constant 0 : index
    %192 = vector.load %arg6[%c0_97, %c0_98] : memref<256x128xf32, #tpu.memory_space<vmem>>, vector<256x128xf32>
    %cst_99 = arith.constant dense<0.000000e+00> : vector<8x128xf32>
    %193 = tpu.matmul %191, %192, %cst_99 {dimension_numbers = #tpu.dot_dimension_numbers<[1], [0], [0], [1], [0, 0, 1, 1], [], []>} : vector<8x256xf32>, vector<256x128xf32>, vector<8x128xf32> -> vector<8x128xf32>
    %c0_100 = arith.constant 0 : index
    %c0_101 = arith.constant 0 : index
    %194 = vector.load %arg7[%c0_100, %c0_101] : memref<1x128xf32, #tpu.memory_space<vmem>>, vector<1x128xf32>
    %195 = vector.broadcast %194 : vector<1x128xf32> to vector<8x128xf32>
    %196 = arith.addf %193, %195 : vector<8x128xf32>
    %197 = arith.negf %196 : vector<8x128xf32>
    %198 = math.exp %197 : vector<8x128xf32>
    %cst_102 = arith.constant 1.000000e+00 : f32
    %199 = vector.broadcast %cst_102 : f32 to vector<8x128xf32>
    %200 = arith.addf %199, %198 : vector<8x128xf32>
    %201 = arith.divf %199, %200 : vector<8x128xf32>
    %cst_103 = arith.constant 2.000000e+00 : f32
    %202 = vector.broadcast %cst_103 : f32 to vector<8x128xf32>
    %203 = arith.mulf %202, %201 : vector<8x128xf32>
    %cst_104 = arith.constant 1.000000e+00 : f32
    %204 = vector.broadcast %cst_104 : f32 to vector<8x128xf32>
    %205 = arith.subf %203, %204 : vector<8x128xf32>
    %c32_i32_105 = arith.constant 32 : i32
    %206 = tpu.dynamic_rotate %201 by %c32_i32_105 dim 1 : vector<8x128xf32>, i32 -> vector<8x128xf32>
    %c96_i32_106 = arith.constant 96 : i32
    %207 = tpu.dynamic_rotate %205 by %c96_i32_106 dim 1 : vector<8x128xf32>, i32 -> vector<8x128xf32>
    %c64_i32_107 = arith.constant 64 : i32
    %208 = tpu.dynamic_rotate %201 by %c64_i32_107 dim 1 : vector<8x128xf32>, i32 -> vector<8x128xf32>
    %209 = arith.mulf %201, %144 : vector<8x128xf32>
    %210 = arith.mulf %206, %207 : vector<8x128xf32>
    %211 = arith.addf %209, %210 : vector<8x128xf32>
    %212 = math.tanh %211 : vector<8x128xf32>
    %213 = arith.mulf %208, %212 : vector<8x128xf32>
    %214 = tpu.concatenate %146, %10 in 1 : vector<8x128xf32>, vector<8x128xf32> -> vector<8x256xf32>
    %c0_108 = arith.constant 0 : index
    %c0_109 = arith.constant 0 : index
    %215 = vector.load %arg8[%c0_108, %c0_109] : memref<256x128xf32, #tpu.memory_space<vmem>>, vector<256x128xf32>
    %cst_110 = arith.constant dense<0.000000e+00> : vector<8x128xf32>
    %216 = tpu.matmul %214, %215, %cst_110 {dimension_numbers = #tpu.dot_dimension_numbers<[1], [0], [0], [1], [0, 0, 1, 1], [], []>} : vector<8x256xf32>, vector<256x128xf32>, vector<8x128xf32> -> vector<8x128xf32>
    %c0_111 = arith.constant 0 : index
    %c0_112 = arith.constant 0 : index
    %217 = vector.load %arg9[%c0_111, %c0_112] : memref<1x128xf32, #tpu.memory_space<vmem>>, vector<1x128xf32>
    %218 = vector.broadcast %217 : vector<1x128xf32> to vector<8x128xf32>
    %219 = arith.addf %216, %218 : vector<8x128xf32>
    %220 = arith.negf %219 : vector<8x128xf32>
    %221 = math.exp %220 : vector<8x128xf32>
    %cst_113 = arith.constant 1.000000e+00 : f32
    %222 = vector.broadcast %cst_113 : f32 to vector<8x128xf32>
    %223 = arith.addf %222, %221 : vector<8x128xf32>
    %224 = arith.divf %222, %223 : vector<8x128xf32>
    %cst_114 = arith.constant 2.000000e+00 : f32
    %225 = vector.broadcast %cst_114 : f32 to vector<8x128xf32>
    %226 = arith.mulf %225, %224 : vector<8x128xf32>
    %cst_115 = arith.constant 1.000000e+00 : f32
    %227 = vector.broadcast %cst_115 : f32 to vector<8x128xf32>
    %228 = arith.subf %226, %227 : vector<8x128xf32>
    %c32_i32_116 = arith.constant 32 : i32
    %229 = tpu.dynamic_rotate %224 by %c32_i32_116 dim 1 : vector<8x128xf32>, i32 -> vector<8x128xf32>
    %c96_i32_117 = arith.constant 96 : i32
    %230 = tpu.dynamic_rotate %228 by %c96_i32_117 dim 1 : vector<8x128xf32>, i32 -> vector<8x128xf32>
    %c64_i32_118 = arith.constant 64 : i32
    %231 = tpu.dynamic_rotate %224 by %c64_i32_118 dim 1 : vector<8x128xf32>, i32 -> vector<8x128xf32>
    %232 = arith.mulf %224, %14 : vector<8x128xf32>
    %233 = arith.mulf %229, %230 : vector<8x128xf32>
    %234 = arith.addf %232, %233 : vector<8x128xf32>
    %235 = math.tanh %234 : vector<8x128xf32>
    %236 = arith.mulf %231, %235 : vector<8x128xf32>
    %c32 = arith.constant 32 : index
    %c0_119 = arith.constant 0 : index
    %237 = vector.load %arg15[%c32, %c0_119] : memref<64x128xf32, #tpu.memory_space<vmem>>, vector<8x128xf32>
    %c0_120 = arith.constant 0 : index
    %c0_121 = arith.constant 0 : index
    %238 = vector.load %arg2[%c0_120, %c0_121] : memref<128x128xf32, #tpu.memory_space<vmem>>, vector<128x128xf32>
    %cst_122 = arith.constant dense<0.000000e+00> : vector<8x128xf32>
    %239 = tpu.matmul %167, %238, %cst_122 {dimension_numbers = #tpu.dot_dimension_numbers<[1], [0], [0], [1], [0, 0, 1, 1], [], []>} : vector<8x128xf32>, vector<128x128xf32>, vector<8x128xf32> -> vector<8x128xf32>
    %240 = arith.addf %237, %239 : vector<8x128xf32>
    %241 = arith.negf %240 : vector<8x128xf32>
    %242 = math.exp %241 : vector<8x128xf32>
    %cst_123 = arith.constant 1.000000e+00 : f32
    %243 = vector.broadcast %cst_123 : f32 to vector<8x128xf32>
    %244 = arith.addf %243, %242 : vector<8x128xf32>
    %245 = arith.divf %243, %244 : vector<8x128xf32>
    %cst_124 = arith.constant 2.000000e+00 : f32
    %246 = vector.broadcast %cst_124 : f32 to vector<8x128xf32>
    %247 = arith.mulf %246, %245 : vector<8x128xf32>
    %cst_125 = arith.constant 1.000000e+00 : f32
    %248 = vector.broadcast %cst_125 : f32 to vector<8x128xf32>
    %249 = arith.subf %247, %248 : vector<8x128xf32>
    %c32_i32_126 = arith.constant 32 : i32
    %250 = tpu.dynamic_rotate %245 by %c32_i32_126 dim 1 : vector<8x128xf32>, i32 -> vector<8x128xf32>
    %c96_i32_127 = arith.constant 96 : i32
    %251 = tpu.dynamic_rotate %249 by %c96_i32_127 dim 1 : vector<8x128xf32>, i32 -> vector<8x128xf32>
    %c64_i32_128 = arith.constant 64 : i32
    %252 = tpu.dynamic_rotate %245 by %c64_i32_128 dim 1 : vector<8x128xf32>, i32 -> vector<8x128xf32>
    %253 = arith.mulf %245, %165 : vector<8x128xf32>
    %254 = arith.mulf %250, %251 : vector<8x128xf32>
    %255 = arith.addf %253, %254 : vector<8x128xf32>
    %256 = math.tanh %255 : vector<8x128xf32>
    %257 = arith.mulf %252, %256 : vector<8x128xf32>
    %258 = tpu.concatenate %167, %190 in 1 : vector<8x128xf32>, vector<8x128xf32> -> vector<8x256xf32>
    %c0_129 = arith.constant 0 : index
    %c0_130 = arith.constant 0 : index
    %259 = vector.load %arg4[%c0_129, %c0_130] : memref<256x128xf32, #tpu.memory_space<vmem>>, vector<256x128xf32>
    %cst_131 = arith.constant dense<0.000000e+00> : vector<8x128xf32>
    %260 = tpu.matmul %258, %259, %cst_131 {dimension_numbers = #tpu.dot_dimension_numbers<[1], [0], [0], [1], [0, 0, 1, 1], [], []>} : vector<8x256xf32>, vector<256x128xf32>, vector<8x128xf32> -> vector<8x128xf32>
    %c0_132 = arith.constant 0 : index
    %c0_133 = arith.constant 0 : index
    %261 = vector.load %arg5[%c0_132, %c0_133] : memref<1x128xf32, #tpu.memory_space<vmem>>, vector<1x128xf32>
    %262 = vector.broadcast %261 : vector<1x128xf32> to vector<8x128xf32>
    %263 = arith.addf %260, %262 : vector<8x128xf32>
    %264 = arith.negf %263 : vector<8x128xf32>
    %265 = math.exp %264 : vector<8x128xf32>
    %cst_134 = arith.constant 1.000000e+00 : f32
    %266 = vector.broadcast %cst_134 : f32 to vector<8x128xf32>
    %267 = arith.addf %266, %265 : vector<8x128xf32>
    %268 = arith.divf %266, %267 : vector<8x128xf32>
    %cst_135 = arith.constant 2.000000e+00 : f32
    %269 = vector.broadcast %cst_135 : f32 to vector<8x128xf32>
    %270 = arith.mulf %269, %268 : vector<8x128xf32>
    %cst_136 = arith.constant 1.000000e+00 : f32
    %271 = vector.broadcast %cst_136 : f32 to vector<8x128xf32>
    %272 = arith.subf %270, %271 : vector<8x128xf32>
    %c32_i32_137 = arith.constant 32 : i32
    %273 = tpu.dynamic_rotate %268 by %c32_i32_137 dim 1 : vector<8x128xf32>, i32 -> vector<8x128xf32>
    %c96_i32_138 = arith.constant 96 : i32
    %274 = tpu.dynamic_rotate %272 by %c96_i32_138 dim 1 : vector<8x128xf32>, i32 -> vector<8x128xf32>
    %c64_i32_139 = arith.constant 64 : i32
    %275 = tpu.dynamic_rotate %268 by %c64_i32_139 dim 1 : vector<8x128xf32>, i32 -> vector<8x128xf32>
    %276 = arith.mulf %268, %188 : vector<8x128xf32>
    %277 = arith.mulf %273, %274 : vector<8x128xf32>
    %278 = arith.addf %276, %277 : vector<8x128xf32>
    %279 = math.tanh %278 : vector<8x128xf32>
    %280 = arith.mulf %275, %279 : vector<8x128xf32>
    %281 = tpu.concatenate %190, %213 in 1 : vector<8x128xf32>, vector<8x128xf32> -> vector<8x256xf32>
    %c0_140 = arith.constant 0 : index
    %c0_141 = arith.constant 0 : index
    %282 = vector.load %arg6[%c0_140, %c0_141] : memref<256x128xf32, #tpu.memory_space<vmem>>, vector<256x128xf32>
    %cst_142 = arith.constant dense<0.000000e+00> : vector<8x128xf32>
    %283 = tpu.matmul %281, %282, %cst_142 {dimension_numbers = #tpu.dot_dimension_numbers<[1], [0], [0], [1], [0, 0, 1, 1], [], []>} : vector<8x256xf32>, vector<256x128xf32>, vector<8x128xf32> -> vector<8x128xf32>
    %c0_143 = arith.constant 0 : index
    %c0_144 = arith.constant 0 : index
    %284 = vector.load %arg7[%c0_143, %c0_144] : memref<1x128xf32, #tpu.memory_space<vmem>>, vector<1x128xf32>
    %285 = vector.broadcast %284 : vector<1x128xf32> to vector<8x128xf32>
    %286 = arith.addf %283, %285 : vector<8x128xf32>
    %287 = arith.negf %286 : vector<8x128xf32>
    %288 = math.exp %287 : vector<8x128xf32>
    %cst_145 = arith.constant 1.000000e+00 : f32
    %289 = vector.broadcast %cst_145 : f32 to vector<8x128xf32>
    %290 = arith.addf %289, %288 : vector<8x128xf32>
    %291 = arith.divf %289, %290 : vector<8x128xf32>
    %cst_146 = arith.constant 2.000000e+00 : f32
    %292 = vector.broadcast %cst_146 : f32 to vector<8x128xf32>
    %293 = arith.mulf %292, %291 : vector<8x128xf32>
    %cst_147 = arith.constant 1.000000e+00 : f32
    %294 = vector.broadcast %cst_147 : f32 to vector<8x128xf32>
    %295 = arith.subf %293, %294 : vector<8x128xf32>
    %c32_i32_148 = arith.constant 32 : i32
    %296 = tpu.dynamic_rotate %291 by %c32_i32_148 dim 1 : vector<8x128xf32>, i32 -> vector<8x128xf32>
    %c96_i32_149 = arith.constant 96 : i32
    %297 = tpu.dynamic_rotate %295 by %c96_i32_149 dim 1 : vector<8x128xf32>, i32 -> vector<8x128xf32>
    %c64_i32_150 = arith.constant 64 : i32
    %298 = tpu.dynamic_rotate %291 by %c64_i32_150 dim 1 : vector<8x128xf32>, i32 -> vector<8x128xf32>
    %299 = arith.mulf %291, %211 : vector<8x128xf32>
    %300 = arith.mulf %296, %297 : vector<8x128xf32>
    %301 = arith.addf %299, %300 : vector<8x128xf32>
    %302 = math.tanh %301 : vector<8x128xf32>
    %303 = arith.mulf %298, %302 : vector<8x128xf32>
    %304 = tpu.concatenate %213, %236 in 1 : vector<8x128xf32>, vector<8x128xf32> -> vector<8x256xf32>
    %c0_151 = arith.constant 0 : index
    %c0_152 = arith.constant 0 : index
    %305 = vector.load %arg8[%c0_151, %c0_152] : memref<256x128xf32, #tpu.memory_space<vmem>>, vector<256x128xf32>
    %cst_153 = arith.constant dense<0.000000e+00> : vector<8x128xf32>
    %306 = tpu.matmul %304, %305, %cst_153 {dimension_numbers = #tpu.dot_dimension_numbers<[1], [0], [0], [1], [0, 0, 1, 1], [], []>} : vector<8x256xf32>, vector<256x128xf32>, vector<8x128xf32> -> vector<8x128xf32>
    %c0_154 = arith.constant 0 : index
    %c0_155 = arith.constant 0 : index
    %307 = vector.load %arg9[%c0_154, %c0_155] : memref<1x128xf32, #tpu.memory_space<vmem>>, vector<1x128xf32>
    %308 = vector.broadcast %307 : vector<1x128xf32> to vector<8x128xf32>
    %309 = arith.addf %306, %308 : vector<8x128xf32>
    %310 = arith.negf %309 : vector<8x128xf32>
    %311 = math.exp %310 : vector<8x128xf32>
    %cst_156 = arith.constant 1.000000e+00 : f32
    %312 = vector.broadcast %cst_156 : f32 to vector<8x128xf32>
    %313 = arith.addf %312, %311 : vector<8x128xf32>
    %314 = arith.divf %312, %313 : vector<8x128xf32>
    %cst_157 = arith.constant 2.000000e+00 : f32
    %315 = vector.broadcast %cst_157 : f32 to vector<8x128xf32>
    %316 = arith.mulf %315, %314 : vector<8x128xf32>
    %cst_158 = arith.constant 1.000000e+00 : f32
    %317 = vector.broadcast %cst_158 : f32 to vector<8x128xf32>
    %318 = arith.subf %316, %317 : vector<8x128xf32>
    %c32_i32_159 = arith.constant 32 : i32
    %319 = tpu.dynamic_rotate %314 by %c32_i32_159 dim 1 : vector<8x128xf32>, i32 -> vector<8x128xf32>
    %c96_i32_160 = arith.constant 96 : i32
    %320 = tpu.dynamic_rotate %318 by %c96_i32_160 dim 1 : vector<8x128xf32>, i32 -> vector<8x128xf32>
    %c64_i32_161 = arith.constant 64 : i32
    %321 = tpu.dynamic_rotate %314 by %c64_i32_161 dim 1 : vector<8x128xf32>, i32 -> vector<8x128xf32>
    %322 = arith.mulf %314, %234 : vector<8x128xf32>
    %323 = arith.mulf %319, %320 : vector<8x128xf32>
    %324 = arith.addf %322, %323 : vector<8x128xf32>
    %325 = math.tanh %324 : vector<8x128xf32>
    %326 = arith.mulf %321, %325 : vector<8x128xf32>
    %c40 = arith.constant 40 : index
    %c0_162 = arith.constant 0 : index
    %327 = vector.load %arg15[%c40, %c0_162] : memref<64x128xf32, #tpu.memory_space<vmem>>, vector<8x128xf32>
    %c0_163 = arith.constant 0 : index
    %c0_164 = arith.constant 0 : index
    %328 = vector.load %arg2[%c0_163, %c0_164] : memref<128x128xf32, #tpu.memory_space<vmem>>, vector<128x128xf32>
    %cst_165 = arith.constant dense<0.000000e+00> : vector<8x128xf32>
    %329 = tpu.matmul %257, %328, %cst_165 {dimension_numbers = #tpu.dot_dimension_numbers<[1], [0], [0], [1], [0, 0, 1, 1], [], []>} : vector<8x128xf32>, vector<128x128xf32>, vector<8x128xf32> -> vector<8x128xf32>
    %330 = arith.addf %327, %329 : vector<8x128xf32>
    %331 = arith.negf %330 : vector<8x128xf32>
    %332 = math.exp %331 : vector<8x128xf32>
    %cst_166 = arith.constant 1.000000e+00 : f32
    %333 = vector.broadcast %cst_166 : f32 to vector<8x128xf32>
    %334 = arith.addf %333, %332 : vector<8x128xf32>
    %335 = arith.divf %333, %334 : vector<8x128xf32>
    %cst_167 = arith.constant 2.000000e+00 : f32
    %336 = vector.broadcast %cst_167 : f32 to vector<8x128xf32>
    %337 = arith.mulf %336, %335 : vector<8x128xf32>
    %cst_168 = arith.constant 1.000000e+00 : f32
    %338 = vector.broadcast %cst_168 : f32 to vector<8x128xf32>
    %339 = arith.subf %337, %338 : vector<8x128xf32>
    %c32_i32_169 = arith.constant 32 : i32
    %340 = tpu.dynamic_rotate %335 by %c32_i32_169 dim 1 : vector<8x128xf32>, i32 -> vector<8x128xf32>
    %c96_i32_170 = arith.constant 96 : i32
    %341 = tpu.dynamic_rotate %339 by %c96_i32_170 dim 1 : vector<8x128xf32>, i32 -> vector<8x128xf32>
    %c64_i32_171 = arith.constant 64 : i32
    %342 = tpu.dynamic_rotate %335 by %c64_i32_171 dim 1 : vector<8x128xf32>, i32 -> vector<8x128xf32>
    %343 = arith.mulf %335, %255 : vector<8x128xf32>
    %344 = arith.mulf %340, %341 : vector<8x128xf32>
    %345 = arith.addf %343, %344 : vector<8x128xf32>
    %346 = math.tanh %345 : vector<8x128xf32>
    %347 = arith.mulf %342, %346 : vector<8x128xf32>
    %348 = tpu.concatenate %257, %280 in 1 : vector<8x128xf32>, vector<8x128xf32> -> vector<8x256xf32>
    %c0_172 = arith.constant 0 : index
    %c0_173 = arith.constant 0 : index
    %349 = vector.load %arg4[%c0_172, %c0_173] : memref<256x128xf32, #tpu.memory_space<vmem>>, vector<256x128xf32>
    %cst_174 = arith.constant dense<0.000000e+00> : vector<8x128xf32>
    %350 = tpu.matmul %348, %349, %cst_174 {dimension_numbers = #tpu.dot_dimension_numbers<[1], [0], [0], [1], [0, 0, 1, 1], [], []>} : vector<8x256xf32>, vector<256x128xf32>, vector<8x128xf32> -> vector<8x128xf32>
    %c0_175 = arith.constant 0 : index
    %c0_176 = arith.constant 0 : index
    %351 = vector.load %arg5[%c0_175, %c0_176] : memref<1x128xf32, #tpu.memory_space<vmem>>, vector<1x128xf32>
    %352 = vector.broadcast %351 : vector<1x128xf32> to vector<8x128xf32>
    %353 = arith.addf %350, %352 : vector<8x128xf32>
    %354 = arith.negf %353 : vector<8x128xf32>
    %355 = math.exp %354 : vector<8x128xf32>
    %cst_177 = arith.constant 1.000000e+00 : f32
    %356 = vector.broadcast %cst_177 : f32 to vector<8x128xf32>
    %357 = arith.addf %356, %355 : vector<8x128xf32>
    %358 = arith.divf %356, %357 : vector<8x128xf32>
    %cst_178 = arith.constant 2.000000e+00 : f32
    %359 = vector.broadcast %cst_178 : f32 to vector<8x128xf32>
    %360 = arith.mulf %359, %358 : vector<8x128xf32>
    %cst_179 = arith.constant 1.000000e+00 : f32
    %361 = vector.broadcast %cst_179 : f32 to vector<8x128xf32>
    %362 = arith.subf %360, %361 : vector<8x128xf32>
    %c32_i32_180 = arith.constant 32 : i32
    %363 = tpu.dynamic_rotate %358 by %c32_i32_180 dim 1 : vector<8x128xf32>, i32 -> vector<8x128xf32>
    %c96_i32_181 = arith.constant 96 : i32
    %364 = tpu.dynamic_rotate %362 by %c96_i32_181 dim 1 : vector<8x128xf32>, i32 -> vector<8x128xf32>
    %c64_i32_182 = arith.constant 64 : i32
    %365 = tpu.dynamic_rotate %358 by %c64_i32_182 dim 1 : vector<8x128xf32>, i32 -> vector<8x128xf32>
    %366 = arith.mulf %358, %278 : vector<8x128xf32>
    %367 = arith.mulf %363, %364 : vector<8x128xf32>
    %368 = arith.addf %366, %367 : vector<8x128xf32>
    %369 = math.tanh %368 : vector<8x128xf32>
    %370 = arith.mulf %365, %369 : vector<8x128xf32>
    %371 = tpu.concatenate %280, %303 in 1 : vector<8x128xf32>, vector<8x128xf32> -> vector<8x256xf32>
    %c0_183 = arith.constant 0 : index
    %c0_184 = arith.constant 0 : index
    %372 = vector.load %arg6[%c0_183, %c0_184] : memref<256x128xf32, #tpu.memory_space<vmem>>, vector<256x128xf32>
    %cst_185 = arith.constant dense<0.000000e+00> : vector<8x128xf32>
    %373 = tpu.matmul %371, %372, %cst_185 {dimension_numbers = #tpu.dot_dimension_numbers<[1], [0], [0], [1], [0, 0, 1, 1], [], []>} : vector<8x256xf32>, vector<256x128xf32>, vector<8x128xf32> -> vector<8x128xf32>
    %c0_186 = arith.constant 0 : index
    %c0_187 = arith.constant 0 : index
    %374 = vector.load %arg7[%c0_186, %c0_187] : memref<1x128xf32, #tpu.memory_space<vmem>>, vector<1x128xf32>
    %375 = vector.broadcast %374 : vector<1x128xf32> to vector<8x128xf32>
    %376 = arith.addf %373, %375 : vector<8x128xf32>
    %377 = arith.negf %376 : vector<8x128xf32>
    %378 = math.exp %377 : vector<8x128xf32>
    %cst_188 = arith.constant 1.000000e+00 : f32
    %379 = vector.broadcast %cst_188 : f32 to vector<8x128xf32>
    %380 = arith.addf %379, %378 : vector<8x128xf32>
    %381 = arith.divf %379, %380 : vector<8x128xf32>
    %cst_189 = arith.constant 2.000000e+00 : f32
    %382 = vector.broadcast %cst_189 : f32 to vector<8x128xf32>
    %383 = arith.mulf %382, %381 : vector<8x128xf32>
    %cst_190 = arith.constant 1.000000e+00 : f32
    %384 = vector.broadcast %cst_190 : f32 to vector<8x128xf32>
    %385 = arith.subf %383, %384 : vector<8x128xf32>
    %c32_i32_191 = arith.constant 32 : i32
    %386 = tpu.dynamic_rotate %381 by %c32_i32_191 dim 1 : vector<8x128xf32>, i32 -> vector<8x128xf32>
    %c96_i32_192 = arith.constant 96 : i32
    %387 = tpu.dynamic_rotate %385 by %c96_i32_192 dim 1 : vector<8x128xf32>, i32 -> vector<8x128xf32>
    %c64_i32_193 = arith.constant 64 : i32
    %388 = tpu.dynamic_rotate %381 by %c64_i32_193 dim 1 : vector<8x128xf32>, i32 -> vector<8x128xf32>
    %389 = arith.mulf %381, %301 : vector<8x128xf32>
    %390 = arith.mulf %386, %387 : vector<8x128xf32>
    %391 = arith.addf %389, %390 : vector<8x128xf32>
    %392 = math.tanh %391 : vector<8x128xf32>
    %393 = arith.mulf %388, %392 : vector<8x128xf32>
    %394 = tpu.concatenate %303, %326 in 1 : vector<8x128xf32>, vector<8x128xf32> -> vector<8x256xf32>
    %c0_194 = arith.constant 0 : index
    %c0_195 = arith.constant 0 : index
    %395 = vector.load %arg8[%c0_194, %c0_195] : memref<256x128xf32, #tpu.memory_space<vmem>>, vector<256x128xf32>
    %cst_196 = arith.constant dense<0.000000e+00> : vector<8x128xf32>
    %396 = tpu.matmul %394, %395, %cst_196 {dimension_numbers = #tpu.dot_dimension_numbers<[1], [0], [0], [1], [0, 0, 1, 1], [], []>} : vector<8x256xf32>, vector<256x128xf32>, vector<8x128xf32> -> vector<8x128xf32>
    %c0_197 = arith.constant 0 : index
    %c0_198 = arith.constant 0 : index
    %397 = vector.load %arg9[%c0_197, %c0_198] : memref<1x128xf32, #tpu.memory_space<vmem>>, vector<1x128xf32>
    %398 = vector.broadcast %397 : vector<1x128xf32> to vector<8x128xf32>
    %399 = arith.addf %396, %398 : vector<8x128xf32>
    %400 = arith.negf %399 : vector<8x128xf32>
    %401 = math.exp %400 : vector<8x128xf32>
    %cst_199 = arith.constant 1.000000e+00 : f32
    %402 = vector.broadcast %cst_199 : f32 to vector<8x128xf32>
    %403 = arith.addf %402, %401 : vector<8x128xf32>
    %404 = arith.divf %402, %403 : vector<8x128xf32>
    %cst_200 = arith.constant 2.000000e+00 : f32
    %405 = vector.broadcast %cst_200 : f32 to vector<8x128xf32>
    %406 = arith.mulf %405, %404 : vector<8x128xf32>
    %cst_201 = arith.constant 1.000000e+00 : f32
    %407 = vector.broadcast %cst_201 : f32 to vector<8x128xf32>
    %408 = arith.subf %406, %407 : vector<8x128xf32>
    %c32_i32_202 = arith.constant 32 : i32
    %409 = tpu.dynamic_rotate %404 by %c32_i32_202 dim 1 : vector<8x128xf32>, i32 -> vector<8x128xf32>
    %c96_i32_203 = arith.constant 96 : i32
    %410 = tpu.dynamic_rotate %408 by %c96_i32_203 dim 1 : vector<8x128xf32>, i32 -> vector<8x128xf32>
    %c64_i32_204 = arith.constant 64 : i32
    %411 = tpu.dynamic_rotate %404 by %c64_i32_204 dim 1 : vector<8x128xf32>, i32 -> vector<8x128xf32>
    %412 = arith.mulf %404, %324 : vector<8x128xf32>
    %413 = arith.mulf %409, %410 : vector<8x128xf32>
    %414 = arith.addf %412, %413 : vector<8x128xf32>
    %415 = math.tanh %414 : vector<8x128xf32>
    %416 = arith.mulf %411, %415 : vector<8x128xf32>
    %c48 = arith.constant 48 : index
    %c0_205 = arith.constant 0 : index
    %417 = vector.load %arg15[%c48, %c0_205] : memref<64x128xf32, #tpu.memory_space<vmem>>, vector<8x128xf32>
    %c0_206 = arith.constant 0 : index
    %c0_207 = arith.constant 0 : index
    %418 = vector.load %arg2[%c0_206, %c0_207] : memref<128x128xf32, #tpu.memory_space<vmem>>, vector<128x128xf32>
    %cst_208 = arith.constant dense<0.000000e+00> : vector<8x128xf32>
    %419 = tpu.matmul %347, %418, %cst_208 {dimension_numbers = #tpu.dot_dimension_numbers<[1], [0], [0], [1], [0, 0, 1, 1], [], []>} : vector<8x128xf32>, vector<128x128xf32>, vector<8x128xf32> -> vector<8x128xf32>
    %420 = arith.addf %417, %419 : vector<8x128xf32>
    %421 = arith.negf %420 : vector<8x128xf32>
    %422 = math.exp %421 : vector<8x128xf32>
    %cst_209 = arith.constant 1.000000e+00 : f32
    %423 = vector.broadcast %cst_209 : f32 to vector<8x128xf32>
    %424 = arith.addf %423, %422 : vector<8x128xf32>
    %425 = arith.divf %423, %424 : vector<8x128xf32>
    %cst_210 = arith.constant 2.000000e+00 : f32
    %426 = vector.broadcast %cst_210 : f32 to vector<8x128xf32>
    %427 = arith.mulf %426, %425 : vector<8x128xf32>
    %cst_211 = arith.constant 1.000000e+00 : f32
    %428 = vector.broadcast %cst_211 : f32 to vector<8x128xf32>
    %429 = arith.subf %427, %428 : vector<8x128xf32>
    %c32_i32_212 = arith.constant 32 : i32
    %430 = tpu.dynamic_rotate %425 by %c32_i32_212 dim 1 : vector<8x128xf32>, i32 -> vector<8x128xf32>
    %c96_i32_213 = arith.constant 96 : i32
    %431 = tpu.dynamic_rotate %429 by %c96_i32_213 dim 1 : vector<8x128xf32>, i32 -> vector<8x128xf32>
    %c64_i32_214 = arith.constant 64 : i32
    %432 = tpu.dynamic_rotate %425 by %c64_i32_214 dim 1 : vector<8x128xf32>, i32 -> vector<8x128xf32>
    %433 = arith.mulf %425, %345 : vector<8x128xf32>
    %434 = arith.mulf %430, %431 : vector<8x128xf32>
    %435 = arith.addf %433, %434 : vector<8x128xf32>
    %436 = math.tanh %435 : vector<8x128xf32>
    %437 = arith.mulf %432, %436 : vector<8x128xf32>
    %438 = tpu.concatenate %347, %370 in 1 : vector<8x128xf32>, vector<8x128xf32> -> vector<8x256xf32>
    %c0_215 = arith.constant 0 : index
    %c0_216 = arith.constant 0 : index
    %439 = vector.load %arg4[%c0_215, %c0_216] : memref<256x128xf32, #tpu.memory_space<vmem>>, vector<256x128xf32>
    %cst_217 = arith.constant dense<0.000000e+00> : vector<8x128xf32>
    %440 = tpu.matmul %438, %439, %cst_217 {dimension_numbers = #tpu.dot_dimension_numbers<[1], [0], [0], [1], [0, 0, 1, 1], [], []>} : vector<8x256xf32>, vector<256x128xf32>, vector<8x128xf32> -> vector<8x128xf32>
    %c0_218 = arith.constant 0 : index
    %c0_219 = arith.constant 0 : index
    %441 = vector.load %arg5[%c0_218, %c0_219] : memref<1x128xf32, #tpu.memory_space<vmem>>, vector<1x128xf32>
    %442 = vector.broadcast %441 : vector<1x128xf32> to vector<8x128xf32>
    %443 = arith.addf %440, %442 : vector<8x128xf32>
    %444 = arith.negf %443 : vector<8x128xf32>
    %445 = math.exp %444 : vector<8x128xf32>
    %cst_220 = arith.constant 1.000000e+00 : f32
    %446 = vector.broadcast %cst_220 : f32 to vector<8x128xf32>
    %447 = arith.addf %446, %445 : vector<8x128xf32>
    %448 = arith.divf %446, %447 : vector<8x128xf32>
    %cst_221 = arith.constant 2.000000e+00 : f32
    %449 = vector.broadcast %cst_221 : f32 to vector<8x128xf32>
    %450 = arith.mulf %449, %448 : vector<8x128xf32>
    %cst_222 = arith.constant 1.000000e+00 : f32
    %451 = vector.broadcast %cst_222 : f32 to vector<8x128xf32>
    %452 = arith.subf %450, %451 : vector<8x128xf32>
    %c32_i32_223 = arith.constant 32 : i32
    %453 = tpu.dynamic_rotate %448 by %c32_i32_223 dim 1 : vector<8x128xf32>, i32 -> vector<8x128xf32>
    %c96_i32_224 = arith.constant 96 : i32
    %454 = tpu.dynamic_rotate %452 by %c96_i32_224 dim 1 : vector<8x128xf32>, i32 -> vector<8x128xf32>
    %c64_i32_225 = arith.constant 64 : i32
    %455 = tpu.dynamic_rotate %448 by %c64_i32_225 dim 1 : vector<8x128xf32>, i32 -> vector<8x128xf32>
    %456 = arith.mulf %448, %368 : vector<8x128xf32>
    %457 = arith.mulf %453, %454 : vector<8x128xf32>
    %458 = arith.addf %456, %457 : vector<8x128xf32>
    %459 = math.tanh %458 : vector<8x128xf32>
    %460 = arith.mulf %455, %459 : vector<8x128xf32>
    %461 = tpu.concatenate %370, %393 in 1 : vector<8x128xf32>, vector<8x128xf32> -> vector<8x256xf32>
    %c0_226 = arith.constant 0 : index
    %c0_227 = arith.constant 0 : index
    %462 = vector.load %arg6[%c0_226, %c0_227] : memref<256x128xf32, #tpu.memory_space<vmem>>, vector<256x128xf32>
    %cst_228 = arith.constant dense<0.000000e+00> : vector<8x128xf32>
    %463 = tpu.matmul %461, %462, %cst_228 {dimension_numbers = #tpu.dot_dimension_numbers<[1], [0], [0], [1], [0, 0, 1, 1], [], []>} : vector<8x256xf32>, vector<256x128xf32>, vector<8x128xf32> -> vector<8x128xf32>
    %c0_229 = arith.constant 0 : index
    %c0_230 = arith.constant 0 : index
    %464 = vector.load %arg7[%c0_229, %c0_230] : memref<1x128xf32, #tpu.memory_space<vmem>>, vector<1x128xf32>
    %465 = vector.broadcast %464 : vector<1x128xf32> to vector<8x128xf32>
    %466 = arith.addf %463, %465 : vector<8x128xf32>
    %467 = arith.negf %466 : vector<8x128xf32>
    %468 = math.exp %467 : vector<8x128xf32>
    %cst_231 = arith.constant 1.000000e+00 : f32
    %469 = vector.broadcast %cst_231 : f32 to vector<8x128xf32>
    %470 = arith.addf %469, %468 : vector<8x128xf32>
    %471 = arith.divf %469, %470 : vector<8x128xf32>
    %cst_232 = arith.constant 2.000000e+00 : f32
    %472 = vector.broadcast %cst_232 : f32 to vector<8x128xf32>
    %473 = arith.mulf %472, %471 : vector<8x128xf32>
    %cst_233 = arith.constant 1.000000e+00 : f32
    %474 = vector.broadcast %cst_233 : f32 to vector<8x128xf32>
    %475 = arith.subf %473, %474 : vector<8x128xf32>
    %c32_i32_234 = arith.constant 32 : i32
    %476 = tpu.dynamic_rotate %471 by %c32_i32_234 dim 1 : vector<8x128xf32>, i32 -> vector<8x128xf32>
    %c96_i32_235 = arith.constant 96 : i32
    %477 = tpu.dynamic_rotate %475 by %c96_i32_235 dim 1 : vector<8x128xf32>, i32 -> vector<8x128xf32>
    %c64_i32_236 = arith.constant 64 : i32
    %478 = tpu.dynamic_rotate %471 by %c64_i32_236 dim 1 : vector<8x128xf32>, i32 -> vector<8x128xf32>
    %479 = arith.mulf %471, %391 : vector<8x128xf32>
    %480 = arith.mulf %476, %477 : vector<8x128xf32>
    %481 = arith.addf %479, %480 : vector<8x128xf32>
    %482 = math.tanh %481 : vector<8x128xf32>
    %483 = arith.mulf %478, %482 : vector<8x128xf32>
    %484 = tpu.concatenate %393, %416 in 1 : vector<8x128xf32>, vector<8x128xf32> -> vector<8x256xf32>
    %c0_237 = arith.constant 0 : index
    %c0_238 = arith.constant 0 : index
    %485 = vector.load %arg8[%c0_237, %c0_238] : memref<256x128xf32, #tpu.memory_space<vmem>>, vector<256x128xf32>
    %cst_239 = arith.constant dense<0.000000e+00> : vector<8x128xf32>
    %486 = tpu.matmul %484, %485, %cst_239 {dimension_numbers = #tpu.dot_dimension_numbers<[1], [0], [0], [1], [0, 0, 1, 1], [], []>} : vector<8x256xf32>, vector<256x128xf32>, vector<8x128xf32> -> vector<8x128xf32>
    %c0_240 = arith.constant 0 : index
    %c0_241 = arith.constant 0 : index
    %487 = vector.load %arg9[%c0_240, %c0_241] : memref<1x128xf32, #tpu.memory_space<vmem>>, vector<1x128xf32>
    %488 = vector.broadcast %487 : vector<1x128xf32> to vector<8x128xf32>
    %489 = arith.addf %486, %488 : vector<8x128xf32>
    %490 = arith.negf %489 : vector<8x128xf32>
    %491 = math.exp %490 : vector<8x128xf32>
    %cst_242 = arith.constant 1.000000e+00 : f32
    %492 = vector.broadcast %cst_242 : f32 to vector<8x128xf32>
    %493 = arith.addf %492, %491 : vector<8x128xf32>
    %494 = arith.divf %492, %493 : vector<8x128xf32>
    %cst_243 = arith.constant 2.000000e+00 : f32
    %495 = vector.broadcast %cst_243 : f32 to vector<8x128xf32>
    %496 = arith.mulf %495, %494 : vector<8x128xf32>
    %cst_244 = arith.constant 1.000000e+00 : f32
    %497 = vector.broadcast %cst_244 : f32 to vector<8x128xf32>
    %498 = arith.subf %496, %497 : vector<8x128xf32>
    %c32_i32_245 = arith.constant 32 : i32
    %499 = tpu.dynamic_rotate %494 by %c32_i32_245 dim 1 : vector<8x128xf32>, i32 -> vector<8x128xf32>
    %c96_i32_246 = arith.constant 96 : i32
    %500 = tpu.dynamic_rotate %498 by %c96_i32_246 dim 1 : vector<8x128xf32>, i32 -> vector<8x128xf32>
    %c64_i32_247 = arith.constant 64 : i32
    %501 = tpu.dynamic_rotate %494 by %c64_i32_247 dim 1 : vector<8x128xf32>, i32 -> vector<8x128xf32>
    %502 = arith.mulf %494, %414 : vector<8x128xf32>
    %503 = arith.mulf %499, %500 : vector<8x128xf32>
    %504 = arith.addf %502, %503 : vector<8x128xf32>
    %505 = math.tanh %504 : vector<8x128xf32>
    %506 = arith.mulf %501, %505 : vector<8x128xf32>
    %c56 = arith.constant 56 : index
    %c0_248 = arith.constant 0 : index
    %507 = vector.load %arg15[%c56, %c0_248] : memref<64x128xf32, #tpu.memory_space<vmem>>, vector<8x128xf32>
    %c0_249 = arith.constant 0 : index
    %c0_250 = arith.constant 0 : index
    %508 = vector.load %arg2[%c0_249, %c0_250] : memref<128x128xf32, #tpu.memory_space<vmem>>, vector<128x128xf32>
    %cst_251 = arith.constant dense<0.000000e+00> : vector<8x128xf32>
    %509 = tpu.matmul %437, %508, %cst_251 {dimension_numbers = #tpu.dot_dimension_numbers<[1], [0], [0], [1], [0, 0, 1, 1], [], []>} : vector<8x128xf32>, vector<128x128xf32>, vector<8x128xf32> -> vector<8x128xf32>
    %510 = arith.addf %507, %509 : vector<8x128xf32>
    %511 = arith.negf %510 : vector<8x128xf32>
    %512 = math.exp %511 : vector<8x128xf32>
    %cst_252 = arith.constant 1.000000e+00 : f32
    %513 = vector.broadcast %cst_252 : f32 to vector<8x128xf32>
    %514 = arith.addf %513, %512 : vector<8x128xf32>
    %515 = arith.divf %513, %514 : vector<8x128xf32>
    %cst_253 = arith.constant 2.000000e+00 : f32
    %516 = vector.broadcast %cst_253 : f32 to vector<8x128xf32>
    %517 = arith.mulf %516, %515 : vector<8x128xf32>
    %cst_254 = arith.constant 1.000000e+00 : f32
    %518 = vector.broadcast %cst_254 : f32 to vector<8x128xf32>
    %519 = arith.subf %517, %518 : vector<8x128xf32>
    %c32_i32_255 = arith.constant 32 : i32
    %520 = tpu.dynamic_rotate %515 by %c32_i32_255 dim 1 : vector<8x128xf32>, i32 -> vector<8x128xf32>
    %c96_i32_256 = arith.constant 96 : i32
    %521 = tpu.dynamic_rotate %519 by %c96_i32_256 dim 1 : vector<8x128xf32>, i32 -> vector<8x128xf32>
    %c64_i32_257 = arith.constant 64 : i32
    %522 = tpu.dynamic_rotate %515 by %c64_i32_257 dim 1 : vector<8x128xf32>, i32 -> vector<8x128xf32>
    %523 = arith.mulf %515, %435 : vector<8x128xf32>
    %524 = arith.mulf %520, %521 : vector<8x128xf32>
    %525 = arith.addf %523, %524 : vector<8x128xf32>
    %526 = math.tanh %525 : vector<8x128xf32>
    %527 = arith.mulf %522, %526 : vector<8x128xf32>
    %528 = tpu.concatenate %437, %460 in 1 : vector<8x128xf32>, vector<8x128xf32> -> vector<8x256xf32>
    %c0_258 = arith.constant 0 : index
    %c0_259 = arith.constant 0 : index
    %529 = vector.load %arg4[%c0_258, %c0_259] : memref<256x128xf32, #tpu.memory_space<vmem>>, vector<256x128xf32>
    %cst_260 = arith.constant dense<0.000000e+00> : vector<8x128xf32>
    %530 = tpu.matmul %528, %529, %cst_260 {dimension_numbers = #tpu.dot_dimension_numbers<[1], [0], [0], [1], [0, 0, 1, 1], [], []>} : vector<8x256xf32>, vector<256x128xf32>, vector<8x128xf32> -> vector<8x128xf32>
    %c0_261 = arith.constant 0 : index
    %c0_262 = arith.constant 0 : index
    %531 = vector.load %arg5[%c0_261, %c0_262] : memref<1x128xf32, #tpu.memory_space<vmem>>, vector<1x128xf32>
    %532 = vector.broadcast %531 : vector<1x128xf32> to vector<8x128xf32>
    %533 = arith.addf %530, %532 : vector<8x128xf32>
    %534 = arith.negf %533 : vector<8x128xf32>
    %535 = math.exp %534 : vector<8x128xf32>
    %cst_263 = arith.constant 1.000000e+00 : f32
    %536 = vector.broadcast %cst_263 : f32 to vector<8x128xf32>
    %537 = arith.addf %536, %535 : vector<8x128xf32>
    %538 = arith.divf %536, %537 : vector<8x128xf32>
    %cst_264 = arith.constant 2.000000e+00 : f32
    %539 = vector.broadcast %cst_264 : f32 to vector<8x128xf32>
    %540 = arith.mulf %539, %538 : vector<8x128xf32>
    %cst_265 = arith.constant 1.000000e+00 : f32
    %541 = vector.broadcast %cst_265 : f32 to vector<8x128xf32>
    %542 = arith.subf %540, %541 : vector<8x128xf32>
    %c32_i32_266 = arith.constant 32 : i32
    %543 = tpu.dynamic_rotate %538 by %c32_i32_266 dim 1 : vector<8x128xf32>, i32 -> vector<8x128xf32>
    %c96_i32_267 = arith.constant 96 : i32
    %544 = tpu.dynamic_rotate %542 by %c96_i32_267 dim 1 : vector<8x128xf32>, i32 -> vector<8x128xf32>
    %c64_i32_268 = arith.constant 64 : i32
    %545 = tpu.dynamic_rotate %538 by %c64_i32_268 dim 1 : vector<8x128xf32>, i32 -> vector<8x128xf32>
    %546 = arith.mulf %538, %458 : vector<8x128xf32>
    %547 = arith.mulf %543, %544 : vector<8x128xf32>
    %548 = arith.addf %546, %547 : vector<8x128xf32>
    %549 = math.tanh %548 : vector<8x128xf32>
    %550 = arith.mulf %545, %549 : vector<8x128xf32>
    %551 = tpu.concatenate %460, %483 in 1 : vector<8x128xf32>, vector<8x128xf32> -> vector<8x256xf32>
    %c0_269 = arith.constant 0 : index
    %c0_270 = arith.constant 0 : index
    %552 = vector.load %arg6[%c0_269, %c0_270] : memref<256x128xf32, #tpu.memory_space<vmem>>, vector<256x128xf32>
    %cst_271 = arith.constant dense<0.000000e+00> : vector<8x128xf32>
    %553 = tpu.matmul %551, %552, %cst_271 {dimension_numbers = #tpu.dot_dimension_numbers<[1], [0], [0], [1], [0, 0, 1, 1], [], []>} : vector<8x256xf32>, vector<256x128xf32>, vector<8x128xf32> -> vector<8x128xf32>
    %c0_272 = arith.constant 0 : index
    %c0_273 = arith.constant 0 : index
    %554 = vector.load %arg7[%c0_272, %c0_273] : memref<1x128xf32, #tpu.memory_space<vmem>>, vector<1x128xf32>
    %555 = vector.broadcast %554 : vector<1x128xf32> to vector<8x128xf32>
    %556 = arith.addf %553, %555 : vector<8x128xf32>
    %557 = arith.negf %556 : vector<8x128xf32>
    %558 = math.exp %557 : vector<8x128xf32>
    %cst_274 = arith.constant 1.000000e+00 : f32
    %559 = vector.broadcast %cst_274 : f32 to vector<8x128xf32>
    %560 = arith.addf %559, %558 : vector<8x128xf32>
    %561 = arith.divf %559, %560 : vector<8x128xf32>
    %cst_275 = arith.constant 2.000000e+00 : f32
    %562 = vector.broadcast %cst_275 : f32 to vector<8x128xf32>
    %563 = arith.mulf %562, %561 : vector<8x128xf32>
    %cst_276 = arith.constant 1.000000e+00 : f32
    %564 = vector.broadcast %cst_276 : f32 to vector<8x128xf32>
    %565 = arith.subf %563, %564 : vector<8x128xf32>
    %c32_i32_277 = arith.constant 32 : i32
    %566 = tpu.dynamic_rotate %561 by %c32_i32_277 dim 1 : vector<8x128xf32>, i32 -> vector<8x128xf32>
    %c96_i32_278 = arith.constant 96 : i32
    %567 = tpu.dynamic_rotate %565 by %c96_i32_278 dim 1 : vector<8x128xf32>, i32 -> vector<8x128xf32>
    %c64_i32_279 = arith.constant 64 : i32
    %568 = tpu.dynamic_rotate %561 by %c64_i32_279 dim 1 : vector<8x128xf32>, i32 -> vector<8x128xf32>
    %569 = arith.mulf %561, %481 : vector<8x128xf32>
    %570 = arith.mulf %566, %567 : vector<8x128xf32>
    %571 = arith.addf %569, %570 : vector<8x128xf32>
    %572 = math.tanh %571 : vector<8x128xf32>
    %573 = arith.mulf %568, %572 : vector<8x128xf32>
    %574 = tpu.concatenate %483, %506 in 1 : vector<8x128xf32>, vector<8x128xf32> -> vector<8x256xf32>
    %c0_280 = arith.constant 0 : index
    %c0_281 = arith.constant 0 : index
    %575 = vector.load %arg8[%c0_280, %c0_281] : memref<256x128xf32, #tpu.memory_space<vmem>>, vector<256x128xf32>
    %cst_282 = arith.constant dense<0.000000e+00> : vector<8x128xf32>
    %576 = tpu.matmul %574, %575, %cst_282 {dimension_numbers = #tpu.dot_dimension_numbers<[1], [0], [0], [1], [0, 0, 1, 1], [], []>} : vector<8x256xf32>, vector<256x128xf32>, vector<8x128xf32> -> vector<8x128xf32>
    %c0_283 = arith.constant 0 : index
    %c0_284 = arith.constant 0 : index
    %577 = vector.load %arg9[%c0_283, %c0_284] : memref<1x128xf32, #tpu.memory_space<vmem>>, vector<1x128xf32>
    %578 = vector.broadcast %577 : vector<1x128xf32> to vector<8x128xf32>
    %579 = arith.addf %576, %578 : vector<8x128xf32>
    %580 = arith.negf %579 : vector<8x128xf32>
    %581 = math.exp %580 : vector<8x128xf32>
    %cst_285 = arith.constant 1.000000e+00 : f32
    %582 = vector.broadcast %cst_285 : f32 to vector<8x128xf32>
    %583 = arith.addf %582, %581 : vector<8x128xf32>
    %584 = arith.divf %582, %583 : vector<8x128xf32>
    %cst_286 = arith.constant 2.000000e+00 : f32
    %585 = vector.broadcast %cst_286 : f32 to vector<8x128xf32>
    %586 = arith.mulf %585, %584 : vector<8x128xf32>
    %cst_287 = arith.constant 1.000000e+00 : f32
    %587 = vector.broadcast %cst_287 : f32 to vector<8x128xf32>
    %588 = arith.subf %586, %587 : vector<8x128xf32>
    %c32_i32_288 = arith.constant 32 : i32
    %589 = tpu.dynamic_rotate %584 by %c32_i32_288 dim 1 : vector<8x128xf32>, i32 -> vector<8x128xf32>
    %c96_i32_289 = arith.constant 96 : i32
    %590 = tpu.dynamic_rotate %588 by %c96_i32_289 dim 1 : vector<8x128xf32>, i32 -> vector<8x128xf32>
    %c64_i32_290 = arith.constant 64 : i32
    %591 = tpu.dynamic_rotate %584 by %c64_i32_290 dim 1 : vector<8x128xf32>, i32 -> vector<8x128xf32>
    %592 = arith.mulf %584, %504 : vector<8x128xf32>
    %593 = arith.mulf %589, %590 : vector<8x128xf32>
    %594 = arith.addf %592, %593 : vector<8x128xf32>
    %595 = math.tanh %594 : vector<8x128xf32>
    %596 = arith.mulf %591, %595 : vector<8x128xf32>
    %597 = tpu.concatenate %527, %550 in 1 : vector<8x128xf32>, vector<8x128xf32> -> vector<8x256xf32>
    %c0_291 = arith.constant 0 : index
    %c0_292 = arith.constant 0 : index
    %598 = vector.load %arg4[%c0_291, %c0_292] : memref<256x128xf32, #tpu.memory_space<vmem>>, vector<256x128xf32>
    %cst_293 = arith.constant dense<0.000000e+00> : vector<8x128xf32>
    %599 = tpu.matmul %597, %598, %cst_293 {dimension_numbers = #tpu.dot_dimension_numbers<[1], [0], [0], [1], [0, 0, 1, 1], [], []>} : vector<8x256xf32>, vector<256x128xf32>, vector<8x128xf32> -> vector<8x128xf32>
    %c0_294 = arith.constant 0 : index
    %c0_295 = arith.constant 0 : index
    %600 = vector.load %arg5[%c0_294, %c0_295] : memref<1x128xf32, #tpu.memory_space<vmem>>, vector<1x128xf32>
    %601 = vector.broadcast %600 : vector<1x128xf32> to vector<8x128xf32>
    %602 = arith.addf %599, %601 : vector<8x128xf32>
    %603 = arith.negf %602 : vector<8x128xf32>
    %604 = math.exp %603 : vector<8x128xf32>
    %cst_296 = arith.constant 1.000000e+00 : f32
    %605 = vector.broadcast %cst_296 : f32 to vector<8x128xf32>
    %606 = arith.addf %605, %604 : vector<8x128xf32>
    %607 = arith.divf %605, %606 : vector<8x128xf32>
    %cst_297 = arith.constant 2.000000e+00 : f32
    %608 = vector.broadcast %cst_297 : f32 to vector<8x128xf32>
    %609 = arith.mulf %608, %607 : vector<8x128xf32>
    %cst_298 = arith.constant 1.000000e+00 : f32
    %610 = vector.broadcast %cst_298 : f32 to vector<8x128xf32>
    %611 = arith.subf %609, %610 : vector<8x128xf32>
    %c32_i32_299 = arith.constant 32 : i32
    %612 = tpu.dynamic_rotate %607 by %c32_i32_299 dim 1 : vector<8x128xf32>, i32 -> vector<8x128xf32>
    %c96_i32_300 = arith.constant 96 : i32
    %613 = tpu.dynamic_rotate %611 by %c96_i32_300 dim 1 : vector<8x128xf32>, i32 -> vector<8x128xf32>
    %c64_i32_301 = arith.constant 64 : i32
    %614 = tpu.dynamic_rotate %607 by %c64_i32_301 dim 1 : vector<8x128xf32>, i32 -> vector<8x128xf32>
    %615 = arith.mulf %607, %548 : vector<8x128xf32>
    %616 = arith.mulf %612, %613 : vector<8x128xf32>
    %617 = arith.addf %615, %616 : vector<8x128xf32>
    %618 = math.tanh %617 : vector<8x128xf32>
    %619 = arith.mulf %614, %618 : vector<8x128xf32>
    %620 = tpu.concatenate %550, %573 in 1 : vector<8x128xf32>, vector<8x128xf32> -> vector<8x256xf32>
    %c0_302 = arith.constant 0 : index
    %c0_303 = arith.constant 0 : index
    %621 = vector.load %arg6[%c0_302, %c0_303] : memref<256x128xf32, #tpu.memory_space<vmem>>, vector<256x128xf32>
    %cst_304 = arith.constant dense<0.000000e+00> : vector<8x128xf32>
    %622 = tpu.matmul %620, %621, %cst_304 {dimension_numbers = #tpu.dot_dimension_numbers<[1], [0], [0], [1], [0, 0, 1, 1], [], []>} : vector<8x256xf32>, vector<256x128xf32>, vector<8x128xf32> -> vector<8x128xf32>
    %c0_305 = arith.constant 0 : index
    %c0_306 = arith.constant 0 : index
    %623 = vector.load %arg7[%c0_305, %c0_306] : memref<1x128xf32, #tpu.memory_space<vmem>>, vector<1x128xf32>
    %624 = vector.broadcast %623 : vector<1x128xf32> to vector<8x128xf32>
    %625 = arith.addf %622, %624 : vector<8x128xf32>
    %626 = arith.negf %625 : vector<8x128xf32>
    %627 = math.exp %626 : vector<8x128xf32>
    %cst_307 = arith.constant 1.000000e+00 : f32
    %628 = vector.broadcast %cst_307 : f32 to vector<8x128xf32>
    %629 = arith.addf %628, %627 : vector<8x128xf32>
    %630 = arith.divf %628, %629 : vector<8x128xf32>
    %cst_308 = arith.constant 2.000000e+00 : f32
    %631 = vector.broadcast %cst_308 : f32 to vector<8x128xf32>
    %632 = arith.mulf %631, %630 : vector<8x128xf32>
    %cst_309 = arith.constant 1.000000e+00 : f32
    %633 = vector.broadcast %cst_309 : f32 to vector<8x128xf32>
    %634 = arith.subf %632, %633 : vector<8x128xf32>
    %c32_i32_310 = arith.constant 32 : i32
    %635 = tpu.dynamic_rotate %630 by %c32_i32_310 dim 1 : vector<8x128xf32>, i32 -> vector<8x128xf32>
    %c96_i32_311 = arith.constant 96 : i32
    %636 = tpu.dynamic_rotate %634 by %c96_i32_311 dim 1 : vector<8x128xf32>, i32 -> vector<8x128xf32>
    %c64_i32_312 = arith.constant 64 : i32
    %637 = tpu.dynamic_rotate %630 by %c64_i32_312 dim 1 : vector<8x128xf32>, i32 -> vector<8x128xf32>
    %638 = arith.mulf %630, %571 : vector<8x128xf32>
    %639 = arith.mulf %635, %636 : vector<8x128xf32>
    %640 = arith.addf %638, %639 : vector<8x128xf32>
    %641 = math.tanh %640 : vector<8x128xf32>
    %642 = arith.mulf %637, %641 : vector<8x128xf32>
    %643 = tpu.concatenate %573, %596 in 1 : vector<8x128xf32>, vector<8x128xf32> -> vector<8x256xf32>
    %c0_313 = arith.constant 0 : index
    %c0_314 = arith.constant 0 : index
    %644 = vector.load %arg8[%c0_313, %c0_314] : memref<256x128xf32, #tpu.memory_space<vmem>>, vector<256x128xf32>
    %cst_315 = arith.constant dense<0.000000e+00> : vector<8x128xf32>
    %645 = tpu.matmul %643, %644, %cst_315 {dimension_numbers = #tpu.dot_dimension_numbers<[1], [0], [0], [1], [0, 0, 1, 1], [], []>} : vector<8x256xf32>, vector<256x128xf32>, vector<8x128xf32> -> vector<8x128xf32>
    %c0_316 = arith.constant 0 : index
    %c0_317 = arith.constant 0 : index
    %646 = vector.load %arg9[%c0_316, %c0_317] : memref<1x128xf32, #tpu.memory_space<vmem>>, vector<1x128xf32>
    %647 = vector.broadcast %646 : vector<1x128xf32> to vector<8x128xf32>
    %648 = arith.addf %645, %647 : vector<8x128xf32>
    %649 = arith.negf %648 : vector<8x128xf32>
    %650 = math.exp %649 : vector<8x128xf32>
    %cst_318 = arith.constant 1.000000e+00 : f32
    %651 = vector.broadcast %cst_318 : f32 to vector<8x128xf32>
    %652 = arith.addf %651, %650 : vector<8x128xf32>
    %653 = arith.divf %651, %652 : vector<8x128xf32>
    %cst_319 = arith.constant 2.000000e+00 : f32
    %654 = vector.broadcast %cst_319 : f32 to vector<8x128xf32>
    %655 = arith.mulf %654, %653 : vector<8x128xf32>
    %cst_320 = arith.constant 1.000000e+00 : f32
    %656 = vector.broadcast %cst_320 : f32 to vector<8x128xf32>
    %657 = arith.subf %655, %656 : vector<8x128xf32>
    %c32_i32_321 = arith.constant 32 : i32
    %658 = tpu.dynamic_rotate %653 by %c32_i32_321 dim 1 : vector<8x128xf32>, i32 -> vector<8x128xf32>
    %c96_i32_322 = arith.constant 96 : i32
    %659 = tpu.dynamic_rotate %657 by %c96_i32_322 dim 1 : vector<8x128xf32>, i32 -> vector<8x128xf32>
    %c64_i32_323 = arith.constant 64 : i32
    %660 = tpu.dynamic_rotate %653 by %c64_i32_323 dim 1 : vector<8x128xf32>, i32 -> vector<8x128xf32>
    %661 = arith.mulf %653, %594 : vector<8x128xf32>
    %662 = arith.mulf %658, %659 : vector<8x128xf32>
    %663 = arith.addf %661, %662 : vector<8x128xf32>
    %664 = math.tanh %663 : vector<8x128xf32>
    %665 = arith.mulf %660, %664 : vector<8x128xf32>
    %666 = tpu.concatenate %619, %642 in 1 : vector<8x128xf32>, vector<8x128xf32> -> vector<8x256xf32>
    %c0_324 = arith.constant 0 : index
    %c0_325 = arith.constant 0 : index
    %667 = vector.load %arg6[%c0_324, %c0_325] : memref<256x128xf32, #tpu.memory_space<vmem>>, vector<256x128xf32>
    %cst_326 = arith.constant dense<0.000000e+00> : vector<8x128xf32>
    %668 = tpu.matmul %666, %667, %cst_326 {dimension_numbers = #tpu.dot_dimension_numbers<[1], [0], [0], [1], [0, 0, 1, 1], [], []>} : vector<8x256xf32>, vector<256x128xf32>, vector<8x128xf32> -> vector<8x128xf32>
    %c0_327 = arith.constant 0 : index
    %c0_328 = arith.constant 0 : index
    %669 = vector.load %arg7[%c0_327, %c0_328] : memref<1x128xf32, #tpu.memory_space<vmem>>, vector<1x128xf32>
    %670 = vector.broadcast %669 : vector<1x128xf32> to vector<8x128xf32>
    %671 = arith.addf %668, %670 : vector<8x128xf32>
    %672 = arith.negf %671 : vector<8x128xf32>
    %673 = math.exp %672 : vector<8x128xf32>
    %cst_329 = arith.constant 1.000000e+00 : f32
    %674 = vector.broadcast %cst_329 : f32 to vector<8x128xf32>
    %675 = arith.addf %674, %673 : vector<8x128xf32>
    %676 = arith.divf %674, %675 : vector<8x128xf32>
    %cst_330 = arith.constant 2.000000e+00 : f32
    %677 = vector.broadcast %cst_330 : f32 to vector<8x128xf32>
    %678 = arith.mulf %677, %676 : vector<8x128xf32>
    %cst_331 = arith.constant 1.000000e+00 : f32
    %679 = vector.broadcast %cst_331 : f32 to vector<8x128xf32>
    %680 = arith.subf %678, %679 : vector<8x128xf32>
    %c32_i32_332 = arith.constant 32 : i32
    %681 = tpu.dynamic_rotate %676 by %c32_i32_332 dim 1 : vector<8x128xf32>, i32 -> vector<8x128xf32>
    %c96_i32_333 = arith.constant 96 : i32
    %682 = tpu.dynamic_rotate %680 by %c96_i32_333 dim 1 : vector<8x128xf32>, i32 -> vector<8x128xf32>
    %c64_i32_334 = arith.constant 64 : i32
    %683 = tpu.dynamic_rotate %676 by %c64_i32_334 dim 1 : vector<8x128xf32>, i32 -> vector<8x128xf32>
    %684 = arith.mulf %676, %640 : vector<8x128xf32>
    %685 = arith.mulf %681, %682 : vector<8x128xf32>
    %686 = arith.addf %684, %685 : vector<8x128xf32>
    %687 = math.tanh %686 : vector<8x128xf32>
    %688 = arith.mulf %683, %687 : vector<8x128xf32>
    %689 = tpu.concatenate %642, %665 in 1 : vector<8x128xf32>, vector<8x128xf32> -> vector<8x256xf32>
    %c0_335 = arith.constant 0 : index
    %c0_336 = arith.constant 0 : index
    %690 = vector.load %arg8[%c0_335, %c0_336] : memref<256x128xf32, #tpu.memory_space<vmem>>, vector<256x128xf32>
    %cst_337 = arith.constant dense<0.000000e+00> : vector<8x128xf32>
    %691 = tpu.matmul %689, %690, %cst_337 {dimension_numbers = #tpu.dot_dimension_numbers<[1], [0], [0], [1], [0, 0, 1, 1], [], []>} : vector<8x256xf32>, vector<256x128xf32>, vector<8x128xf32> -> vector<8x128xf32>
    %c0_338 = arith.constant 0 : index
    %c0_339 = arith.constant 0 : index
    %692 = vector.load %arg9[%c0_338, %c0_339] : memref<1x128xf32, #tpu.memory_space<vmem>>, vector<1x128xf32>
    %693 = vector.broadcast %692 : vector<1x128xf32> to vector<8x128xf32>
    %694 = arith.addf %691, %693 : vector<8x128xf32>
    %695 = arith.negf %694 : vector<8x128xf32>
    %696 = math.exp %695 : vector<8x128xf32>
    %cst_340 = arith.constant 1.000000e+00 : f32
    %697 = vector.broadcast %cst_340 : f32 to vector<8x128xf32>
    %698 = arith.addf %697, %696 : vector<8x128xf32>
    %699 = arith.divf %697, %698 : vector<8x128xf32>
    %cst_341 = arith.constant 2.000000e+00 : f32
    %700 = vector.broadcast %cst_341 : f32 to vector<8x128xf32>
    %701 = arith.mulf %700, %699 : vector<8x128xf32>
    %cst_342 = arith.constant 1.000000e+00 : f32
    %702 = vector.broadcast %cst_342 : f32 to vector<8x128xf32>
    %703 = arith.subf %701, %702 : vector<8x128xf32>
    %c32_i32_343 = arith.constant 32 : i32
    %704 = tpu.dynamic_rotate %699 by %c32_i32_343 dim 1 : vector<8x128xf32>, i32 -> vector<8x128xf32>
    %c96_i32_344 = arith.constant 96 : i32
    %705 = tpu.dynamic_rotate %703 by %c96_i32_344 dim 1 : vector<8x128xf32>, i32 -> vector<8x128xf32>
    %c64_i32_345 = arith.constant 64 : i32
    %706 = tpu.dynamic_rotate %699 by %c64_i32_345 dim 1 : vector<8x128xf32>, i32 -> vector<8x128xf32>
    %707 = arith.mulf %699, %663 : vector<8x128xf32>
    %708 = arith.mulf %704, %705 : vector<8x128xf32>
    %709 = arith.addf %707, %708 : vector<8x128xf32>
    %710 = math.tanh %709 : vector<8x128xf32>
    %711 = arith.mulf %706, %710 : vector<8x128xf32>
    %712 = tpu.concatenate %688, %711 in 1 : vector<8x128xf32>, vector<8x128xf32> -> vector<8x256xf32>
    %c0_346 = arith.constant 0 : index
    %c0_347 = arith.constant 0 : index
    %713 = vector.load %arg8[%c0_346, %c0_347] : memref<256x128xf32, #tpu.memory_space<vmem>>, vector<256x128xf32>
    %cst_348 = arith.constant dense<0.000000e+00> : vector<8x128xf32>
    %714 = tpu.matmul %712, %713, %cst_348 {dimension_numbers = #tpu.dot_dimension_numbers<[1], [0], [0], [1], [0, 0, 1, 1], [], []>} : vector<8x256xf32>, vector<256x128xf32>, vector<8x128xf32> -> vector<8x128xf32>
    %c0_349 = arith.constant 0 : index
    %c0_350 = arith.constant 0 : index
    %715 = vector.load %arg9[%c0_349, %c0_350] : memref<1x128xf32, #tpu.memory_space<vmem>>, vector<1x128xf32>
    %716 = vector.broadcast %715 : vector<1x128xf32> to vector<8x128xf32>
    %717 = arith.addf %714, %716 : vector<8x128xf32>
    %718 = arith.negf %717 : vector<8x128xf32>
    %719 = math.exp %718 : vector<8x128xf32>
    %cst_351 = arith.constant 1.000000e+00 : f32
    %720 = vector.broadcast %cst_351 : f32 to vector<8x128xf32>
    %721 = arith.addf %720, %719 : vector<8x128xf32>
    %722 = arith.divf %720, %721 : vector<8x128xf32>
    %cst_352 = arith.constant 2.000000e+00 : f32
    %723 = vector.broadcast %cst_352 : f32 to vector<8x128xf32>
    %724 = arith.mulf %723, %722 : vector<8x128xf32>
    %cst_353 = arith.constant 1.000000e+00 : f32
    %725 = vector.broadcast %cst_353 : f32 to vector<8x128xf32>
    %726 = arith.subf %724, %725 : vector<8x128xf32>
    %c32_i32_354 = arith.constant 32 : i32
    %727 = tpu.dynamic_rotate %722 by %c32_i32_354 dim 1 : vector<8x128xf32>, i32 -> vector<8x128xf32>
    %c96_i32_355 = arith.constant 96 : i32
    %728 = tpu.dynamic_rotate %726 by %c96_i32_355 dim 1 : vector<8x128xf32>, i32 -> vector<8x128xf32>
    %c64_i32_356 = arith.constant 64 : i32
    %729 = tpu.dynamic_rotate %722 by %c64_i32_356 dim 1 : vector<8x128xf32>, i32 -> vector<8x128xf32>
    %730 = arith.mulf %722, %709 : vector<8x128xf32>
    %731 = arith.mulf %727, %728 : vector<8x128xf32>
    %732 = arith.addf %730, %731 : vector<8x128xf32>
    %733 = math.tanh %732 : vector<8x128xf32>
    %734 = arith.mulf %729, %733 : vector<8x128xf32>
    %c0_357 = arith.constant 0 : index
    %c0_358 = arith.constant 0 : index
    %735 = vector.load %arg10[%c0_357, %c0_358] : memref<128x256xf32, #tpu.memory_space<vmem>>, vector<128x256xf32>
    %cst_359 = arith.constant dense<0.000000e+00> : vector<8x256xf32>
    %736 = tpu.matmul %734, %735, %cst_359 {dimension_numbers = #tpu.dot_dimension_numbers<[1], [0], [0], [1], [0, 0, 1, 1], [], []>} : vector<8x128xf32>, vector<128x256xf32>, vector<8x256xf32> -> vector<8x256xf32>
    %c0_360 = arith.constant 0 : index
    %c0_361 = arith.constant 0 : index
    %737 = vector.load %arg11[%c0_360, %c0_361] : memref<1x256xf32, #tpu.memory_space<vmem>>, vector<1x256xf32>
    %738 = vector.broadcast %737 : vector<1x256xf32> to vector<8x256xf32>
    %739 = arith.addf %736, %738 : vector<8x256xf32>
    %c0_362 = arith.constant 0 : index
    %c0_363 = arith.constant 0 : index
    %740 = vector.load %arg12[%c0_362, %c0_363] : memref<256x10xf32, #tpu.memory_space<vmem>>, vector<256x10xf32>
    %cst_364 = arith.constant dense<0.000000e+00> : vector<8x10xf32>
    %741 = tpu.matmul %739, %740, %cst_364 {dimension_numbers = #tpu.dot_dimension_numbers<[1], [0], [0], [1], [0, 0, 1, 1], [], []>} : vector<8x256xf32>, vector<256x10xf32>, vector<8x10xf32> -> vector<8x10xf32>
    %c0_365 = arith.constant 0 : index
    %c0_366 = arith.constant 0 : index
    %742 = vector.load %arg13[%c0_365, %c0_366] : memref<1x10xf32, #tpu.memory_space<vmem>>, vector<1x10xf32>
    %743 = vector.broadcast %742 : vector<1x10xf32> to vector<8x10xf32>
    %744 = arith.addf %741, %743 : vector<8x10xf32>
    %c0_367 = arith.constant 0 : index
    %c0_368 = arith.constant 0 : index
    %745 = vector.load %arg14[%c0_367, %c0_368] : memref<8x10xf32, #tpu.memory_space<vmem>>, vector<8x10xf32>
    tpu.vector_store %arg14[%c0_367, %c0_368], %744 {strides = array<i32>} : memref<8x10xf32, #tpu.memory_space<vmem>>, vector<8x10xf32>,
    return
  }
}

</mosaic_0001>

<bundles_post_ra>
// kernel: lstm_model_forward.1
= control target key start
LH: loop header
LB: loop body
LE: loop exit
PB: predicated region body
PF: predicated region fallthrough
CT: control target
= control target key end

     0   :  { %19 = vsyncpa [#allocation4], 0  ;;  %s5782_s0 = inlined_call_operand.vmem [shape: f32[64,16], index: 0, kind: input, shape index: {}]   ;;  %s5783_s1 = inlined_call_operand.vmem [shape: f32[16,128], index: 1, kind: input, shape index: {}]   ;;  %s5784_s2 = inlined_call_operand.vmem [shape: f32[128,128], index: 2, kind: input, shape index: {}]   ;;  %s5785_s3 = inlined_call_operand.vmem [shape: f32[1,128], index: 3, kind: input, shape index: {}]   ;;  %s5786_s4 = inlined_call_operand.vmem [shape: f32[256,128], index: 4, kind: input, shape index: {}]   ;;  %s5787_s5 = inlined_call_operand.vmem [shape: f32[1,128], index: 5, kind: input, shape index: {}]   ;;  %s5788_s6 = inlined_call_operand.hbm [shape: f32[256,128], index: 6, kind: input, shape index: {}]   ;;  %s5789_s7 = inlined_call_operand.vmem [shape: f32[1,128], index: 7, kind: input, shape index: {}]   ;;  %s5790_s8 = inlined_call_operand.hbm [shape: f32[256,128], index: 8, kind: input, shape index: {}]   ;;  %s5791_s9 = inlined_call_operand.vmem [shape: f32[1,128], index: 9, kind: input, shape index: {}]   ;;  %s5792_s10 = inlined_call_operand.hbm [shape: f32[128,256], index: 10, kind: input, shape index: {}]   ;;  %s5793_s11 = inlined_call_operand.vmem [shape: f32[1,256], index: 11, kind: input, shape index: {}]   ;;  %s5794_s12 = inlined_call_operand.vmem [shape: f32[256,10], index: 12, kind: input, shape index: {}]   ;;  %s5795_s13 = inlined_call_operand.vmem [shape: f32[1,10], index: 13, kind: input, shape index: {}]   ;;  %s5796_s14 = inlined_call_operand.vmem [shape: f32[8,10], index: 14, kind: output, shape index: {}]  }
   0x1   :  { %20 = vsyncpa [#allocation6], 0  ;;  %s52_s15 = sshll.u32 %s5790_s8, 4  ;;  %s3235_s16 = smov [#allocation5]   ;;  %s53_s15 = int_to_ptr.hbm [resolvable:$true] %s52_s15 }
   0x2   :  { %s54_s17 = sshll.u32 %s3235_s16, 4  ;;  %s37_s20 = sshll.u32 %s5788_s6, 4  ;;  %s55_s17 = int_to_ptr.vmem [resolvable:$true] %s54_s17  ;;  %s38_s20 = int_to_ptr.hbm [resolvable:$true] %s37_s20 }
   0x3   :  { %s3236_s21 = smov 128   ;;  %s3237_s22 = smov 8  }
   0x4   :  { %60 = dma.hbm_to_vmem [thread:$0]  %s53_s15, 4096, %s55_s17, [#allocation6], %s3236_s21, %s3236_s21, %s3237_s22  }
   0x5   :  { %s3238_s23 = smov [#allocation3]   ;;  %s67_s27 = sshll.u32 %s5792_s10, 4  ;;  %s68_s27 = int_to_ptr.hbm [resolvable:$true] %s67_s27 }
   0x6   :  { %s39_s24 = sshll.u32 %s3238_s23, 4  ;;  %s3239_s8 = smov [#allocation7]   ;;  %s40_s24 = int_to_ptr.vmem [resolvable:$true] %s39_s24 }
   0x7   :  { %45 = dma.hbm_to_vmem [thread:$0]  %s38_s20, 4096, %s40_s24, [#allocation4], %s3236_s21, %s3236_s21, %s3237_s22  }
   0x8   :  { %s69_s28 = sshll.u32 %s3239_s8, 4  ;;  %s3240_s29 = smov 256   ;;  %s70_s28 = int_to_ptr.vmem [resolvable:$true] %s69_s28 }
   0x9   :  { %s3241_s30 = smov 16  }
   0xa   :  { %75 = dma.hbm_to_vmem [thread:$0]  %s68_s27, 4096, %s70_s28, [#allocation6], %s3240_s29, %s3240_s29, %s3241_s30  }
   0xb   :  { %3231 = dma.done.wait [#allocation4], 4096  }
   0xc   :  { %3232 = vsyncadd [#allocation4], 4294963200 }
   0xd   :  { %3233 = dma.done.wait [#allocation6], 8192  }
   0xe   :  { %3234 = vsyncadd [#allocation6], 4294959104  ;;  %v3333_v0 = vld [vmem:[%s5784_s2 + $0x78] sm:$0xff]  ;;  %v3338_v1 = vld [vmem:[%s5784_s2 + $0x70] sm:$0xff]  ;;  %vm108_vm0 = vcmask 130048   ;;  %v5797_v19 = vmov 0.0  }
   0xf   :  { %199 = vmatpush.msra.mxu1 %v3333_v0  ;;  %253 = vmatpush.msra.mxu2 %v3333_v0  ;;  %v3345_v2 = vld [vmem:[%s5784_s2 + $0x68] sm:$0xff]  ;;  %v3352_v3 = vld [vmem:[%s5784_s2 + $0x60] sm:$0xff]  ;;  %v3367_v7 = vld [vmem:[%s5784_s2 + $0x58] sm:$0xff]  ;;  %s3243_s25 = smov 64   ;;  %s3244_s26 = smov 32  }
  0x10   :  { %v103_v4 = vld [vmem:[%s5783_s1 + $0x8] sm:$0xff]  ;;  %v102_v5 = vld [vmem:[%s5783_s1] sm:$0xff]  ;;  %v3374_v8 = vld [vmem:[%s5784_s2 + $0x50] sm:$0xff]  ;;  %s3245_s27 = smov 96  }
  0x11   :  { %200 = vmatpush.msra.mxu1 %v3338_v1  ;;  %254 = vmatpush.msra.mxu2 %v3338_v1  ;;  %v94_v6 = vld [vmem:[%s5782_s0] sm:$0xff]  ;;  %v3382_v9 = vld [vmem:[%s5784_s2 + $0x48] sm:$0xff]  ;;  %v3396_v11 = vld [vmem:[%s5784_s2 + $0x38] sm:$0xff] }
  0x12   :  { %147 = vmatpush.msra.mxu0 %v103_v4  ;;  %v3389_v10 = vld [vmem:[%s5784_s2 + $0x40] sm:$0xff]  ;;  %5936 = vst [vmem:[#allocation10_spill] sm:$0xff] %v3396_v11  ;;  %v3403_v12 = vld [vmem:[%s5784_s2 + $0x30] sm:$0xff]  ;;  %v3410_v13 = vld [vmem:[%s5784_s2 + $0x28] sm:$0xff] }
  0x13   :  { %201 = vmatpush.msra.mxu1 %v3345_v2  ;;  %255 = vmatpush.msra.mxu2 %v3345_v2  ;;  %5937 = vst [vmem:[#allocation11_spill] sm:$0xff] %v3403_v12  ;;  %v3417_v14 = vld [vmem:[%s5784_s2 + $0x20] sm:$0xff]  ;;  %v3424_v15 = vld [vmem:[%s5784_s2 + $0x18] sm:$0xff]  ;;  %v3431_v16 = vld [vmem:[%s5784_s2 + $0x10] sm:$0xff] }
  0x14   :  { %148 = vmatpush.msra.mxu0 %v102_v5  ;;  %5938 = vst [vmem:[#allocation12_spill] sm:$0xff] %v3410_v13  ;;  %v3438_v17 = vld [vmem:[%s5784_s2 + $0x8] sm:$0xff]  ;;  %v3445_v18 = vld [vmem:[%s5784_s2] sm:$0xff]  ;;  %v3478_v26 = vld [vmem:[%s5786_s4 + $0x78] sm:$0xff] }
  0x15   :  { %202 = vmatpush.msra.mxu1 %v3352_v3  ;;  %2628 = vmatmul.msk.f32.vlgmr.msra.gmra.mxu0 %vm108_vm0, %v94_v6  ;;  %5939 = vst [vmem:[#allocation13_spill] sm:$0xff] %v3417_v14  ;;  %v3472_v20 = vld [vmem:[%s5785_s3] ss:$0 sm:$0xff]  ;;  %v3483_v27 = vld [vmem:[%s5786_s4 + $0x70] sm:$0xff]  ;;  %v3489_v28 = vld [vmem:[%s5786_s4 + $0xf8] sm:$0xff] }
  0x16   :  { %256 = vmatpush.msra.mxu2 %v3352_v3  ;;  %5940 = vst [vmem:[#allocation14_spill] sm:$0xff] %v3424_v15  ;;  %342 = vmatpush.msra.mxu3 %v3478_v26  ;;  %v3494_v29 = vld [vmem:[%s5786_s4 + $0x68] sm:$0xff]  ;;  %v3502_v31 = vld [vmem:[%s5786_s4 + $0x60] sm:$0xff]  ;;  %v3508_v33 = vld [vmem:[%s5786_s4 + $0x58] sm:$0xff] }
  0x17   :  { %203 = vmatpush.msra.mxu1 %v3367_v7  ;;  %5941 = vst [vmem:[#allocation15_spill] sm:$0xff] %v3431_v16  ;;  %488 = vmatpush.msrb.mxu0 %v3489_v28  ;;  %v3523_v46 = vld [vmem:[%s5786_s4 + $0x50] sm:$0xff]  ;;  %v3533_v48 = vld [vmem:[%s5786_s4 + $0x48] sm:$0xff]  ;;  %v3545_v50 = vld [vmem:[%s5786_s4 + $0x40] sm:$0xff] }
  0x18   :  { %257 = vmatpush.msra.mxu2 %v3367_v7  ;;  %5942 = vst [vmem:[#allocation16_spill] sm:$0xff] %v3438_v17  ;;  %343 = vmatpush.msra.mxu3 %v3483_v27  ;;  %v3528_v47 = vld [vmem:[%s5786_s4 + $0xf0] sm:$0xff]  ;;  %v3540_v49 = vld [vmem:[%s5786_s4 + $0xe8] sm:$0xff]  ;;  %v3550_v51 = vld [vmem:[%s5786_s4 + $0xe0] sm:$0xff] }
  0x19   :  { %204 = vmatpush.msra.mxu1 %v3374_v8  ;;  %5943 = vst [vmem:[#allocation17_spill] sm:$0xff] %v3445_v18  ;;  %489 = vmatpush.msrb.mxu0 %v3528_v47  ;;  %v3558_v52 = vld [vmem:[%s5786_s4 + $0x38] sm:$0xff]  ;;  %v3574_v54 = vld [vmem:[%s5786_s4 + $0x30] sm:$0xff]  ;;  %v3587_v56 = vld [vmem:[%s5786_s4 + $0x28] sm:$0xff] }
  0x1a   :  { %258 = vmatpush.msra.mxu2 %v3374_v8  ;;  %5944 = vst [vmem:[#allocation18_spill] sm:$0xff] %v3472_v20  ;;  %344 = vmatpush.msra.mxu3 %v3494_v29  ;;  %v3563_v53 = vld [vmem:[%s5786_s4 + $0xd8] sm:$0xff]  ;;  %v3579_v55 = vld [vmem:[%s5786_s4 + $0xd0] sm:$0xff]  ;;  %v3592_v57 = vld [vmem:[%s5786_s4 + $0xc8] sm:$0xff] }
  0x1b   :  { %205 = vmatpush.msra.mxu1 %v3382_v9  ;;  %490 = vmatpush.msrb.mxu0 %v3540_v49  ;;  %v3600_v58 = vld [vmem:[%s5786_s4 + $0x20] sm:$0xff]  ;;  %v3613_v60 = vld [vmem:[%s5786_s4 + $0x18] sm:$0xff]  ;;  %v3623_v62 = vld [vmem:[%s5786_s4 + $0x10] sm:$0xff] }
  0x1c   :  { %259 = vmatpush.msra.mxu2 %v3382_v9  ;;  %345 = vmatpush.msra.mxu3 %v3502_v31  ;;  %v3605_v59 = vld [vmem:[%s5786_s4 + $0xc0] sm:$0xff]  ;;  %v3618_v61 = vld [vmem:[%s5786_s4 + $0xb8] sm:$0xff]  ;;  %v3628_v63 = vld [vmem:[%s5786_s4 + $0xb0] sm:$0xff] }
  0x1d   :  { %206 = vmatpush.msra.mxu1 %v3389_v10  ;;  %491 = vmatpush.msrb.mxu0 %v3550_v51  ;;  %v3636_v4 = vld [vmem:[%s5786_s4 + $0x8] sm:$0xff]  ;;  %v3649_v6 = vld [vmem:[%s5786_s4] sm:$0xff] }
  0x1e   :  { %260 = vmatpush.msra.mxu2 %v3389_v10  ;;  %346 = vmatpush.msra.mxu3 %v3508_v33  ;;  %v3641_v5 = vld [vmem:[%s5786_s4 + $0xa8] sm:$0xff] }
  0x1f   :  { %207 = vmatpush.msra.mxu1 %v3396_v11  ;;  %492 = vmatpush.msrb.mxu0 %v3563_v53 }
  0x20   :  { %261 = vmatpush.msra.mxu2 %v3396_v11  ;;  %347 = vmatpush.msra.mxu3 %v3523_v46 }
  0x21   :  { %208 = vmatpush.msra.mxu1 %v3403_v12  ;;  %493 = vmatpush.msrb.mxu0 %v3579_v55 }
  0x22   :  { %262 = vmatpush.msra.mxu2 %v3403_v12  ;;  %348 = vmatpush.msra.mxu3 %v3533_v48 }
  0x23   :  { %209 = vmatpush.msra.mxu1 %v3410_v13  ;;  %494 = vmatpush.msrb.mxu0 %v3592_v57 }
  0x24   :  { %263 = vmatpush.msra.mxu2 %v3410_v13  ;;  %349 = vmatpush.msra.mxu3 %v3545_v50 }
  0x25   :  { %210 = vmatpush.msra.mxu1 %v3417_v14  ;;  %495 = vmatpush.msrb.mxu0 %v3605_v59 }
  0x26   :  { %264 = vmatpush.msra.mxu2 %v3417_v14  ;;  %350 = vmatpush.msra.mxu3 %v3558_v52 }
  0x27   :  { %211 = vmatpush.msra.mxu1 %v3424_v15  ;;  %496 = vmatpush.msrb.mxu0 %v3618_v61 }
  0x28   :  { %265 = vmatpush.msra.mxu2 %v3424_v15  ;;  %351 = vmatpush.msra.mxu3 %v3574_v54 }
  0x29   :  { %212 = vmatpush.msra.mxu1 %v3431_v16  ;;  %497 = vmatpush.msrb.mxu0 %v3628_v63 }
  0x2a   :  { %266 = vmatpush.msra.mxu2 %v3431_v16  ;;  %352 = vmatpush.msra.mxu3 %v3587_v56 }
  0x2b   :  { %213 = vmatpush.msra.mxu1 %v3438_v17  ;;  %498 = vmatpush.msrb.mxu0 %v3641_v5 }
  0x2c   :  { %267 = vmatpush.msra.mxu2 %v3438_v17  ;;  %353 = vmatpush.msra.mxu3 %v3600_v58 }
  0x2d   :  { %214 = vmatpush.msra.mxu1 %v3445_v18 }
  0x2e   :  { %215 = vmatmul.f32.vlgmr.msra.gmra.mxu1 %v5797_v19  ;;  %268 = vmatpush.msra.mxu2 %v3445_v18 }
  0x2f   :  { %362 = vmatpush.msrb.mxu1 %v3489_v28  ;;  %354 = vmatpush.msra.mxu3 %v3613_v60 }
  0x30   :  { %415 = vmatpush.msrb.mxu2 %v3333_v0 }
  0x31   :  { %363 = vmatpush.msrb.mxu1 %v3528_v47  ;;  %355 = vmatpush.msra.mxu3 %v3623_v62 }
  0x32   :  { %416 = vmatpush.msrb.mxu2 %v3338_v1 }
  0x33   :  { %364 = vmatpush.msrb.mxu1 %v3540_v49  ;;  %356 = vmatpush.msra.mxu3 %v3636_v4 }
  0x34   :  { %417 = vmatpush.msrb.mxu2 %v3345_v2 }
  0x35   :  { %365 = vmatpush.msrb.mxu1 %v3550_v51  ;;  %357 = vmatpush.msra.mxu3 %v3649_v6 }
  0x36   :  { %418 = vmatpush.msrb.mxu2 %v3352_v3 }
  0x37   :  { %366 = vmatpush.msrb.mxu1 %v3563_v53  ;;  %468 = vmatpush.msrb.mxu3 %v3478_v26 }
  0x38   :  { %419 = vmatpush.msrb.mxu2 %v3367_v7 }
  0x39   :  { %367 = vmatpush.msrb.mxu1 %v3579_v55  ;;  %469 = vmatpush.msrb.mxu3 %v3483_v27 }
  0x3a   :  { %420 = vmatpush.msrb.mxu2 %v3374_v8 }
  0x3b   :  { %368 = vmatpush.msrb.mxu1 %v3592_v57  ;;  %470 = vmatpush.msrb.mxu3 %v3494_v29 }
  0x3c   :  { %421 = vmatpush.msrb.mxu2 %v3382_v9 }
  0x3d   :  { %369 = vmatpush.msrb.mxu1 %v3605_v59  ;;  %471 = vmatpush.msrb.mxu3 %v3502_v31 }
  0x3e   :  { %422 = vmatpush.msrb.mxu2 %v3389_v10 }
  0x3f   :  { %370 = vmatpush.msrb.mxu1 %v3618_v61  ;;  %472 = vmatpush.msrb.mxu3 %v3508_v33 }
  0x40   :  { %423 = vmatpush.msrb.mxu2 %v3396_v11 }
  0x41   :  { %371 = vmatpush.msrb.mxu1 %v3628_v63  ;;  %473 = vmatpush.msrb.mxu3 %v3523_v46 }
  0x42   :  { %424 = vmatpush.msrb.mxu2 %v3403_v12 }
  0x43   :  { %372 = vmatpush.msrb.mxu1 %v3641_v5  ;;  %474 = vmatpush.msrb.mxu3 %v3533_v48 }
  0x44   :  { %425 = vmatpush.msrb.mxu2 %v3410_v13 }
  0x45   :  { %475 = vmatpush.msrb.mxu3 %v3545_v50 }
  0x46   :  { %426 = vmatpush.msrb.mxu2 %v3417_v14 }
  0x47   :  { %476 = vmatpush.msrb.mxu3 %v3558_v52 }
  0x48   :  { %427 = vmatpush.msrb.mxu2 %v3424_v15 }
  0x49   :  { %477 = vmatpush.msrb.mxu3 %v3574_v54 }
  0x4a   :  { %428 = vmatpush.msrb.mxu2 %v3431_v16 }
  0x4b   :  { %478 = vmatpush.msrb.mxu3 %v3587_v56 }
  0x4c   :  { %429 = vmatpush.msrb.mxu2 %v3438_v17 }
  0x4d   :  { %479 = vmatpush.msrb.mxu3 %v3600_v58 }
  0x4e   :  { %430 = vmatpush.msrb.mxu2 %v3445_v18 }
  0x4f   :  { %480 = vmatpush.msrb.mxu3 %v3613_v60 }
  0x51   :  { %481 = vmatpush.msrb.mxu3 %v3623_v62 }
  0x53   :  { %482 = vmatpush.msrb.mxu3 %v3636_v4 }
  0x55   :  { %483 = vmatpush.msrb.mxu3 %v3649_v6 }
  0x92   :  { %v150_v21 = vpop.f32.mrf.mxu0 }
  0x93   :  { %v151_v22 = vadd.f32 %v3472_v20, %v150_v21  ;;  %v3654_v21 = vld [vmem:[%s5786_s4 + $0xa0] sm:$0xff] }
  0x94   :  { %373 = vmatpush.msrb.mxu1 %v3654_v21  ;;  %499 = vmatpush.msrb.mxu0 %v3654_v21 }
  0xab   :  { %v216_v23 = vpop.f32.mrf.mxu1 }
  0xac   :  { %v219_v24 = vadd.f32 %v216_v23, %v151_v22  ;;  %v3665_v22 = vld [vmem:[%s5786_s4 + $0x98] sm:$0xff]  ;;  %v3670_v23 = vld [vmem:[%s5786_s4 + $0x90] sm:$0xff] }
  0xad   :  { %374 = vmatpush.msrb.mxu1 %v3665_v22  ;;  %500 = vmatpush.msrb.mxu0 %v3665_v22 }
  0xae   :  { %v2636_v25 = vmul.f32 -1.442695, %v219_v24  ;;  %v95_v24 = vld [vmem:[%s5782_s0 + $0x8] sm:$0xff] }
  0xaf   :  { %2629 = vmatmul.msk.f32.gmra.mxu0 %vm108_vm0, %v95_v24  ;;  %375 = vmatpush.msrb.mxu1 %v3670_v23 }
  0xb0   :  { %2716 = vpow2.f32 %v2636_v25  ;;  %v3682_v25 = vld [vmem:[%s5786_s4 + $0x88] sm:$0xff]  ;;  %501 = vmatpush.msrb.mxu0 %v3670_v23 }
  0xb1   :  { %376 = vmatpush.msrb.mxu1 %v3682_v25 }
  0xb2   :  { %502 = vmatpush.msrb.mxu0 %v3682_v25 }
  0xb6   :  { %v2717_v30 = vpop.eup %2716 }
  0xb7   :  { %v223_v32 = vadd.f32 1.0, %v2717_v30  ;;  %v3690_v30 = vld [vmem:[%s5786_s4 + $0x80] sm:$0xff] }
  0xb8   :  { %377 = vmatpush.msrb.mxu1 %v3690_v30  ;;  %503 = vmatpush.msrb.mxu0 %v3690_v30 }
  0xb9   :  { %2718 = vrcp.f32 %v223_v32  ;;  %v235_v37 = vand.u32 2147483648, %v223_v32  ;;  %v233_v39 = vand.u32 2147483647, %v223_v32  ;;  %vm229_vm2 = vweird.f32 %v223_v32  ;;  %378 = vmatmul.f32.vlgmr.msrb.gmra.mxu1 %v5797_v19  ;;  %v3868_v19 = vld [vmem:[#allocation3 + $0x98] sm:$0xff] }
  0xba   :  { %702 = vmatpush.msra.mxu0 %v3478_v26 }
  0xbb   :  { %v236_v41 = vor.u32 1.1754944e-38, %v235_v37  ;;  %vm234_vm4 = vcmp.eq.f32.partialorder %v233_v39, 8.507059e+37 }
  0xbc   :  { %703 = vmatpush.msra.mxu0 %v3483_v27 }
  0xbe   :  { %704 = vmatpush.msra.mxu0 %v3494_v29 }
  0xbf   :  { %v2719_v34 = vpop.eup %2718 }
  0xc0   :  { %v225_v35 = vmul.f32 %v2719_v34, %v223_v32  ;;  %vm230_vm1 = vweird.f32 %v2719_v34  ;;  %705 = vmatpush.msra.mxu0 %v3502_v31 }
  0xc1   :  { %vm231_vm3 = vmor %vm229_vm2, %vm230_vm1 }
  0xc2   :  { %v226_v36 = vsub.f32 1.0, %v225_v35  ;;  %706 = vmatpush.msra.mxu0 %v3508_v33 }
  0xc4   :  { %v227_v38 = vmul.f32 %v2719_v34, %v226_v36  ;;  %707 = vmatpush.msra.mxu0 %v3523_v46 }
  0xc6   :  { %v228_v40 = vadd.f32 %v2719_v34, %v227_v38  ;;  %708 = vmatpush.msra.mxu0 %v3533_v48  ;;  %v3752_v38 = vld [vmem:[%s5787_s5] ss:$0 sm:$0xff] }
  0xc7   :  { %5945 = vst [vmem:[#allocation19_spill] sm:$0xff] %v3752_v38 }
  0xc8   :  { %v232_v42 = vsel %vm231_vm3, %v2719_v34, %v228_v40  ;;  %709 = vmatpush.msra.mxu0 %v3545_v50 }
  0xc9   :  { %v3512_v43 = vsel %vm234_vm4, %v236_v41, %v232_v42 }
  0xca   :  { %245 = vrot.lane.b32.xlu1 %v3512_v43, %s3243_s25  ;;  %241 = vrot.lane.b32.xlu0 %v3512_v43, %s3244_s26  ;;  %v239_v44 = vmul.f32 2.0, %v3512_v43  ;;  %v247_v35 = vmul.f32 0.0, %v3512_v43 }
  0xcb   :  { %710 = vmatpush.msra.mxu0 %v3558_v52 }
  0xcc   :  { %v2637_v45 = vadd.f32 -1.0, %v239_v44 }
  0xcd   :  { %711 = vmatpush.msra.mxu0 %v3574_v54 }
  0xcf   :  { %712 = vmatpush.msra.mxu0 %v3587_v56  ;;  %v96_v56 = vld [vmem:[%s5782_s0 + $0x10] sm:$0xff] }
  0xd0   :  { %2630 = vmatmul.msk.f32.gmra.mxu0 %vm108_vm0, %v96_v56  ;;  %v3784_v56 = vld [vmem:[#allocation3 + $0xf8] sm:$0xff] }
  0xd1   :  { %713 = vmatpush.msra.mxu0 %v3600_v58 }
  0xd2   :  { %243 = vrot.lane.b32.xlu0 %v2637_v45, %s3245_s27 }
  0xd3   :  { %714 = vmatpush.msra.mxu0 %v3613_v60 }
  0xd5   :  { %715 = vmatpush.msra.mxu0 %v3623_v62 }
  0xd7   :  { %716 = vmatpush.msra.mxu0 %v3636_v4 }
  0xd9   :  { %717 = vmatpush.msra.mxu0 %v3649_v6 }
 0x12c   :  { %v153_v36 = vpop.f32.mrf.mxu0 }
 0x12d   :  { %v154_v37 = vadd.f32 %v3472_v20, %v153_v36  ;;  %v3873_v20 = vld [vmem:[#allocation3 + $0x90] sm:$0xff] }
 0x136   :  { %v379_v39 = vpop.f32.mrf.mxu1 }
 0x13c   :  { %v242_v32 = vpop.permute.xlu0 %241  ;;  %v246_v31 = vpop.permute.xlu1 %245 }
 0x144   :  { %v244_v34 = vpop.permute.xlu0 %243 }
 0x145   :  { %v248_v26 = vmul.f32 %v244_v34, %v242_v32 }
 0x147   :  { %v3714_v27 = vadd.f32 %v248_v26, %v247_v35 }
 0x149   :  { %2720 = vtanh.f32 %v3714_v27 }
 0x14f   :  { %v2721_v29 = vpop.eup %2720 }
 0x150   :  { %v251_v33 = vmul.f32 %v2721_v29, %v246_v31 }
 0x152   :  { %269 = vmatmul.f32.vlgmr.msra.gmra.mxu2 %v251_v33  ;;  %358 = vmatmul.f32.vlgmr.msra.gmra.mxu3 %v251_v33 }
 0x153   :  { %649 = vmatpush.msra.mxu3 %v3333_v0  ;;  %596 = vmatpush.msra.mxu2 %v3784_v56 }
 0x155   :  { %650 = vmatpush.msra.mxu3 %v3338_v1 }
 0x157   :  { %651 = vmatpush.msra.mxu3 %v3345_v2 }
 0x159   :  { %652 = vmatpush.msra.mxu3 %v3352_v3 }
 0x15b   :  { %653 = vmatpush.msra.mxu3 %v3367_v7 }
 0x15d   :  { %654 = vmatpush.msra.mxu3 %v3374_v8 }
 0x15f   :  { %655 = vmatpush.msra.mxu3 %v3382_v9 }
 0x161   :  { %656 = vmatpush.msra.mxu3 %v3389_v10 }
 0x163   :  { %657 = vmatpush.msra.mxu3 %v3396_v11 }
 0x165   :  { %658 = vmatpush.msra.mxu3 %v3403_v12 }
 0x167   :  { %659 = vmatpush.msra.mxu3 %v3410_v13 }
 0x169   :  { %660 = vmatpush.msra.mxu3 %v3417_v14 }
 0x16b   :  { %661 = vmatpush.msra.mxu3 %v3424_v15  ;;  %v3885_v15 = vld [vmem:[#allocation3 + $0x80] sm:$0xff] }
 0x16d   :  { %662 = vmatpush.msra.mxu3 %v3431_v16  ;;  %v3883_v16 = vld [vmem:[#allocation3] sm:$0xff] }
 0x16f   :  { %663 = vmatpush.msra.mxu3 %v3438_v17  ;;  %v3879_v17 = vld [vmem:[#allocation3 + $0x88] sm:$0xff] }
 0x171   :  { %664 = vmatpush.msra.mxu3 %v3445_v18  ;;  %v3877_v18 = vld [vmem:[#allocation3 + $0x8] sm:$0xff] }
 0x1d5   :  { %v270_v40 = vpop.f32.mrf.mxu2  ;;  %v359_v41 = vpop.f32.mrf.mxu3 }
 0x1d6   :  { %v273_v42 = vadd.f32 %v270_v40, %v154_v37  ;;  %v360_v43 = vadd.f32 %v3752_v38, %v359_v41  ;;  %v3871_v38 = vld [vmem:[#allocation3 + $0x10] sm:$0xff] }
 0x1d8   :  { %v2638_v44 = vmul.f32 -1.442695, %v273_v42  ;;  %v380_v45 = vadd.f32 %v379_v39, %v360_v43 }
 0x1da   :  { %2722 = vpow2.f32 %v2638_v44  ;;  %v2640_v46 = vmul.f32 -1.442695, %v380_v45 }
 0x1dc   :  { %2724 = vpow2.f32 %v2640_v46 }
 0x1e0   :  { %v2723_v48 = vpop.eup %2722 }
 0x1e1   :  { %v277_v50 = vadd.f32 1.0, %v2723_v48 }
 0x1e2   :  { %v2725_v52 = vpop.eup %2724 }
 0x1e3   :  { %2726 = vrcp.f32 %v277_v50  ;;  %v385_v54 = vadd.f32 1.0, %v2725_v52  ;;  %v289_v24 = vand.u32 2147483648, %v277_v50  ;;  %v287_v34 = vand.u32 2147483647, %v277_v50  ;;  %v98_v52 = vld [vmem:[%s5782_s0 + $0x20] sm:$0xff] }
 0x1e4   :  { %vm283_vm6 = vweird.f32 %v277_v50 }
 0x1e5   :  { %2728 = vrcp.f32 %v385_v54  ;;  %v397_v26 = vand.u32 2147483648, %v385_v54  ;;  %v395_v33 = vand.u32 2147483647, %v385_v54  ;;  %v290_v36 = vor.u32 1.1754944e-38, %v289_v24  ;;  %v3803_v24 = vld [vmem:[#allocation3 + $0xe0] sm:$0xff] }
 0x1e6   :  { %vm288_vm9 = vcmp.eq.f32.partialorder %v287_v34, 8.507059e+37  ;;  %vm391_vm10 = vweird.f32 %v385_v54  ;;  %v3810_v34 = vld [vmem:[#allocation3 + $0x58] sm:$0xff] }
 0x1e7   :  { %v398_v41 = vor.u32 1.1754944e-38, %v397_v26  ;;  %vm396_vm12 = vcmp.eq.f32.partialorder %v395_v33, 8.507059e+37  ;;  %v3817_v26 = vld [vmem:[#allocation3 + $0x50] sm:$0xff]  ;;  %v3825_v33 = vld [vmem:[#allocation3 + $0xc8] sm:$0xff] }
 0x1e9   :  { %v2727_v58 = vpop.eup %2726 }
 0x1ea   :  { %v279_v60 = vmul.f32 %v2727_v58, %v277_v50  ;;  %vm284_vm5 = vweird.f32 %v2727_v58  ;;  %v97_v50 = vld [vmem:[%s5782_s0 + $0x18] sm:$0xff] }
 0x1eb   :  { %v2729_v62 = vpop.eup %2728  ;;  %vm285_vm8 = vmor %vm283_vm6, %vm284_vm5  ;;  %2631 = vmatmul.msk.f32.gmra.mxu0 %vm108_vm0, %v97_v50  ;;  %v3857_v50 = vld [vmem:[#allocation3 + $0x20] sm:$0xff] }
 0x1ec   :  { %v280_v4 = vsub.f32 1.0, %v279_v60  ;;  %v387_v6 = vmul.f32 %v2729_v62, %v385_v54  ;;  %vm392_vm7 = vweird.f32 %v2729_v62  ;;  %v3782_v54 = vld [vmem:[#allocation3 + $0x78] sm:$0xff]  ;;  %v3790_v60 = vld [vmem:[#allocation3 + $0xf0] sm:$0xff] }
 0x1ed   :  { %vm393_vm11 = vmor %vm391_vm10, %vm392_vm7  ;;  %576 = vmatpush.msra.mxu1 %v3782_v54  ;;  %597 = vmatpush.msra.mxu2 %v3790_v60 }
 0x1ee   :  { %v281_v32 = vmul.f32 %v2727_v58, %v280_v4  ;;  %v388_v35 = vsub.f32 1.0, %v387_v6  ;;  %v3796_v4 = vld [vmem:[#allocation3 + $0xe8] sm:$0xff]  ;;  %v3801_v6 = vld [vmem:[#allocation3 + $0x60] sm:$0xff] }
 0x1ef   :  { %598 = vmatpush.msra.mxu2 %v3796_v4 }
 0x1f0   :  { %v282_v29 = vadd.f32 %v2727_v58, %v281_v32  ;;  %v389_v31 = vmul.f32 %v2729_v62, %v388_v35  ;;  %v99_v32 = vld [vmem:[%s5782_s0 + $0x28] sm:$0xff]  ;;  %v3812_v35 = vld [vmem:[#allocation3 + $0xd8] sm:$0xff] }
 0x1f1   :  { %599 = vmatpush.msra.mxu2 %v3803_v24 }
 0x1f2   :  { %v286_v37 = vsel %vm285_vm8, %v2727_v58, %v282_v29  ;;  %v390_v39 = vadd.f32 %v2729_v62, %v389_v31  ;;  %v3788_v58 = vld [vmem:[#allocation3 + $0x70] sm:$0xff]  ;;  %v3823_v31 = vld [vmem:[#allocation3 + $0x48] sm:$0xff] }
 0x1f3   :  { %v3759_v40 = vsel %vm288_vm9, %v290_v36, %v286_v37  ;;  %2632 = vmatmul.msk.f32.gmra.mxu0 %vm108_vm0, %v98_v52  ;;  %577 = vmatpush.msra.mxu1 %v3788_v58  ;;  %v3819_v29 = vld [vmem:[#allocation3 + $0xd0] sm:$0xff]  ;;  %v3829_v36 = vld [vmem:[#allocation3 + $0x40] sm:$0xff] }
 0x1f4   :  { %295 = vrot.lane.b32.xlu1 %v3759_v40, %s3244_s26  ;;  %v394_v42 = vsel %vm393_vm11, %v2729_v62, %v390_v39  ;;  %v293_v43 = vmul.f32 2.0, %v3759_v40  ;;  %v3793_v62 = vld [vmem:[#allocation3 + $0x68] sm:$0xff]  ;;  %600 = vmatpush.msra.mxu2 %v3812_v35  ;;  %v3831_v37 = vld [vmem:[#allocation3 + $0xc0] sm:$0xff]  ;;  %v100_v39 = vld [vmem:[%s5782_s0 + $0x30] sm:$0xff]  ;;  %v301_v13 = vmul.f32 %v3759_v40, %v3714_v27 }
 0x1f5   :  { %v3764_v44 = vsel %vm396_vm12, %v398_v41, %v394_v42  ;;  %578 = vmatpush.msra.mxu1 %v3793_v62  ;;  %v3838_v41 = vld [vmem:[#allocation3 + $0x38] sm:$0xff]  ;;  %v3859_v52 = vld [vmem:[#allocation3 + $0xa0] sm:$0xff] }
 0x1f6   :  { %403 = vrot.lane.b32.xlu0 %v3764_v44, %s3244_s26  ;;  %v2639_v45 = vadd.f32 -1.0, %v293_v43  ;;  %v401_v46 = vmul.f32 2.0, %v3764_v44  ;;  %601 = vmatpush.msra.mxu2 %v3819_v29  ;;  %v3840_v42 = vld [vmem:[#allocation3 + $0xb8] sm:$0xff]  ;;  %v3845_v43 = vld [vmem:[#allocation3 + $0x30] sm:$0xff] }
 0x1f7   :  { %579 = vmatpush.msra.mxu1 %v3801_v6 }
 0x1f8   :  { %297 = vrot.lane.b32.xlu2 %v2639_v45, %s3245_s27  ;;  %v2641_v48 = vadd.f32 -1.0, %v401_v46  ;;  %602 = vmatpush.msra.mxu2 %v3825_v33  ;;  %v3847_v45 = vld [vmem:[#allocation3 + $0xb0] sm:$0xff]  ;;  %v3851_v46 = vld [vmem:[#allocation3 + $0x28] sm:$0xff] }
 0x1f9   :  { %580 = vmatpush.msra.mxu1 %v3810_v34 }
 0x1fa   :  { %603 = vmatpush.msra.mxu2 %v3831_v37 }
 0x1fb   :  { %2633 = vmatmul.msk.f32.gmra.mxu0 %vm108_vm0, %v99_v32  ;;  %581 = vmatpush.msra.mxu1 %v3817_v26  ;;  %v101_v32 = vld [vmem:[%s5782_s0 + $0x38] sm:$0xff] }
 0x1fc   :  { %405 = vrot.lane.b32.xlu1 %v2641_v48, %s3245_s27  ;;  %604 = vmatpush.msra.mxu2 %v3840_v42  ;;  %v3853_v48 = vld [vmem:[#allocation3 + $0xa8] sm:$0xff] }
 0x1fd   :  { %582 = vmatpush.msra.mxu1 %v3823_v31 }
 0x1fe   :  { %605 = vmatpush.msra.mxu2 %v3847_v45 }
 0x1ff   :  { %583 = vmatpush.msra.mxu1 %v3829_v36 }
 0x200   :  { %299 = vrot.lane.b32.xlu2 %v3759_v40, %s3243_s25  ;;  %606 = vmatpush.msra.mxu2 %v3853_v48 }
 0x201   :  { %584 = vmatpush.msra.mxu1 %v3838_v41 }
 0x202   :  { %607 = vmatpush.msra.mxu2 %v3859_v52 }
 0x203   :  { %2634 = vmatmul.msk.f32.gmra.mxu0 %vm108_vm0, %v100_v39  ;;  %585 = vmatpush.msra.mxu1 %v3845_v43  ;;  %v3866_v39 = vld [vmem:[#allocation3 + $0x18] sm:$0xff] }
 0x204   :  { %608 = vmatpush.msra.mxu2 %v3868_v19 }
 0x205   :  { %586 = vmatpush.msra.mxu1 %v3851_v46 }
 0x206   :  { %609 = vmatpush.msra.mxu2 %v3873_v20 }
 0x207   :  { %587 = vmatpush.msra.mxu1 %v3857_v50 }
 0x208   :  { %407 = vrot.lane.b32.xlu2 %v3764_v44, %s3243_s25  ;;  %610 = vmatpush.msra.mxu2 %v3879_v17 }
 0x209   :  { %588 = vmatpush.msra.mxu1 %v3866_v39 }
 0x20a   :  { %611 = vmatpush.msra.mxu2 %v3885_v15 }
 0x20b   :  { %2635 = vmatmul.msk.f32.gmra.mxu0 %vm108_vm0, %v101_v32  ;;  %589 = vmatpush.msra.mxu1 %v3871_v38 }
 0x20d   :  { %590 = vmatpush.msra.mxu1 %v3877_v18 }
 0x20f   :  { %591 = vmatpush.msra.mxu1 %v3883_v16 }
 0x211   :  { %722 = vmatpush.msrb.mxu1 %v3489_v28 }
 0x213   :  { %723 = vmatpush.msrb.mxu1 %v3528_v47 }
 0x215   :  { %724 = vmatpush.msrb.mxu1 %v3540_v49 }
 0x217   :  { %725 = vmatpush.msrb.mxu1 %v3550_v51  ;;  %v409_v51 = vmul.f32 0.0, %v3764_v44 }
 0x219   :  { %726 = vmatpush.msrb.mxu1 %v3563_v53 }
 0x21b   :  { %727 = vmatpush.msrb.mxu1 %v3579_v55 }
 0x21d   :  { %728 = vmatpush.msrb.mxu1 %v3592_v57 }
 0x21f   :  { %729 = vmatpush.msrb.mxu1 %v3605_v59 }
 0x221   :  { %730 = vmatpush.msrb.mxu1 %v3618_v61  ;;  %v5946_v61 = vmov 0.0  }
 0x223   :  { %731 = vmatpush.msrb.mxu1 %v3628_v63  ;;  %v5947_v63 = vld [vmem:[#allocation10_spill] sm:$0xff] }
 0x225   :  { %732 = vmatpush.msrb.mxu1 %v3641_v5  ;;  %v5948_v5 = vld [vmem:[#allocation11_spill] sm:$0xff] }
 0x227   :  { %733 = vmatpush.msrb.mxu1 %v3654_v21  ;;  %v5949_v21 = vld [vmem:[#allocation12_spill] sm:$0xff] }
 0x229   :  { %734 = vmatpush.msrb.mxu1 %v3665_v22 }
 0x22b   :  { %735 = vmatpush.msrb.mxu1 %v3670_v23 }
 0x22d   :  { %736 = vmatpush.msrb.mxu1 %v3682_v25 }
 0x22f   :  { %737 = vmatpush.msrb.mxu1 %v3690_v30  ;;  %v5960_v30 = vld [vmem:[#allocation18_spill] sm:$0xff] }
 0x252   :  { %v298_v32 = vpop.permute.xlu2 %297 }
 0x25a   :  { %v300_v49 = vpop.permute.xlu2 %299 }
 0x262   :  { %v408_v57 = vpop.permute.xlu2 %407 }
 0x266   :  { %v296_v14 = vpop.permute.xlu1 %295 }
 0x267   :  { %v302_v12 = vmul.f32 %v298_v32, %v296_v14 }
 0x268   :  { %v404_v28 = vpop.permute.xlu0 %403 }
 0x269   :  { %v3899_v11 = vadd.f32 %v302_v12, %v301_v13 }
 0x26b   :  { %2730 = vtanh.f32 %v3899_v11 }
 0x26e   :  { %v406_v47 = vpop.permute.xlu1 %405 }
 0x26f   :  { %v410_v53 = vmul.f32 %v406_v47, %v404_v28  ;;  %v5961_v28 = vld [vmem:[#allocation19_spill] sm:$0xff] }
 0x271   :  { %v2731_v14 = vpop.eup %2730  ;;  %v3907_v55 = vadd.f32 %v410_v53, %v409_v51 }
 0x272   :  { %v305_v12 = vmul.f32 %v2731_v14, %v300_v49  ;;  %v3980_v14 = vld [vmem:[%s5789_s7] ss:$0 sm:$0xff] }
 0x273   :  { %2732 = vtanh.f32 %v3907_v55 }
 0x274   :  { %431 = vmatmul.f32.vlgmr.msrb.gmra.mxu2 %v305_v12  ;;  %484 = vmatmul.f32.vlgmr.msrb.gmra.mxu3 %v305_v12 }
 0x275   :  { %774 = vmatpush.msrb.mxu2 %v3782_v54  ;;  %794 = vmatpush.msrb.mxu3 %v3784_v56 }
 0x277   :  { %775 = vmatpush.msrb.mxu2 %v3788_v58  ;;  %795 = vmatpush.msrb.mxu3 %v3790_v60 }
 0x279   :  { %v2733_v13 = vpop.eup %2732  ;;  %776 = vmatpush.msrb.mxu2 %v3793_v62  ;;  %796 = vmatpush.msrb.mxu3 %v3796_v4 }
 0x27a   :  { %v413_v59 = vmul.f32 %v2733_v13, %v408_v57 }
 0x27b   :  { %777 = vmatpush.msrb.mxu2 %v3801_v6  ;;  %797 = vmatpush.msrb.mxu3 %v3803_v24 }
 0x27c   :  { %504 = vmatmul.f32.vlgmr.msrb.gmra.mxu0 %v413_v59  ;;  %592 = vmatmul.f32.vlgmr.msra.gmra.mxu1 %v413_v59 }
 0x27d   :  { %612 = vmatmul.f32.vlgmr.msra.gmra.mxu2 %v5946_v61  ;;  %798 = vmatpush.msrb.mxu3 %v3812_v35 }
 0x27e   :  { %778 = vmatpush.msrb.mxu2 %v3810_v34 }
 0x27f   :  { %799 = vmatpush.msrb.mxu3 %v3819_v29 }
 0x280   :  { %779 = vmatpush.msrb.mxu2 %v3817_v26 }
 0x281   :  { %800 = vmatpush.msrb.mxu3 %v3825_v33 }
 0x282   :  { %780 = vmatpush.msrb.mxu2 %v3823_v31 }
 0x283   :  { %801 = vmatpush.msrb.mxu3 %v3831_v37 }
 0x284   :  { %781 = vmatpush.msrb.mxu2 %v3829_v36 }
 0x285   :  { %802 = vmatpush.msrb.mxu3 %v3840_v42 }
 0x286   :  { %782 = vmatpush.msrb.mxu2 %v3838_v41 }
 0x287   :  { %803 = vmatpush.msrb.mxu3 %v3847_v45 }
 0x288   :  { %783 = vmatpush.msrb.mxu2 %v3845_v43 }
 0x289   :  { %804 = vmatpush.msrb.mxu3 %v3853_v48 }
 0x28a   :  { %784 = vmatpush.msrb.mxu2 %v3851_v46 }
 0x28b   :  { %805 = vmatpush.msrb.mxu3 %v3859_v52 }
 0x28c   :  { %785 = vmatpush.msrb.mxu2 %v3857_v50 }
 0x28d   :  { %806 = vmatpush.msrb.mxu3 %v3868_v19 }
 0x28e   :  { %786 = vmatpush.msrb.mxu2 %v3866_v39 }
 0x28f   :  { %807 = vmatpush.msrb.mxu3 %v3873_v20 }
 0x290   :  { %787 = vmatpush.msrb.mxu2 %v3871_v38 }
 0x291   :  { %808 = vmatpush.msrb.mxu3 %v3879_v17 }
 0x292   :  { %788 = vmatpush.msrb.mxu2 %v3877_v18 }
 0x293   :  { %809 = vmatpush.msrb.mxu3 %v3885_v15 }
 0x294   :  { %789 = vmatpush.msrb.mxu2 %v3883_v16 }
 0x296   :  { %955 = vmatpush.msra.mxu2 %v3333_v0  ;;  %v5950_v0 = vld [vmem:[#allocation13_spill] sm:$0xff] }
 0x298   :  { %956 = vmatpush.msra.mxu2 %v3338_v1  ;;  %v5951_v1 = vld [vmem:[#allocation14_spill] sm:$0xff] }
 0x29a   :  { %957 = vmatpush.msra.mxu2 %v3345_v2  ;;  %v5952_v2 = vld [vmem:[#allocation15_spill] sm:$0xff] }
 0x29b   :  { %5962 = vst [vmem:[#allocation15_spill] sm:$0xff] %v3980_v14 }
 0x29c   :  { %958 = vmatpush.msra.mxu2 %v3352_v3  ;;  %v5953_v3 = vld [vmem:[#allocation16_spill] sm:$0xff] }
 0x29e   :  { %959 = vmatpush.msra.mxu2 %v3367_v7  ;;  %v5954_v7 = vld [vmem:[#allocation17_spill] sm:$0xff] }
 0x2a0   :  { %960 = vmatpush.msra.mxu2 %v3374_v8  ;;  %v156_v8 = vpop.f32.mrf.mxu0 }
 0x2a1   :  { %v157_v27 = vadd.f32 %v5960_v30, %v156_v8 }
 0x2a2   :  { %961 = vmatpush.msra.mxu2 %v3382_v9 }
 0x2a4   :  { %962 = vmatpush.msra.mxu2 %v3389_v10 }
 0x2a6   :  { %963 = vmatpush.msra.mxu2 %v5947_v63 }
 0x2a8   :  { %964 = vmatpush.msra.mxu2 %v5948_v5  ;;  %v3965_v9 = vpop.f32.mrf.mxu0 }
 0x2a9   :  { %5955 = vst [vmem:[#allocation10_spill] sm:$0xff] %v3965_v9  ;;  %v4079_v9 = vld [vmem:[#allocation5 + $0xa0] sm:$0xff] }
 0x2aa   :  { %965 = vmatpush.msra.mxu2 %v5949_v21  ;;  %5984 = vst [vmem:[#allocation37_spill] sm:$0xff] %v4079_v9 }
 0x2ac   :  { %966 = vmatpush.msra.mxu2 %v5950_v0 }
 0x2ae   :  { %967 = vmatpush.msra.mxu2 %v5951_v1 }
 0x2b0   :  { %968 = vmatpush.msra.mxu2 %v5952_v2  ;;  %v3967_v10 = vpop.f32.mrf.mxu0 }
 0x2b1   :  { %5956 = vst [vmem:[#allocation11_spill] sm:$0xff] %v3967_v10  ;;  %v4073_v10 = vld [vmem:[#allocation5 + $0xa8] sm:$0xff] }
 0x2b2   :  { %969 = vmatpush.msra.mxu2 %v5953_v3  ;;  %5982 = vst [vmem:[#allocation35_spill] sm:$0xff] %v4073_v10 }
 0x2b4   :  { %970 = vmatpush.msra.mxu2 %v5954_v7 }
 0x2b8   :  { %v3969_v22 = vpop.f32.mrf.mxu0 }
 0x2b9   :  { %5957 = vst [vmem:[#allocation12_spill] sm:$0xff] %v3969_v22  ;;  %v4071_v22 = vld [vmem:[#allocation5 + $0x18] sm:$0xff] }
 0x2ba   :  { %5981 = vst [vmem:[#allocation34_spill] sm:$0xff] %v4071_v22 }
 0x2c0   :  { %v3971_v23 = vpop.f32.mrf.mxu0 }
 0x2c1   :  { %5958 = vst [vmem:[#allocation13_spill] sm:$0xff] %v3971_v23  ;;  %v4069_v23 = vld [vmem:[#allocation5 + $0xb0] sm:$0xff] }
 0x2c2   :  { %5980 = vst [vmem:[#allocation33_spill] sm:$0xff] %v4069_v23 }
 0x2c8   :  { %v3973_v25 = vpop.f32.mrf.mxu0 }
 0x2c9   :  { %5959 = vst [vmem:[#allocation14_spill] sm:$0xff] %v3973_v25  ;;  %v4065_v25 = vld [vmem:[#allocation5 + $0x20] sm:$0xff] }
 0x2ca   :  { %5979 = vst [vmem:[#allocation32_spill] sm:$0xff] %v4065_v25 }
 0x2f7   :  { %v432_v40 = vpop.f32.mrf.mxu2  ;;  %v485_v44 = vpop.f32.mrf.mxu3 }
 0x2f8   :  { %v435_v32 = vadd.f32 %v432_v40, %v157_v27  ;;  %v486_v47 = vadd.f32 %v5961_v28, %v485_v44 }
 0x2f9   :  { %v505_v49 = vpop.f32.mrf.mxu0  ;;  %v593_v13 = vpop.f32.mrf.mxu1 }
 0x2fa   :  { %v2642_v51 = vmul.f32 -1.442695, %v435_v32  ;;  %v506_v53 = vadd.f32 %v505_v49, %v486_v47  ;;  %v594_v57 = vadd.f32 %v3980_v14, %v593_v13  ;;  %v4077_v14 = vld [vmem:[#allocation5 + $0x10] sm:$0xff] }
 0x2fb   :  { %5983 = vst [vmem:[#allocation36_spill] sm:$0xff] %v4077_v14 }
 0x2fc   :  { %2734 = vpow2.f32 %v2642_v51  ;;  %v2644_v12 = vmul.f32 -1.442695, %v506_v53 }
 0x2fe   :  { %2736 = vpow2.f32 %v2644_v12 }
 0x300   :  { %v613_v59 = vpop.f32.mrf.mxu2 }
 0x301   :  { %v614_v63 = vadd.f32 %v613_v59, %v594_v57 }
 0x302   :  { %v2735_v5 = vpop.eup %2734 }
 0x303   :  { %v439_v21 = vadd.f32 1.0, %v2735_v5  ;;  %v2646_v0 = vmul.f32 -1.442695, %v614_v63 }
 0x304   :  { %v2737_v1 = vpop.eup %2736 }
 0x305   :  { %2738 = vrcp.f32 %v439_v21  ;;  %v511_v2 = vadd.f32 1.0, %v2737_v1  ;;  %v451_v32 = vand.u32 2147483648, %v439_v21  ;;  %v449_v47 = vand.u32 2147483647, %v439_v21 }
 0x306   :  { %2740 = vpow2.f32 %v2646_v0  ;;  %vm445_vm14 = vweird.f32 %v439_v21 }
 0x307   :  { %2742 = vrcp.f32 %v511_v2  ;;  %v523_v51 = vand.u32 2147483648, %v511_v2  ;;  %v521_v13 = vand.u32 2147483647, %v511_v2  ;;  %v452_v57 = vor.u32 1.1754944e-38, %v451_v32 }
 0x308   :  { %vm450_vm1 = vcmp.eq.f32.partialorder %v449_v47, 8.507059e+37  ;;  %vm517_vm2 = vweird.f32 %v511_v2 }
 0x309   :  { %v524_v1 = vor.u32 1.1754944e-38, %v523_v51  ;;  %vm522_vm4 = vcmp.eq.f32.partialorder %v521_v13, 8.507059e+37 }
 0x30b   :  { %v2739_v3 = vpop.eup %2738 }
 0x30c   :  { %v2741_v7 = vpop.eup %2740  ;;  %v441_v8 = vmul.f32 %v2739_v3, %v439_v21  ;;  %vm446_vm13 = vweird.f32 %v2739_v3 }
 0x30d   :  { %v2743_v30 = vpop.eup %2742  ;;  %v619_v27 = vadd.f32 1.0, %v2741_v7  ;;  %vm447_vm0 = vmor %vm445_vm14, %vm446_vm13 }
 0x30e   :  { %v442_v40 = vsub.f32 1.0, %v441_v8  ;;  %v513_v44 = vmul.f32 %v2743_v30, %v511_v2  ;;  %vm518_vm15 = vweird.f32 %v2743_v30 }
 0x30f   :  { %2744 = vrcp.f32 %v619_v27  ;;  %vm519_vm3 = vmor %vm517_vm2, %vm518_vm15  ;;  %v631_v32 = vand.u32 2147483648, %v619_v27  ;;  %v629_v47 = vand.u32 2147483647, %v619_v27  ;;  %vm625_vm6 = vweird.f32 %v619_v27 }
 0x310   :  { %v443_v28 = vmul.f32 %v2739_v3, %v442_v40  ;;  %v514_v49 = vsub.f32 1.0, %v513_v44 }
 0x311   :  { %v632_v51 = vor.u32 1.1754944e-38, %v631_v32  ;;  %vm630_vm8 = vcmp.eq.f32.partialorder %v629_v47, 8.507059e+37  ;;  %v4039_v32 = vld [vmem:[#allocation5 + $0xd8] sm:$0xff]  ;;  %v4045_v47 = vld [vmem:[#allocation5 + $0xd0] sm:$0xff] }
 0x312   :  { %v444_v53 = vadd.f32 %v2739_v3, %v443_v28  ;;  %v515_v12 = vmul.f32 %v2743_v30, %v514_v49  ;;  %5970 = vst [vmem:[#allocation23_spill] sm:$0xff] %v4039_v32 }
 0x313   :  { %5972 = vst [vmem:[#allocation25_spill] sm:$0xff] %v4045_v47 }
 0x314   :  { %v448_v59 = vsel %vm447_vm0, %v2739_v3, %v444_v53  ;;  %v516_v63 = vadd.f32 %v2743_v30, %v515_v12 }
 0x315   :  { %v2745_v5 = vpop.eup %2744  ;;  %v3983_v0 = vsel %vm450_vm1, %v452_v57, %v448_v59  ;;  %v4010_v59 = vld [vmem:[#allocation5 + $0x70] sm:$0xff] }
 0x316   :  { %457 = vrot.lane.b32.xlu0 %v3983_v0, %s3244_s26  ;;  %v520_v21 = vsel %vm519_vm3, %v2743_v30, %v516_v63  ;;  %v455_v7 = vmul.f32 2.0, %v3983_v0  ;;  %v621_v8 = vmul.f32 %v2745_v5, %v619_v27  ;;  %vm626_vm5 = vweird.f32 %v2745_v5  ;;  %v4007_v27 = vld [vmem:[#allocation5 + $0x78] sm:$0xff]  ;;  %v4013_v63 = vld [vmem:[#allocation5 + $0x68] sm:$0xff] }
 0x317   :  { %v3988_v40 = vsel %vm522_vm4, %v524_v1, %v520_v21  ;;  %vm627_vm7 = vmor %vm625_vm6, %vm626_vm5  ;;  %882 = vmatpush.msrb.mxu0 %v4007_v27  ;;  %5963 = vst [vmem:[#allocation16_spill] sm:$0xff] %v4013_v63  ;;  %v4017_v1 = vld [vmem:[#allocation5 + $0x60] sm:$0xff]  ;;  %v4021_v21 = vld [vmem:[#allocation5 + $0xf0] sm:$0xff] }
 0x318   :  { %529 = vrot.lane.b32.xlu2 %v3988_v40, %s3244_s26  ;;  %v2643_v3 = vadd.f32 -1.0, %v455_v7  ;;  %v527_v2 = vmul.f32 2.0, %v3988_v40  ;;  %v622_v44 = vsub.f32 1.0, %v621_v8  ;;  %5964 = vst [vmem:[#allocation17_spill] sm:$0xff] %v4017_v1  ;;  %v4025_v7 = vld [vmem:[#allocation5 + $0x58] sm:$0xff]  ;;  %v4027_v8 = vld [vmem:[#allocation5 + $0xe8] sm:$0xff] }
 0x319   :  { %883 = vmatpush.msrb.mxu0 %v4010_v59  ;;  %5965 = vst [vmem:[#allocation18_spill] sm:$0xff] %v4025_v7 }
 0x31a   :  { %459 = vrot.lane.b32.xlu1 %v2643_v3, %s3245_s27  ;;  %v623_v28 = vmul.f32 %v2745_v5, %v622_v44  ;;  %v2645_v30 = vadd.f32 -1.0, %v527_v2  ;;  %5966 = vst [vmem:[#allocation19_spill] sm:$0xff] %v4027_v8  ;;  %v4031_v3 = vld [vmem:[#allocation5 + $0x50] sm:$0xff]  ;;  %v4033_v2 = vld [vmem:[#allocation5 + $0xe0] sm:$0xff]  ;;  %v4037_v44 = vld [vmem:[#allocation5 + $0x48] sm:$0xff] }
 0x31b   :  { %884 = vmatpush.msrb.mxu0 %v4013_v63  ;;  %5967 = vst [vmem:[#allocation20_spill] sm:$0xff] %v4031_v3 }
 0x31c   :  { %v624_v49 = vadd.f32 %v2745_v5, %v623_v28  ;;  %5968 = vst [vmem:[#allocation21_spill] sm:$0xff] %v4033_v2  ;;  %v4043_v28 = vld [vmem:[#allocation5 + $0x40] sm:$0xff] }
 0x31d   :  { %885 = vmatpush.msrb.mxu0 %v4017_v1  ;;  %5969 = vst [vmem:[#allocation22_spill] sm:$0xff] %v4037_v44 }
 0x31e   :  { %531 = vrot.lane.b32.xlu0 %v2645_v30, %s3245_s27  ;;  %v628_v53 = vsel %vm627_vm7, %v2745_v5, %v624_v49  ;;  %v4015_v5 = vld [vmem:[#allocation5 + $0xf8] sm:$0xff]  ;;  %5971 = vst [vmem:[#allocation24_spill] sm:$0xff] %v4043_v28  ;;  %v4049_v30 = vld [vmem:[#allocation5 + $0xc8] sm:$0xff] }
 0x31f   :  { %v3995_v12 = vsel %vm630_vm8, %v632_v51, %v628_v53  ;;  %902 = vmatpush.msra.mxu1 %v4015_v5  ;;  %886 = vmatpush.msrb.mxu0 %v4025_v7  ;;  %5973 = vst [vmem:[#allocation26_spill] sm:$0xff] %v4049_v30  ;;  %v4051_v49 = vld [vmem:[#allocation5 + $0x38] sm:$0xff]  ;;  %v4055_v51 = vld [vmem:[#allocation5 + $0x30] sm:$0xff]  ;;  %v4057_v53 = vld [vmem:[#allocation5 + $0xc0] sm:$0xff] }
 0x320   :  { %v635_v13 = vmul.f32 2.0, %v3995_v12  ;;  %5974 = vst [vmem:[#allocation27_spill] sm:$0xff] %v4051_v49 }
 0x321   :  { %903 = vmatpush.msra.mxu1 %v4021_v21  ;;  %887 = vmatpush.msrb.mxu0 %v4031_v3  ;;  %5975 = vst [vmem:[#allocation28_spill] sm:$0xff] %v4055_v51 }
 0x322   :  { %637 = vrot.lane.b32.xlu1 %v3995_v12, %s3244_s26  ;;  %v2647_v57 = vadd.f32 -1.0, %v635_v13  ;;  %5976 = vst [vmem:[#allocation29_spill] sm:$0xff] %v4057_v53  ;;  %v4061_v13 = vld [vmem:[#allocation5 + $0x28] sm:$0xff] }
 0x323   :  { %904 = vmatpush.msra.mxu1 %v4027_v8  ;;  %888 = vmatpush.msrb.mxu0 %v4037_v44  ;;  %5977 = vst [vmem:[#allocation30_spill] sm:$0xff] %v4061_v13 }
 0x324   :  { %639 = vrot.lane.b32.xlu2 %v2647_v57, %s3245_s27  ;;  %v4063_v57 = vld [vmem:[#allocation5 + $0xb8] sm:$0xff] }
 0x325   :  { %905 = vmatpush.msra.mxu1 %v4033_v2  ;;  %889 = vmatpush.msrb.mxu0 %v4043_v28  ;;  %5978 = vst [vmem:[#allocation31_spill] sm:$0xff] %v4063_v57 }
 0x326   :  { %461 = vrot.lane.b32.xlu0 %v3983_v0, %s3243_s25 }
 0x327   :  { %906 = vmatpush.msra.mxu1 %v4039_v32  ;;  %890 = vmatpush.msrb.mxu0 %v4051_v49 }
 0x329   :  { %907 = vmatpush.msra.mxu1 %v4045_v47  ;;  %891 = vmatpush.msrb.mxu0 %v4055_v51  ;;  %v4085_v51 = vld [vmem:[#allocation5 + $0x98] sm:$0xff] }
 0x32a   :  { %533 = vrot.lane.b32.xlu1 %v3988_v40, %s3243_s25  ;;  %5986 = vst [vmem:[#allocation39_spill] sm:$0xff] %v4085_v51 }
 0x32b   :  { %908 = vmatpush.msra.mxu1 %v4049_v30  ;;  %892 = vmatpush.msrb.mxu0 %v4061_v13  ;;  %v4083_v13 = vld [vmem:[#allocation5 + $0x8] sm:$0xff] }
 0x32c   :  { %641 = vrot.lane.b32.xlu2 %v3995_v12, %s3243_s25  ;;  %5985 = vst [vmem:[#allocation38_spill] sm:$0xff] %v4083_v13 }
 0x32d   :  { %909 = vmatpush.msra.mxu1 %v4057_v53  ;;  %893 = vmatpush.msrb.mxu0 %v4065_v25  ;;  %v4091_v25 = vld [vmem:[#allocation5 + $0x90] sm:$0xff] }
 0x32e   :  { %5988 = vst [vmem:[#allocation41_spill] sm:$0xff] %v4091_v25 }
 0x32f   :  { %910 = vmatpush.msra.mxu1 %v4063_v57  ;;  %894 = vmatpush.msrb.mxu0 %v4071_v22  ;;  %v4089_v57 = vld [vmem:[#allocation5] sm:$0xff] }
 0x330   :  { %5987 = vst [vmem:[#allocation40_spill] sm:$0xff] %v4089_v57  ;;  %v4099_v22 = vld [vmem:[#allocation5 + $0x80] sm:$0xff] }
 0x331   :  { %911 = vmatpush.msra.mxu1 %v4069_v23  ;;  %895 = vmatpush.msrb.mxu0 %v4077_v14  ;;  %v4095_v23 = vld [vmem:[#allocation5 + $0x88] sm:$0xff]  ;;  %5990 = vst [vmem:[#allocation43_spill] sm:$0xff] %v4099_v22 }
 0x332   :  { %5989 = vst [vmem:[#allocation42_spill] sm:$0xff] %v4095_v23 }
 0x333   :  { %912 = vmatpush.msra.mxu1 %v4073_v10  ;;  %896 = vmatpush.msrb.mxu0 %v4083_v13  ;;  %v463_v13 = vmul.f32 %v3983_v0, %v3899_v11 }
 0x335   :  { %913 = vmatpush.msra.mxu1 %v4079_v9  ;;  %897 = vmatpush.msrb.mxu0 %v4089_v57  ;;  %v535_v57 = vmul.f32 %v3988_v40, %v3907_v55  ;;  %v4138_v40 = vld [vmem:[%s5786_s4 + $0xf0] sm:$0xff] }
 0x337   :  { %914 = vmatpush.msra.mxu1 %v4085_v51 }
 0x339   :  { %915 = vmatpush.msra.mxu1 %v4091_v25 }
 0x33b   :  { %916 = vmatpush.msra.mxu1 %v4095_v23 }
 0x33d   :  { %917 = vmatpush.msra.mxu1 %v4099_v22  ;;  %v643_v22 = vmul.f32 0.0, %v3995_v12 }
 0x372   :  { %v530_v9 = vpop.permute.xlu2 %529 }
 0x37e   :  { %v640_v23 = vpop.permute.xlu2 %639 }
 0x388   :  { %v458_v14 = vpop.permute.xlu0 %457 }
 0x38c   :  { %v460_v10 = vpop.permute.xlu1 %459 }
 0x38d   :  { %v464_v49 = vmul.f32 %v460_v10, %v458_v14 }
 0x38f   :  { %v4105_v51 = vadd.f32 %v464_v49, %v463_v13  ;;  %v4150_v13 = vld [vmem:[%s5786_s4 + $0xe8] sm:$0xff] }
 0x390   :  { %v532_v53 = vpop.permute.xlu0 %531 }
 0x391   :  { %2746 = vtanh.f32 %v4105_v51  ;;  %v536_v25 = vmul.f32 %v532_v53, %v530_v9  ;;  %v4120_v9 = vld [vmem:[%s5786_s4 + $0x78] sm:$0xff]  ;;  %v4144_v53 = vld [vmem:[%s5786_s4 + $0x68] sm:$0xff] }
 0x393   :  { %v4110_v28 = vadd.f32 %v536_v25, %v535_v57  ;;  %v4132_v25 = vld [vmem:[%s5786_s4 + $0x70] sm:$0xff]  ;;  %v4158_v57 = vld [vmem:[%s5786_s4 + $0x60] sm:$0xff] }
 0x394   :  { %v638_v30 = vpop.permute.xlu1 %637 }
 0x395   :  { %2748 = vtanh.f32 %v4110_v28  ;;  %v644_v44 = vmul.f32 %v640_v23, %v638_v30 }
 0x397   :  { %v2747_v11 = vpop.eup %2746  ;;  %v4114_v10 = vadd.f32 %v644_v44, %v643_v22  ;;  %v4126_v22 = vld [vmem:[%s5786_s4 + $0xf8] sm:$0xff]  ;;  %v642_v44 = vpop.permute.xlu2 %641 }
 0x398   :  { %v462_v14 = vpop.permute.xlu0 %461 }
 0x399   :  { %2750 = vtanh.f32 %v4114_v10  ;;  %v467_v0 = vmul.f32 %v2747_v11, %v462_v14  ;;  %v4164_v11 = vld [vmem:[%s5786_s4 + $0xe0] sm:$0xff]  ;;  %v4184_v14 = vld [vmem:[%s5786_s4 + $0x50] sm:$0xff] }
 0x39b   :  { %v2749_v49 = vpop.eup %2748  ;;  %665 = vmatmul.f32.vlgmr.msra.gmra.mxu3 %v467_v0  ;;  %718 = vmatmul.f32.vlgmr.msra.gmra.mxu0 %v467_v0  ;;  %v4190_v0 = vld [vmem:[%s5786_s4 + $0xd0] sm:$0xff] }
 0x39c   :  { %v534_v55 = vpop.permute.xlu1 %533  ;;  %1008 = vmatpush.msra.mxu3 %v4120_v9  ;;  %1028 = vmatpush.msra.mxu0 %v4126_v22 }
 0x39d   :  { %v539_v23 = vmul.f32 %v2749_v49, %v534_v55  ;;  %v6002_v49 = vld [vmem:[#allocation33_spill] sm:$0xff] }
 0x39e   :  { %1009 = vmatpush.msra.mxu3 %v4132_v25  ;;  %1029 = vmatpush.msra.mxu0 %v4138_v40  ;;  %v4389_v55 = vld [vmem:[%s5784_s2 + $0x58] sm:$0xff] }
 0x39f   :  { %v2751_v12 = vpop.eup %2750  ;;  %738 = vmatmul.f32.vlgmr.msrb.gmra.mxu1 %v539_v23  ;;  %790 = vmatmul.f32.vlgmr.msrb.gmra.mxu2 %v539_v23  ;;  %6003 = vst [vmem:[#allocation48_spill] sm:$0xff] %v4389_v55  ;;  %v6004_v23 = vld [vmem:[#allocation30_spill] sm:$0xff] }
 0x3a0   :  { %v647_v30 = vmul.f32 %v2751_v12, %v642_v44  ;;  %1010 = vmatpush.msra.mxu3 %v4144_v53  ;;  %1030 = vmatpush.msra.mxu0 %v4150_v13  ;;  %v6005_v12 = vld [vmem:[#allocation35_spill] sm:$0xff]  ;;  %v4397_v44 = vld [vmem:[%s5784_s2 + $0x50] sm:$0xff] }
 0x3a1   :  { %1080 = vmatpush.msrb.mxu1 %v3782_v54  ;;  %1100 = vmatpush.msrb.mxu2 %v3784_v56  ;;  %v4170_v54 = vld [vmem:[%s5786_s4 + $0x58] sm:$0xff]  ;;  %6006 = vst [vmem:[#allocation49_spill] sm:$0xff] %v4397_v44 }
 0x3a2   :  { %1011 = vmatpush.msra.mxu3 %v4158_v57  ;;  %1031 = vmatpush.msra.mxu0 %v4164_v11  ;;  %v4176_v56 = vld [vmem:[%s5786_s4 + $0xd8] sm:$0xff] }
 0x3a3   :  { %810 = vmatmul.f32.vlgmr.msrb.gmra.mxu3 %v647_v30  ;;  %898 = vmatmul.f32.vlgmr.msrb.gmra.mxu0 %v647_v30  ;;  %v6007_v30 = vld [vmem:[#allocation32_spill] sm:$0xff] }
 0x3a4   :  { %1012 = vmatpush.msra.mxu3 %v4170_v54  ;;  %1032 = vmatpush.msra.mxu0 %v4176_v56 }
 0x3a5   :  { %1081 = vmatpush.msrb.mxu1 %v3788_v58  ;;  %1101 = vmatpush.msrb.mxu2 %v3790_v60  ;;  %v4198_v58 = vld [vmem:[%s5786_s4 + $0x48] sm:$0xff] }
 0x3a6   :  { %1013 = vmatpush.msra.mxu3 %v4184_v14  ;;  %1033 = vmatpush.msra.mxu0 %v4190_v0  ;;  %v4204_v60 = vld [vmem:[%s5786_s4 + $0xc8] sm:$0xff] }
 0x3a7   :  { %918 = vmatmul.f32.vlgmr.msra.gmra.mxu1 %v5946_v61  ;;  %1102 = vmatpush.msrb.mxu2 %v3796_v4  ;;  %v4212_v4 = vld [vmem:[%s5786_s4 + $0x40] sm:$0xff] }
 0x3a8   :  { %1014 = vmatpush.msra.mxu3 %v4198_v58  ;;  %1034 = vmatpush.msra.mxu0 %v4204_v60  ;;  %v4218_v61 = vld [vmem:[%s5786_s4 + $0xc0] sm:$0xff] }
 0x3a9   :  { %1082 = vmatpush.msrb.mxu1 %v3793_v62  ;;  %1103 = vmatpush.msrb.mxu2 %v3803_v24  ;;  %v4226_v62 = vld [vmem:[%s5786_s4 + $0x38] sm:$0xff] }
 0x3aa   :  { %1015 = vmatpush.msra.mxu3 %v4212_v4  ;;  %1035 = vmatpush.msra.mxu0 %v4218_v61  ;;  %v4232_v24 = vld [vmem:[%s5786_s4 + $0xb8] sm:$0xff] }
 0x3ab   :  { %1083 = vmatpush.msrb.mxu1 %v3801_v6  ;;  %1104 = vmatpush.msrb.mxu2 %v3812_v35  ;;  %v4240_v6 = vld [vmem:[%s5786_s4 + $0x30] sm:$0xff] }
 0x3ac   :  { %1016 = vmatpush.msra.mxu3 %v4226_v62  ;;  %1036 = vmatpush.msra.mxu0 %v4232_v24  ;;  %v4246_v35 = vld [vmem:[%s5786_s4 + $0xb0] sm:$0xff] }
 0x3ad   :  { %1084 = vmatpush.msrb.mxu1 %v3810_v34  ;;  %1105 = vmatpush.msrb.mxu2 %v3819_v29  ;;  %v4254_v34 = vld [vmem:[%s5786_s4 + $0x28] sm:$0xff] }
 0x3ae   :  { %1017 = vmatpush.msra.mxu3 %v4240_v6  ;;  %1037 = vmatpush.msra.mxu0 %v4246_v35  ;;  %v4260_v29 = vld [vmem:[%s5786_s4 + $0xa8] sm:$0xff] }
 0x3af   :  { %1085 = vmatpush.msrb.mxu1 %v3817_v26  ;;  %1106 = vmatpush.msrb.mxu2 %v3825_v33  ;;  %v4268_v26 = vld [vmem:[%s5786_s4 + $0x20] sm:$0xff] }
 0x3b0   :  { %1018 = vmatpush.msra.mxu3 %v4254_v34  ;;  %1038 = vmatpush.msra.mxu0 %v4260_v29  ;;  %v4274_v33 = vld [vmem:[%s5786_s4 + $0xa0] sm:$0xff] }
 0x3b1   :  { %1086 = vmatpush.msrb.mxu1 %v3823_v31  ;;  %1107 = vmatpush.msrb.mxu2 %v3831_v37  ;;  %v4282_v31 = vld [vmem:[%s5786_s4 + $0x18] sm:$0xff] }
 0x3b2   :  { %1019 = vmatpush.msra.mxu3 %v4268_v26  ;;  %1039 = vmatpush.msra.mxu0 %v4274_v33  ;;  %v4288_v37 = vld [vmem:[%s5786_s4 + $0x98] sm:$0xff] }
 0x3b3   :  { %1087 = vmatpush.msrb.mxu1 %v3829_v36  ;;  %1108 = vmatpush.msrb.mxu2 %v3840_v42  ;;  %v4296_v36 = vld [vmem:[%s5786_s4 + $0x10] sm:$0xff] }
 0x3b4   :  { %1020 = vmatpush.msra.mxu3 %v4282_v31  ;;  %1040 = vmatpush.msra.mxu0 %v4288_v37  ;;  %v4302_v42 = vld [vmem:[%s5786_s4 + $0x90] sm:$0xff] }
 0x3b5   :  { %1088 = vmatpush.msrb.mxu1 %v3838_v41  ;;  %1109 = vmatpush.msrb.mxu2 %v3847_v45  ;;  %v4310_v41 = vld [vmem:[%s5786_s4 + $0x8] sm:$0xff] }
 0x3b6   :  { %1021 = vmatpush.msra.mxu3 %v4296_v36  ;;  %1041 = vmatpush.msra.mxu0 %v4302_v42  ;;  %v4316_v45 = vld [vmem:[%s5786_s4 + $0x88] sm:$0xff] }
 0x3b7   :  { %1089 = vmatpush.msrb.mxu1 %v3845_v43  ;;  %1110 = vmatpush.msrb.mxu2 %v3853_v48  ;;  %v4324_v43 = vld [vmem:[%s5786_s4] sm:$0xff] }
 0x3b8   :  { %1022 = vmatpush.msra.mxu3 %v4310_v41  ;;  %1042 = vmatpush.msra.mxu0 %v4316_v45  ;;  %v4330_v48 = vld [vmem:[%s5786_s4 + $0x80] sm:$0xff] }
 0x3b9   :  { %1090 = vmatpush.msrb.mxu1 %v3851_v46  ;;  %1111 = vmatpush.msrb.mxu2 %v3859_v52  ;;  %v5998_v46 = vld [vmem:[#allocation27_spill] sm:$0xff]  ;;  %v4381_v52 = vld [vmem:[%s5784_s2 + $0x60] sm:$0xff] }
 0x3ba   :  { %1023 = vmatpush.msra.mxu3 %v4324_v43  ;;  %1043 = vmatpush.msra.mxu0 %v4330_v48  ;;  %6000 = vst [vmem:[#allocation47_spill] sm:$0xff] %v4381_v52 }
 0x3bb   :  { %1091 = vmatpush.msrb.mxu1 %v3857_v50  ;;  %1112 = vmatpush.msrb.mxu2 %v3868_v19  ;;  %v4365_v19 = vld [vmem:[%s5784_s2 + $0x70] sm:$0xff]  ;;  %v5999_v50 = vld [vmem:[#allocation31_spill] sm:$0xff] }
 0x3bc   :  { %1152 = vmatpush.msrb.mxu3 %v4007_v27  ;;  %1172 = vmatpush.msrb.mxu0 %v4015_v5  ;;  %5994 = vst [vmem:[#allocation45_spill] sm:$0xff] %v4365_v19 }
 0x3bd   :  { %1092 = vmatpush.msrb.mxu1 %v3866_v39  ;;  %1113 = vmatpush.msrb.mxu2 %v3873_v20  ;;  %v5996_v20 = vld [vmem:[#allocation29_spill] sm:$0xff]  ;;  %v6001_v39 = vld [vmem:[#allocation28_spill] sm:$0xff] }
 0x3be   :  { %1153 = vmatpush.msrb.mxu3 %v4010_v59  ;;  %1173 = vmatpush.msrb.mxu0 %v4021_v21 }
 0x3bf   :  { %1093 = vmatpush.msrb.mxu1 %v3871_v38  ;;  %1114 = vmatpush.msrb.mxu2 %v3879_v17  ;;  %v4357_v17 = vld [vmem:[%s5784_s2 + $0x78] sm:$0xff]  ;;  %v4373_v38 = vld [vmem:[%s5784_s2 + $0x68] sm:$0xff] }
 0x3c0   :  { %1154 = vmatpush.msrb.mxu3 %v4013_v63  ;;  %1174 = vmatpush.msrb.mxu0 %v4027_v8  ;;  %5991 = vst [vmem:[#allocation44_spill] sm:$0xff] %v4357_v17 }
 0x3c1   :  { %1094 = vmatpush.msrb.mxu1 %v3877_v18  ;;  %1115 = vmatpush.msrb.mxu2 %v3885_v15  ;;  %v5992_v18 = vld [vmem:[#allocation22_spill] sm:$0xff]  ;;  %5997 = vst [vmem:[#allocation46_spill] sm:$0xff] %v4373_v38 }
 0x3c2   :  { %1155 = vmatpush.msrb.mxu3 %v4017_v1  ;;  %1175 = vmatpush.msrb.mxu0 %v4033_v2  ;;  %v5993_v15 = vld [vmem:[#allocation26_spill] sm:$0xff] }
 0x3c3   :  { %1095 = vmatpush.msrb.mxu1 %v3883_v16  ;;  %v5995_v16 = vld [vmem:[#allocation24_spill] sm:$0xff] }
 0x3c4   :  { %1156 = vmatpush.msrb.mxu3 %v4025_v7  ;;  %1176 = vmatpush.msrb.mxu0 %v4039_v32 }
 0x3c5   :  { %1225 = vmatpush.msra.mxu1 %v4357_v17 }
 0x3c6   :  { %1157 = vmatpush.msrb.mxu3 %v4031_v3  ;;  %1177 = vmatpush.msrb.mxu0 %v4045_v47 }
 0x3c7   :  { %1226 = vmatpush.msra.mxu1 %v4365_v19 }
 0x3c8   :  { %1158 = vmatpush.msrb.mxu3 %v5992_v18  ;;  %1178 = vmatpush.msrb.mxu0 %v5993_v15  ;;  %v6031_v15 = vld [vmem:[#allocation15_spill] sm:$0xff] }
 0x3c9   :  { %1227 = vmatpush.msra.mxu1 %v4373_v38  ;;  %v4405_v38 = vld [vmem:[%s5784_s2 + $0x48] sm:$0xff] }
 0x3ca   :  { %1159 = vmatpush.msrb.mxu3 %v5995_v16  ;;  %1179 = vmatpush.msrb.mxu0 %v5996_v20  ;;  %6009 = vst [vmem:[#allocation50_spill] sm:$0xff] %v4405_v38 }
 0x3cb   :  { %1228 = vmatpush.msra.mxu1 %v4381_v52  ;;  %v6008_v52 = vld [vmem:[#allocation37_spill] sm:$0xff] }
 0x3cc   :  { %1160 = vmatpush.msrb.mxu3 %v5998_v46  ;;  %1180 = vmatpush.msrb.mxu0 %v5999_v50  ;;  %v4486_v46 = vld [vmem:[%s5791_s9] ss:$0 sm:$0xff] }
 0x3cd   :  { %1229 = vmatpush.msra.mxu1 %v4389_v55  ;;  %v6010_v55 = vld [vmem:[#allocation34_spill] sm:$0xff] }
 0x3ce   :  { %1161 = vmatpush.msrb.mxu3 %v6001_v39  ;;  %1181 = vmatpush.msrb.mxu0 %v6002_v49 }
 0x3cf   :  { %1230 = vmatpush.msra.mxu1 %v4397_v44  ;;  %v6013_v44 = vld [vmem:[#allocation36_spill] sm:$0xff] }
 0x3d0   :  { %1162 = vmatpush.msrb.mxu3 %v6004_v23  ;;  %1182 = vmatpush.msrb.mxu0 %v6005_v12  ;;  %v6011_v12 = vld [vmem:[#allocation39_spill] sm:$0xff]  ;;  %v4413_v23 = vld [vmem:[%s5784_s2 + $0x40] sm:$0xff] }
 0x3d1   :  { %1231 = vmatpush.msra.mxu1 %v4405_v38  ;;  %6012 = vst [vmem:[#allocation51_spill] sm:$0xff] %v4413_v23  ;;  %v6016_v38 = vld [vmem:[#allocation38_spill] sm:$0xff] }
 0x3d2   :  { %1163 = vmatpush.msrb.mxu3 %v6007_v30  ;;  %1183 = vmatpush.msrb.mxu0 %v6008_v52  ;;  %v6014_v52 = vld [vmem:[#allocation41_spill] sm:$0xff] }
 0x3d3   :  { %1232 = vmatpush.msra.mxu1 %v4413_v23  ;;  %v4421_v30 = vld [vmem:[%s5784_s2 + $0x38] sm:$0xff]  ;;  %v6019_v23 = vld [vmem:[#allocation40_spill] sm:$0xff] }
 0x3d4   :  { %1164 = vmatpush.msrb.mxu3 %v6010_v55  ;;  %1184 = vmatpush.msrb.mxu0 %v6011_v12  ;;  %6015 = vst [vmem:[#allocation52_spill] sm:$0xff] %v4421_v30  ;;  %v6017_v12 = vld [vmem:[#allocation42_spill] sm:$0xff]  ;;  %v4429_v55 = vld [vmem:[%s5784_s2 + $0x30] sm:$0xff] }
 0x3d5   :  { %1233 = vmatpush.msra.mxu1 %v4421_v30  ;;  %6018 = vst [vmem:[#allocation53_spill] sm:$0xff] %v4429_v55  ;;  %v4443_v30 = vld [vmem:[%s5784_s2 + $0x20] sm:$0xff] }
 0x3d6   :  { %1165 = vmatpush.msrb.mxu3 %v6013_v44  ;;  %1185 = vmatpush.msrb.mxu0 %v6014_v52  ;;  %v6020_v52 = vld [vmem:[#allocation43_spill] sm:$0xff]  ;;  %6022 = vst [vmem:[#allocation55_spill] sm:$0xff] %v4443_v30 }
 0x3d7   :  { %1234 = vmatpush.msra.mxu1 %v4429_v55  ;;  %v4437_v44 = vld [vmem:[%s5784_s2 + $0x28] sm:$0xff]  ;;  %v4449_v55 = vld [vmem:[%s5784_s2 + $0x18] sm:$0xff] }
 0x3d8   :  { %1166 = vmatpush.msrb.mxu3 %v6016_v38  ;;  %1186 = vmatpush.msrb.mxu0 %v6017_v12  ;;  %6021 = vst [vmem:[#allocation54_spill] sm:$0xff] %v4437_v44  ;;  %v6029_v38 = vld [vmem:[#allocation10_spill] sm:$0xff] }
 0x3d9   :  { %1235 = vmatpush.msra.mxu1 %v4437_v44  ;;  %6023 = vst [vmem:[#allocation56_spill] sm:$0xff] %v4449_v55  ;;  %v4461_v44 = vld [vmem:[%s5784_s2 + $0x8] sm:$0xff] }
 0x3da   :  { %1167 = vmatpush.msrb.mxu3 %v6019_v23  ;;  %1187 = vmatpush.msrb.mxu0 %v6020_v52  ;;  %v4455_v52 = vld [vmem:[%s5784_s2 + $0x10] sm:$0xff]  ;;  %6025 = vst [vmem:[#allocation58_spill] sm:$0xff] %v4461_v44  ;;  %v4473_v23 = vld [vmem:[%s5787_s5] ss:$0 sm:$0xff] }
 0x3db   :  { %1236 = vmatpush.msra.mxu1 %v4443_v30  ;;  %6024 = vst [vmem:[#allocation57_spill] sm:$0xff] %v4455_v52  ;;  %v4467_v30 = vld [vmem:[%s5784_s2] sm:$0xff] }
 0x3dc   :  { %6026 = vst [vmem:[#allocation59_spill] sm:$0xff] %v4467_v30 }
 0x3dd   :  { %1237 = vmatpush.msra.mxu1 %v4449_v55  ;;  %6027 = vst [vmem:[#allocation60_spill] sm:$0xff] %v4473_v23 }
 0x3de   :  { %6030 = vst [vmem:[#allocation10_spill] sm:$0xff] %v4486_v46 }
 0x3df   :  { %1238 = vmatpush.msra.mxu1 %v4455_v52 }
 0x3e1   :  { %1239 = vmatpush.msra.mxu1 %v4461_v44  ;;  %v4479_v44 = vld [vmem:[%s5785_s3] ss:$0 sm:$0xff] }
 0x3e2   :  { %6028 = vst [vmem:[#allocation61_spill] sm:$0xff] %v4479_v44  ;;  %v160_v49 = vadd.f32 %v4479_v44, %v6029_v38 }
 0x3e3   :  { %1240 = vmatpush.msra.mxu1 %v4467_v30 }
 0x418   :  { %v719_v55 = vpop.f32.mrf.mxu0 }
 0x419   :  { %v720_v52 = vadd.f32 %v4473_v23, %v719_v55 }
 0x41c   :  { %v739_v12 = vpop.f32.mrf.mxu1 }
 0x41d   :  { %v740_v39 = vadd.f32 %v739_v12, %v720_v52 }
 0x41e   :  { %v666_v19 = vpop.f32.mrf.mxu3 }
 0x41f   :  { %v2650_v30 = vmul.f32 -1.442695, %v740_v39  ;;  %v669_v50 = vadd.f32 %v666_v19, %v160_v49 }
 0x420   :  { %v899_v17 = vpop.f32.mrf.mxu0 }
 0x421   :  { %2752 = vpow2.f32 %v2650_v30  ;;  %v2648_v55 = vmul.f32 -1.442695, %v669_v50  ;;  %v900_v20 = vadd.f32 %v4486_v46, %v899_v17 }
 0x422   :  { %v791_v23 = vpop.f32.mrf.mxu2 }
 0x423   :  { %2754 = vpow2.f32 %v2648_v55  ;;  %v792_v18 = vadd.f32 %v6031_v15, %v791_v23 }
 0x424   :  { %v919_v16 = vpop.f32.mrf.mxu1 }
 0x425   :  { %v920_v38 = vadd.f32 %v919_v16, %v900_v20 }
 0x426   :  { %v811_v52 = vpop.f32.mrf.mxu3 }
 0x427   :  { %v2753_v12 = vpop.eup %2752  ;;  %v2654_v39 = vmul.f32 -1.442695, %v920_v38  ;;  %v812_v19 = vadd.f32 %v811_v52, %v792_v18 }
 0x428   :  { %v745_v49 = vadd.f32 1.0, %v2753_v12 }
 0x429   :  { %v2755_v44 = vpop.eup %2754  ;;  %2756 = vpow2.f32 %v2654_v39  ;;  %v2652_v47 = vmul.f32 -1.442695, %v812_v19 }
 0x42a   :  { %2758 = vrcp.f32 %v745_v49  ;;  %v673_v3 = vadd.f32 1.0, %v2755_v44  ;;  %v755_v23 = vand.u32 2147483647, %v745_v49  ;;  %v757_v38 = vand.u32 2147483648, %v745_v49 }
 0x42b   :  { %2760 = vpow2.f32 %v2652_v47  ;;  %vm751_vm10 = vweird.f32 %v745_v49 }
 0x42c   :  { %2762 = vrcp.f32 %v673_v3  ;;  %v685_v47 = vand.u32 2147483648, %v673_v3  ;;  %v683_v19 = vand.u32 2147483647, %v673_v3  ;;  %vm756_vm13 = vcmp.eq.f32.partialorder %v755_v23, 8.507059e+37 }
 0x42d   :  { %v758_v32 = vor.u32 1.1754944e-38, %v757_v38  ;;  %vm679_vm14 = vweird.f32 %v673_v3 }
 0x42e   :  { %vm684_vm0 = vcmp.eq.f32.partialorder %v683_v19, 8.507059e+37 }
 0x42f   :  { %v2757_v50 = vpop.eup %2756 }
 0x430   :  { %v2759_v30 = vpop.eup %2758  ;;  %v4490_v55 = vadd.f32 1.0, %v2757_v50 }
 0x431   :  { %v2761_v17 = vpop.eup %2760  ;;  %v747_v46 = vmul.f32 %v2759_v30, %v745_v49  ;;  %vm752_vm9 = vweird.f32 %v2759_v30 }
 0x432   :  { %v2763_v15 = vpop.eup %2762  ;;  %2764 = vrcp.f32 %v4490_v55  ;;  %v817_v16 = vadd.f32 1.0, %v2761_v17  ;;  %vm753_vm12 = vmor %vm751_vm10, %vm752_vm9  ;;  %vm931_vm5 = vweird.f32 %v4490_v55 }
 0x433   :  { %v748_v20 = vsub.f32 1.0, %v747_v46  ;;  %v675_v18 = vmul.f32 %v2763_v15, %v673_v3  ;;  %vm680_vm11 = vweird.f32 %v2763_v15 }
 0x434   :  { %2766 = vrcp.f32 %v817_v16  ;;  %vm681_vm15 = vmor %vm679_vm14, %vm680_vm11  ;;  %v827_v63 = vand.u32 2147483647, %v817_v16  ;;  %vm823_vm2 = vweird.f32 %v817_v16 }
 0x435   :  { %v749_v52 = vmul.f32 %v2759_v30, %v748_v20  ;;  %v676_v44 = vsub.f32 1.0, %v675_v18  ;;  %v686_v20 = vor.u32 1.1754944e-38, %v685_v47 }
 0x436   :  { %vm828_vm6 = vcmp.eq.f32.partialorder %v827_v63, 8.507059e+37 }
 0x437   :  { %v750_v12 = vadd.f32 %v2759_v30, %v749_v52  ;;  %v677_v39 = vmul.f32 %v2763_v15, %v676_v44 }
 0x438   :  { %v2765_v50 = vpop.eup %2764 }
 0x439   :  { %v927_v17 = vmul.f32 %v2765_v50, %v4490_v55  ;;  %v754_v46 = vsel %vm753_vm12, %v2759_v30, %v750_v12  ;;  %v678_v7 = vadd.f32 %v2763_v15, %v677_v39  ;;  %v829_v30 = vand.u32 2147483648, %v817_v16 }
 0x43a   :  { %v2767_v2 = vpop.eup %2766  ;;  %v759_v1 = vsel %vm756_vm13, %v758_v32, %v754_v46  ;;  %vm932_vm3 = vweird.f32 %v2765_v50  ;;  %v935_v46 = vand.u32 2147483647, %v4490_v55 }
 0x43b   :  { %v928_v18 = vsub.f32 1.0, %v927_v17  ;;  %v819_v49 = vmul.f32 %v2767_v2, %v817_v16  ;;  %763 = vrot.lane.b32.xlu2 %v759_v1, %s3244_s26  ;;  %v682_v52 = vsel %vm681_vm15, %v2763_v15, %v678_v7  ;;  %v761_v3 = vmul.f32 2.0, %v759_v1  ;;  %vm933_vm7 = vmor %vm931_vm5, %vm932_vm3 }
 0x43c   :  { %v687_v44 = vsel %vm684_vm0, %v686_v20, %v682_v52  ;;  %vm824_vm1 = vweird.f32 %v2767_v2  ;;  %v830_v7 = vor.u32 1.1754944e-38, %v829_v30  ;;  %v937_v15 = vand.u32 2147483648, %v4490_v55 }
 0x43d   :  { %v820_v8 = vsub.f32 1.0, %v819_v49  ;;  %691 = vrot.lane.b32.xlu0 %v687_v44, %s3244_s26  ;;  %v689_v23 = vmul.f32 2.0, %v687_v44  ;;  %v929_v38 = vmul.f32 %v2765_v50, %v928_v18  ;;  %vm825_vm4 = vmor %vm823_vm2, %vm824_vm1  ;;  %v2651_v19 = vadd.f32 -1.0, %v761_v3 }
 0x43e   :  { %v938_v16 = vor.u32 1.1754944e-38, %v937_v15  ;;  %vm936_vm8 = vcmp.eq.f32.partialorder %v935_v46, 8.507059e+37 }
 0x43f   :  { %v2649_v12 = vadd.f32 -1.0, %v689_v23  ;;  %v821_v39 = vmul.f32 %v2767_v2, %v820_v8  ;;  %v930_v47 = vadd.f32 %v2765_v50, %v929_v38  ;;  %v697_v38 = vmul.f32 %v687_v44, %v4105_v51 }
 0x441   :  { %693 = vrot.lane.b32.xlu1 %v2649_v12, %s3245_s27  ;;  %v822_v32 = vadd.f32 %v2767_v2, %v821_v39  ;;  %v934_v18 = vsel %vm933_vm7, %v2765_v50, %v930_v47  ;;  %v769_v47 = vmul.f32 %v759_v1, %v4110_v28 }
 0x442   :  { %v939_v52 = vsel %vm936_vm8, %v938_v16, %v934_v18 }
 0x443   :  { %v826_v17 = vsel %vm825_vm4, %v2767_v2, %v822_v32  ;;  %v941_v23 = vmul.f32 2.0, %v939_v52 }
 0x444   :  { %v831_v20 = vsel %vm828_vm6, %v830_v7, %v826_v17 }
 0x445   :  { %765 = vrot.lane.b32.xlu0 %v2651_v19, %s3245_s27  ;;  %v833_v8 = vmul.f32 2.0, %v831_v20  ;;  %v2655_v63 = vadd.f32 -1.0, %v941_v23  ;;  %v841_v46 = vmul.f32 %v831_v20, %v4114_v10  ;;  %v4642_v23 = vld [vmem:[#allocation3 + $0x90] sm:$0xff] }
 0x447   :  { %v2653_v49 = vadd.f32 -1.0, %v833_v8 }
 0x449   :  { %837 = vrot.lane.b32.xlu2 %v2653_v49, %s3245_s27  ;;  %835 = vrot.lane.b32.xlu1 %v831_v20, %s3244_s26 }
 0x44d   :  { %695 = vrot.lane.b32.xlu0 %v687_v44, %s3243_s25 }
 0x451   :  { %945 = vrot.lane.b32.xlu2 %v2655_v63, %s3245_s27  ;;  %943 = vrot.lane.b32.xlu1 %v939_v52, %s3244_s26  ;;  %v6036_v63 = vld [vmem:[#allocation18_spill] sm:$0xff] }
 0x455   :  { %767 = vrot.lane.b32.xlu0 %v759_v1, %s3243_s25  ;;  %v949_v1 = vmul.f32 0.0, %v939_v52 }
 0x459   :  { %947 = vrot.lane.b32.xlu2 %v939_v52, %s3243_s25  ;;  %839 = vrot.lane.b32.xlu1 %v831_v20, %s3243_s25  ;;  %v4534_v52 = vld [vmem:[#allocation3 + $0x78] sm:$0xff] }
 0x495   :  { %v764_v55 = vpop.permute.xlu2 %763 }
 0x4a3   :  { %v838_v39 = vpop.permute.xlu2 %837 }
 0x4ab   :  { %v946_v44 = vpop.permute.xlu2 %945 }
 0x4af   :  { %v692_v2 = vpop.permute.xlu0 %691 }
 0x4b3   :  { %v694_v50 = vpop.permute.xlu1 %693 }
 0x4b4   :  { %v698_v30 = vmul.f32 %v694_v50, %v692_v2  ;;  %v6037_v2 = vld [vmem:[#allocation23_spill] sm:$0xff] }
 0x4b5   :  { %v4650_v50 = vld [vmem:[#allocation3 + $0x88] sm:$0xff] }
 0x4b6   :  { %v4510_v12 = vadd.f32 %v698_v30, %v697_v38  ;;  %v6038_v38 = vld [vmem:[#allocation20_spill] sm:$0xff]  ;;  %v6039_v30 = vld [vmem:[#allocation25_spill] sm:$0xff] }
 0x4b7   :  { %v766_v3 = vpop.permute.xlu0 %765 }
 0x4b8   :  { %2768 = vtanh.f32 %v4510_v12  ;;  %v770_v32 = vmul.f32 %v766_v3, %v764_v55  ;;  %v4647_v55 = vld [vmem:[#allocation3 + $0x10] sm:$0xff]  ;;  %v4655_v3 = vld [vmem:[#allocation3 + $0x8] sm:$0xff] }
 0x4ba   :  { %v4514_v15 = vadd.f32 %v770_v32, %v769_v47  ;;  %v6040_v32 = vld [vmem:[#allocation22_spill] sm:$0xff] }
 0x4bb   :  { %v836_v7 = vpop.permute.xlu1 %835  ;;  %v6041_v47 = vld [vmem:[#allocation26_spill] sm:$0xff] }
 0x4bc   :  { %v842_v19 = vmul.f32 %v838_v39, %v836_v7  ;;  %2770 = vtanh.f32 %v4514_v15  ;;  %v4658_v39 = vld [vmem:[#allocation3 + $0x80] sm:$0xff] }
 0x4bd   :  { %v4663_v7 = vld [vmem:[#allocation3] sm:$0xff] }
 0x4be   :  { %v2769_v17 = vpop.eup %2768  ;;  %v4518_v51 = vadd.f32 %v842_v19, %v841_v46  ;;  %v6042_v19 = vld [vmem:[#allocation24_spill] sm:$0xff] }
 0x4bf   :  { %v696_v8 = vpop.permute.xlu0 %695  ;;  %v6044_v46 = vld [vmem:[#allocation44_spill] sm:$0xff] }
 0x4c0   :  { %v701_v18 = vmul.f32 %v2769_v17, %v696_v8  ;;  %2772 = vtanh.f32 %v4518_v51  ;;  %v6043_v17 = vld [vmem:[#allocation29_spill] sm:$0xff]  ;;  %v6045_v8 = vld [vmem:[#allocation27_spill] sm:$0xff] }
 0x4c2   :  { %971 = vmatmul.f32.vlgmr.msra.gmra.mxu2 %v701_v18  ;;  %1024 = vmatmul.f32.vlgmr.msra.gmra.mxu3 %v701_v18  ;;  %v2771_v20 = vpop.eup %2770  ;;  %v6046_v18 = vld [vmem:[#allocation31_spill] sm:$0xff] }
 0x4c3   :  { %v944_v16 = vpop.permute.xlu1 %943  ;;  %1278 = vmatpush.msra.mxu2 %v4120_v9  ;;  %1298 = vmatpush.msra.mxu3 %v4126_v22 }
 0x4c4   :  { %v950_v28 = vmul.f32 %v946_v44, %v944_v16  ;;  %v6047_v44 = vld [vmem:[#allocation45_spill] sm:$0xff]  ;;  %v6048_v16 = vld [vmem:[#allocation28_spill] sm:$0xff] }
 0x4c5   :  { %1279 = vmatpush.msra.mxu2 %v4132_v25  ;;  %1299 = vmatpush.msra.mxu3 %v4138_v40 }
 0x4c6   :  { %v4525_v10 = vadd.f32 %v950_v28, %v949_v1  ;;  %v2773_v22 = vpop.eup %2772  ;;  %v6049_v1 = vld [vmem:[#allocation33_spill] sm:$0xff]  ;;  %v6050_v28 = vld [vmem:[#allocation46_spill] sm:$0xff] }
 0x4c7   :  { %v768_v49 = vpop.permute.xlu0 %767  ;;  %1280 = vmatpush.msra.mxu2 %v4144_v53  ;;  %1300 = vmatpush.msra.mxu3 %v4150_v13  ;;  %v4537_v53 = vld [vmem:[#allocation3 + $0xf8] sm:$0xff] }
 0x4c8   :  { %2774 = vtanh.f32 %v4525_v10  ;;  %v773_v9 = vmul.f32 %v2771_v20, %v768_v49  ;;  %v6051_v20 = vld [vmem:[#allocation30_spill] sm:$0xff]  ;;  %v6052_v49 = vld [vmem:[#allocation35_spill] sm:$0xff] }
 0x4c9   :  { %1281 = vmatpush.msra.mxu2 %v4158_v57  ;;  %1301 = vmatpush.msra.mxu3 %v4164_v11  ;;  %v948_v57 = vpop.permute.xlu2 %947 }
 0x4ca   :  { %1044 = vmatmul.f32.vlgmr.msra.gmra.mxu0 %v773_v9  ;;  %1096 = vmatmul.f32.vlgmr.msrb.gmra.mxu1 %v773_v9  ;;  %v6053_v9 = vld [vmem:[#allocation47_spill] sm:$0xff] }
 0x4cb   :  { %v840_v25 = vpop.permute.xlu1 %839  ;;  %1282 = vmatpush.msra.mxu2 %v4170_v54  ;;  %1302 = vmatpush.msra.mxu3 %v4176_v56  ;;  %v4544_v54 = vld [vmem:[#allocation3 + $0x70] sm:$0xff] }
 0x4cc   :  { %v845_v40 = vmul.f32 %v2773_v22, %v840_v25  ;;  %1350 = vmatpush.msra.mxu0 %v4534_v52  ;;  %1370 = vmatpush.msrb.mxu1 %v4537_v53  ;;  %v4547_v56 = vld [vmem:[#allocation3 + $0xf0] sm:$0xff]  ;;  %v6055_v25 = vld [vmem:[#allocation37_spill] sm:$0xff] }
 0x4cd   :  { %1283 = vmatpush.msra.mxu2 %v4184_v14  ;;  %1303 = vmatpush.msra.mxu3 %v4190_v0  ;;  %v4552_v14 = vld [vmem:[#allocation3 + $0xe8] sm:$0xff]  ;;  %v6054_v22 = vld [vmem:[#allocation32_spill] sm:$0xff] }
 0x4ce   :  { %v2775_v13 = vpop.eup %2774  ;;  %1116 = vmatmul.f32.vlgmr.msrb.gmra.mxu2 %v845_v40  ;;  %1168 = vmatmul.f32.vlgmr.msrb.gmra.mxu3 %v845_v40  ;;  %v4557_v0 = vld [vmem:[#allocation3 + $0x68] sm:$0xff]  ;;  %v6056_v40 = vld [vmem:[#allocation48_spill] sm:$0xff] }
 0x4cf   :  { %v953_v11 = vmul.f32 %v2775_v13, %v948_v57  ;;  %1284 = vmatpush.msra.mxu2 %v4198_v58  ;;  %1304 = vmatpush.msra.mxu3 %v4204_v60  ;;  %v4560_v58 = vld [vmem:[#allocation3 + $0xe0] sm:$0xff]  ;;  %v6058_v57 = vld [vmem:[#allocation39_spill] sm:$0xff] }
 0x4d0   :  { %1351 = vmatpush.msra.mxu0 %v4544_v54  ;;  %1371 = vmatpush.msrb.mxu1 %v4547_v56  ;;  %v4565_v60 = vld [vmem:[#allocation3 + $0x60] sm:$0xff] }
 0x4d1   :  { %1285 = vmatpush.msra.mxu2 %v4212_v4  ;;  %1305 = vmatpush.msra.mxu3 %v4218_v61  ;;  %v4568_v4 = vld [vmem:[#allocation3 + $0xd8] sm:$0xff]  ;;  %v6057_v13 = vld [vmem:[#allocation34_spill] sm:$0xff] }
 0x4d2   :  { %1188 = vmatmul.f32.vlgmr.msrb.gmra.mxu0 %v953_v11  ;;  %1372 = vmatpush.msrb.mxu1 %v4552_v14  ;;  %v4573_v61 = vld [vmem:[#allocation3 + $0x58] sm:$0xff] }
 0x4d3   :  { %1286 = vmatpush.msra.mxu2 %v4226_v62  ;;  %1306 = vmatpush.msra.mxu3 %v4232_v24  ;;  %v4576_v62 = vld [vmem:[#allocation3 + $0xd0] sm:$0xff]  ;;  %v6059_v11 = vld [vmem:[#allocation49_spill] sm:$0xff] }
 0x4d4   :  { %1352 = vmatpush.msra.mxu0 %v4557_v0  ;;  %1373 = vmatpush.msrb.mxu1 %v4560_v58  ;;  %v4581_v24 = vld [vmem:[#allocation3 + $0x50] sm:$0xff] }
 0x4d5   :  { %1287 = vmatpush.msra.mxu2 %v4240_v6  ;;  %1307 = vmatpush.msra.mxu3 %v4246_v35  ;;  %v4584_v6 = vld [vmem:[#allocation3 + $0xc8] sm:$0xff] }
 0x4d6   :  { %1353 = vmatpush.msra.mxu0 %v4565_v60  ;;  %1374 = vmatpush.msrb.mxu1 %v4568_v4  ;;  %v4589_v35 = vld [vmem:[#allocation3 + $0x48] sm:$0xff] }
 0x4d7   :  { %1288 = vmatpush.msra.mxu2 %v4254_v34  ;;  %1308 = vmatpush.msra.mxu3 %v4260_v29  ;;  %v4592_v34 = vld [vmem:[#allocation3 + $0xc0] sm:$0xff] }
 0x4d8   :  { %1354 = vmatpush.msra.mxu0 %v4573_v61  ;;  %1375 = vmatpush.msrb.mxu1 %v4576_v62  ;;  %v4597_v29 = vld [vmem:[#allocation3 + $0x40] sm:$0xff] }
 0x4d9   :  { %1289 = vmatpush.msra.mxu2 %v4268_v26  ;;  %1309 = vmatpush.msra.mxu3 %v4274_v33  ;;  %v4600_v26 = vld [vmem:[#allocation3 + $0xb8] sm:$0xff] }
 0x4da   :  { %1355 = vmatpush.msra.mxu0 %v4581_v24  ;;  %1376 = vmatpush.msrb.mxu1 %v4584_v6  ;;  %v4605_v33 = vld [vmem:[#allocation3 + $0x38] sm:$0xff] }
 0x4db   :  { %1290 = vmatpush.msra.mxu2 %v4282_v31  ;;  %1310 = vmatpush.msra.mxu3 %v4288_v37  ;;  %v4608_v31 = vld [vmem:[#allocation3 + $0xb0] sm:$0xff] }
 0x4dc   :  { %1356 = vmatpush.msra.mxu0 %v4589_v35  ;;  %1377 = vmatpush.msrb.mxu1 %v4592_v34  ;;  %v4615_v37 = vld [vmem:[#allocation3 + $0x30] sm:$0xff] }
 0x4dd   :  { %1291 = vmatpush.msra.mxu2 %v4296_v36  ;;  %1311 = vmatpush.msra.mxu3 %v4302_v42  ;;  %v4618_v36 = vld [vmem:[#allocation3 + $0xa8] sm:$0xff] }
 0x4de   :  { %1357 = vmatpush.msra.mxu0 %v4597_v29  ;;  %1378 = vmatpush.msrb.mxu1 %v4600_v26  ;;  %v4623_v42 = vld [vmem:[#allocation3 + $0x28] sm:$0xff] }
 0x4df   :  { %1292 = vmatpush.msra.mxu2 %v4310_v41  ;;  %1312 = vmatpush.msra.mxu3 %v4316_v45  ;;  %v4626_v41 = vld [vmem:[#allocation3 + $0xa0] sm:$0xff] }
 0x4e0   :  { %1358 = vmatpush.msra.mxu0 %v4605_v33  ;;  %1379 = vmatpush.msrb.mxu1 %v4608_v31  ;;  %v4631_v45 = vld [vmem:[#allocation3 + $0x20] sm:$0xff] }
 0x4e1   :  { %1293 = vmatpush.msra.mxu2 %v4324_v43  ;;  %1313 = vmatpush.msra.mxu3 %v4330_v48  ;;  %v4634_v43 = vld [vmem:[#allocation3 + $0x98] sm:$0xff] }
 0x4e2   :  { %1359 = vmatpush.msra.mxu0 %v4615_v37  ;;  %1380 = vmatpush.msrb.mxu1 %v4618_v36  ;;  %v4639_v48 = vld [vmem:[#allocation3 + $0x18] sm:$0xff] }
 0x4e3   :  { %1422 = vmatpush.msrb.mxu2 %v4007_v27  ;;  %1442 = vmatpush.msrb.mxu3 %v4015_v5  ;;  %v6032_v27 = vld [vmem:[#allocation16_spill] sm:$0xff]  ;;  %v6033_v5 = vld [vmem:[#allocation19_spill] sm:$0xff] }
 0x4e4   :  { %1360 = vmatpush.msra.mxu0 %v4623_v42  ;;  %1381 = vmatpush.msrb.mxu1 %v4626_v41 }
 0x4e5   :  { %1423 = vmatpush.msrb.mxu2 %v4010_v59  ;;  %1443 = vmatpush.msrb.mxu3 %v4021_v21  ;;  %v6034_v59 = vld [vmem:[#allocation17_spill] sm:$0xff] }
 0x4e6   :  { %1361 = vmatpush.msra.mxu0 %v4631_v45  ;;  %1382 = vmatpush.msrb.mxu1 %v4634_v43  ;;  %v6035_v21 = vld [vmem:[#allocation21_spill] sm:$0xff] }
 0x4e7   :  { %1424 = vmatpush.msrb.mxu2 %v6032_v27  ;;  %1444 = vmatpush.msrb.mxu3 %v6033_v5  ;;  %v6060_v27 = vld [vmem:[#allocation36_spill] sm:$0xff]  ;;  %v6061_v5 = vld [vmem:[#allocation41_spill] sm:$0xff] }
 0x4e8   :  { %1362 = vmatpush.msra.mxu0 %v4639_v48  ;;  %1383 = vmatpush.msrb.mxu1 %v4642_v23 }
 0x4e9   :  { %1425 = vmatpush.msrb.mxu2 %v6034_v59  ;;  %1445 = vmatpush.msrb.mxu3 %v6035_v21  ;;  %v6062_v59 = vld [vmem:[#allocation50_spill] sm:$0xff] }
 0x4ea   :  { %1363 = vmatpush.msra.mxu0 %v4647_v55  ;;  %1384 = vmatpush.msrb.mxu1 %v4650_v50  ;;  %v6063_v21 = vld [vmem:[#allocation38_spill] sm:$0xff] }
 0x4eb   :  { %1426 = vmatpush.msrb.mxu2 %v6036_v63  ;;  %1446 = vmatpush.msrb.mxu3 %v6037_v2  ;;  %v6064_v63 = vld [vmem:[#allocation42_spill] sm:$0xff]  ;;  %v6065_v2 = vld [vmem:[#allocation51_spill] sm:$0xff] }
 0x4ec   :  { %1364 = vmatpush.msra.mxu0 %v4655_v3  ;;  %1385 = vmatpush.msrb.mxu1 %v4658_v39 }
 0x4ed   :  { %1427 = vmatpush.msrb.mxu2 %v6038_v38  ;;  %1447 = vmatpush.msrb.mxu3 %v6039_v30  ;;  %v6066_v38 = vld [vmem:[#allocation40_spill] sm:$0xff]  ;;  %v6067_v30 = vld [vmem:[#allocation43_spill] sm:$0xff] }
 0x4ee   :  { %1365 = vmatpush.msra.mxu0 %v4663_v7 }
 0x4ef   :  { %1428 = vmatpush.msrb.mxu2 %v6040_v32  ;;  %1448 = vmatpush.msrb.mxu3 %v6041_v47  ;;  %v6068_v32 = vld [vmem:[#allocation52_spill] sm:$0xff]  ;;  %v6069_v47 = vld [vmem:[#allocation53_spill] sm:$0xff] }
 0x4f0   :  { %1495 = vmatpush.msrb.mxu0 %v6044_v46  ;;  %v6072_v46 = vld [vmem:[#allocation56_spill] sm:$0xff] }
 0x4f1   :  { %1429 = vmatpush.msrb.mxu2 %v6042_v19  ;;  %1449 = vmatpush.msrb.mxu3 %v6043_v17  ;;  %v6070_v19 = vld [vmem:[#allocation54_spill] sm:$0xff]  ;;  %v6071_v17 = vld [vmem:[#allocation55_spill] sm:$0xff] }
 0x4f2   :  { %1496 = vmatpush.msrb.mxu0 %v6047_v44  ;;  %v6075_v44 = vld [vmem:[#allocation59_spill] sm:$0xff] }
 0x4f3   :  { %1430 = vmatpush.msrb.mxu2 %v6045_v8  ;;  %1450 = vmatpush.msrb.mxu3 %v6046_v18  ;;  %v6073_v8 = vld [vmem:[#allocation57_spill] sm:$0xff]  ;;  %v6074_v18 = vld [vmem:[#allocation58_spill] sm:$0xff] }
 0x4f4   :  { %1497 = vmatpush.msrb.mxu0 %v6050_v28 }
 0x4f5   :  { %1431 = vmatpush.msrb.mxu2 %v6048_v16  ;;  %1451 = vmatpush.msrb.mxu3 %v6049_v1  ;;  %v6076_v16 = vld [vmem:[#allocation11_spill] sm:$0xff]  ;;  %v6077_v1 = vld [vmem:[#allocation61_spill] sm:$0xff] }
 0x4f6   :  { %1498 = vmatpush.msrb.mxu0 %v6053_v9  ;;  %v163_v28 = vadd.f32 %v6077_v1, %v6076_v16 }
 0x4f7   :  { %1432 = vmatpush.msrb.mxu2 %v6051_v20  ;;  %1452 = vmatpush.msrb.mxu3 %v6052_v49 }
 0x4f8   :  { %1499 = vmatpush.msrb.mxu0 %v6056_v40 }
 0x4f9   :  { %1433 = vmatpush.msrb.mxu2 %v6054_v22  ;;  %1453 = vmatpush.msrb.mxu3 %v6055_v25  ;;  %v6078_v22 = vld [vmem:[#allocation60_spill] sm:$0xff] }
 0x4fa   :  { %1500 = vmatpush.msrb.mxu0 %v6059_v11 }
 0x4fb   :  { %1434 = vmatpush.msrb.mxu2 %v6057_v13  ;;  %1454 = vmatpush.msrb.mxu3 %v6058_v57 }
 0x4fc   :  { %1501 = vmatpush.msrb.mxu0 %v6062_v59  ;;  %v4706_v59 = vld [vmem:[%s5789_s7] ss:$0 sm:$0xff] }
 0x4fd   :  { %1435 = vmatpush.msrb.mxu2 %v6060_v27  ;;  %1455 = vmatpush.msrb.mxu3 %v6061_v5 }
 0x4fe   :  { %1502 = vmatpush.msrb.mxu0 %v6065_v2 }
 0x4ff   :  { %1436 = vmatpush.msrb.mxu2 %v6063_v21  ;;  %1456 = vmatpush.msrb.mxu3 %v6064_v63 }
 0x500   :  { %1503 = vmatpush.msrb.mxu0 %v6068_v32 }
 0x501   :  { %1437 = vmatpush.msrb.mxu2 %v6066_v38  ;;  %1457 = vmatpush.msrb.mxu3 %v6067_v30 }
 0x502   :  { %1504 = vmatpush.msrb.mxu0 %v6069_v47  ;;  %v6079_v47 = vld [vmem:[#allocation10_spill] sm:$0xff] }
 0x504   :  { %1505 = vmatpush.msrb.mxu0 %v6070_v19 }
 0x506   :  { %1506 = vmatpush.msrb.mxu0 %v6071_v17 }
 0x508   :  { %1507 = vmatpush.msrb.mxu0 %v6072_v46 }
 0x50a   :  { %1508 = vmatpush.msrb.mxu0 %v6073_v8 }
 0x50c   :  { %1509 = vmatpush.msrb.mxu0 %v6074_v18 }
 0x50e   :  { %1510 = vmatpush.msrb.mxu0 %v6075_v44 }
 0x545   :  { %v972_v20 = vpop.f32.mrf.mxu2  ;;  %v1025_v49 = vpop.f32.mrf.mxu3 }
 0x546   :  { %v975_v9 = vadd.f32 %v972_v20, %v163_v28  ;;  %v1026_v25 = vadd.f32 %v6078_v22, %v1025_v49 }
 0x547   :  { %v1045_v40 = vpop.f32.mrf.mxu0  ;;  %v1097_v27 = vpop.f32.mrf.mxu1 }
 0x548   :  { %v2656_v13 = vmul.f32 -1.442695, %v975_v9  ;;  %v1046_v57 = vadd.f32 %v1045_v40, %v1026_v25  ;;  %v1098_v21 = vadd.f32 %v4706_v59, %v1097_v27 }
 0x54a   :  { %2776 = vpow2.f32 %v2656_v13  ;;  %v2658_v11 = vmul.f32 -1.442695, %v1046_v57 }
 0x54c   :  { %2778 = vpow2.f32 %v2658_v11 }
 0x54f   :  { %v1189_v46 = vpop.f32.mrf.mxu0 }
 0x550   :  { %v2777_v5 = vpop.eup %2776 }
 0x551   :  { %v979_v63 = vadd.f32 1.0, %v2777_v5  ;;  %v1117_v2 = vpop.f32.mrf.mxu2  ;;  %v1169_v38 = vpop.f32.mrf.mxu3 }
 0x552   :  { %v2779_v30 = vpop.eup %2778  ;;  %v1118_v32 = vadd.f32 %v1117_v2, %v1098_v21  ;;  %v1170_v19 = vadd.f32 %v6079_v47, %v1169_v38 }
 0x553   :  { %2780 = vrcp.f32 %v979_v63  ;;  %v1051_v17 = vadd.f32 1.0, %v2779_v30  ;;  %v991_v25 = vand.u32 2147483648, %v979_v63  ;;  %v989_v57 = vand.u32 2147483647, %v979_v63 }
 0x554   :  { %v2660_v8 = vmul.f32 -1.442695, %v1118_v32  ;;  %v1190_v18 = vadd.f32 %v1189_v46, %v1170_v19  ;;  %vm985_vm10 = vweird.f32 %v979_v63 }
 0x555   :  { %2782 = vrcp.f32 %v1051_v17  ;;  %v1063_v5 = vand.u32 2147483648, %v1051_v17  ;;  %v1061_v38 = vand.u32 2147483647, %v1051_v17  ;;  %v992_v30 = vor.u32 1.1754944e-38, %v991_v25 }
 0x556   :  { %2784 = vpow2.f32 %v2660_v8  ;;  %v2662_v44 = vmul.f32 -1.442695, %v1190_v18  ;;  %vm990_vm13 = vcmp.eq.f32.partialorder %v989_v57, 8.507059e+37  ;;  %vm1057_vm14 = vweird.f32 %v1051_v17 }
 0x557   :  { %v1064_v46 = vor.u32 1.1754944e-38, %v1063_v5  ;;  %vm1062_vm0 = vcmp.eq.f32.partialorder %v1061_v38, 8.507059e+37 }
 0x558   :  { %2786 = vpow2.f32 %v2662_v44 }
 0x559   :  { %v2781_v16 = vpop.eup %2780 }
 0x55a   :  { %v981_v1 = vmul.f32 %v2781_v16, %v979_v63  ;;  %vm986_vm9 = vweird.f32 %v2781_v16 }
 0x55b   :  { %v2783_v28 = vpop.eup %2782  ;;  %vm987_vm12 = vmor %vm985_vm10, %vm986_vm9 }
 0x55c   :  { %v2785_v20 = vpop.eup %2784  ;;  %v982_v49 = vsub.f32 1.0, %v981_v1  ;;  %v1053_v9 = vmul.f32 %v2783_v28, %v1051_v17  ;;  %vm1058_vm11 = vweird.f32 %v2783_v28 }
 0x55d   :  { %v1123_v22 = vadd.f32 1.0, %v2785_v20  ;;  %vm1059_vm15 = vmor %vm1057_vm14, %vm1058_vm11 }
 0x55e   :  { %v2787_v40 = vpop.eup %2786  ;;  %v983_v13 = vmul.f32 %v2781_v16, %v982_v49  ;;  %v1054_v11 = vsub.f32 1.0, %v1053_v9 }
 0x55f   :  { %2788 = vrcp.f32 %v1123_v22  ;;  %v1195_v27 = vadd.f32 1.0, %v2787_v40  ;;  %v1133_v25 = vand.u32 2147483647, %v1123_v22  ;;  %v1135_v40 = vand.u32 2147483648, %v1123_v22 }
 0x560   :  { %v984_v21 = vadd.f32 %v2781_v16, %v983_v13  ;;  %v1055_v2 = vmul.f32 %v2783_v28, %v1054_v11  ;;  %vm1129_vm2 = vweird.f32 %v1123_v22 }
 0x561   :  { %2790 = vrcp.f32 %v1195_v27  ;;  %vm1134_vm5 = vcmp.eq.f32.partialorder %v1133_v25, 8.507059e+37  ;;  %vm1201_vm6 = vweird.f32 %v1195_v27 }
 0x562   :  { %v988_v32 = vsel %vm987_vm12, %v2781_v16, %v984_v21  ;;  %v1056_v47 = vadd.f32 %v2783_v28, %v1055_v2  ;;  %v1136_v21 = vor.u32 1.1754944e-38, %v1135_v40  ;;  %v1207_v2 = vand.u32 2147483648, %v1195_v27 }
 0x563   :  { %v993_v19 = vsel %vm990_vm13, %v992_v30, %v988_v32  ;;  %v1205_v32 = vand.u32 2147483647, %v1195_v27 }
 0x564   :  { %997 = vrot.lane.b32.xlu0 %v993_v19, %s3244_s26  ;;  %v1060_v8 = vsel %vm1059_vm15, %v2783_v28, %v1056_v47  ;;  %v995_v63 = vmul.f32 2.0, %v993_v19 }
 0x565   :  { %v2789_v18 = vpop.eup %2788  ;;  %v1065_v44 = vsel %vm1062_vm0, %v1064_v46, %v1060_v8  ;;  %vm1206_vm8 = vcmp.eq.f32.partialorder %v1205_v32, 8.507059e+37 }
 0x566   :  { %1069 = vrot.lane.b32.xlu2 %v1065_v44, %s3244_s26  ;;  %v2657_v1 = vadd.f32 -1.0, %v995_v63  ;;  %v1067_v20 = vmul.f32 2.0, %v1065_v44  ;;  %v1125_v49 = vmul.f32 %v2789_v18, %v1123_v22  ;;  %vm1130_vm1 = vweird.f32 %v2789_v18 }
 0x567   :  { %v2791_v9 = vpop.eup %2790  ;;  %vm1131_vm4 = vmor %vm1129_vm2, %vm1130_vm1  ;;  %v1208_v63 = vor.u32 1.1754944e-38, %v1207_v2 }
 0x568   :  { %999 = vrot.lane.b32.xlu1 %v2657_v1, %s3245_s27  ;;  %v1126_v16 = vsub.f32 1.0, %v1125_v49  ;;  %v1197_v17 = vmul.f32 %v2791_v9, %v1195_v27  ;;  %v2659_v13 = vadd.f32 -1.0, %v1067_v20  ;;  %vm1202_vm3 = vweird.f32 %v2791_v9 }
 0x569   :  { %vm1203_vm7 = vmor %vm1201_vm6, %vm1202_vm3 }
 0x56a   :  { %v1127_v57 = vmul.f32 %v2789_v18, %v1126_v16  ;;  %v1198_v28 = vsub.f32 1.0, %v1197_v17  ;;  %v1003_v16 = vmul.f32 %v993_v19, %v4510_v12 }
 0x56c   :  { %1071 = vrot.lane.b32.xlu0 %v2659_v13, %s3245_s27  ;;  %v1128_v11 = vadd.f32 %v2789_v18, %v1127_v57  ;;  %v1199_v5 = vmul.f32 %v2791_v9, %v1198_v28  ;;  %v1075_v28 = vmul.f32 %v1065_v44, %v4514_v15  ;;  %v4736_v15 = vld [vmem:[%s5786_s4 + $0x78] sm:$0xff] }
 0x56e   :  { %v1132_v38 = vsel %vm1131_vm4, %v2789_v18, %v1128_v11  ;;  %v1200_v30 = vadd.f32 %v2791_v9, %v1199_v5 }
 0x56f   :  { %v1137_v47 = vsel %vm1134_vm5, %v1136_v21, %v1132_v38 }
 0x570   :  { %1141 = vrot.lane.b32.xlu1 %v1137_v47, %s3244_s26  ;;  %v1139_v46 = vmul.f32 2.0, %v1137_v47  ;;  %v1204_v8 = vsel %vm1203_vm7, %v2791_v9, %v1200_v30  ;;  %v1147_v38 = vmul.f32 %v1137_v47, %v4518_v51  ;;  %v4742_v51 = vld [vmem:[%s5786_s4 + $0xf8] sm:$0xff] }
 0x571   :  { %v1209_v22 = vsel %vm1206_vm8, %v1208_v63, %v1204_v8  ;;  %v4750_v8 = vld [vmem:[%s5786_s4 + $0x70] sm:$0xff] }
 0x572   :  { %v2661_v1 = vadd.f32 -1.0, %v1139_v46  ;;  %v1211_v20 = vmul.f32 2.0, %v1209_v22  ;;  %v4756_v63 = vld [vmem:[%s5786_s4 + $0xf0] sm:$0xff] }
 0x574   :  { %1001 = vrot.lane.b32.xlu0 %v993_v19, %s3243_s25  ;;  %1143 = vrot.lane.b32.xlu2 %v2661_v1, %s3245_s27  ;;  %v2663_v18 = vadd.f32 -1.0, %v1211_v20  ;;  %v4764_v20 = vld [vmem:[%s5786_s4 + $0x68] sm:$0xff] }
 0x578   :  { %1213 = vrot.lane.b32.xlu1 %v1209_v22, %s3244_s26 }
 0x57c   :  { %1073 = vrot.lane.b32.xlu0 %v1065_v44, %s3243_s25  ;;  %1215 = vrot.lane.b32.xlu2 %v2663_v18, %s3245_s27  ;;  %v1219_v44 = vmul.f32 %v1209_v22, %v4525_v10  ;;  %v4770_v18 = vld [vmem:[%s5786_s4 + $0xe8] sm:$0xff] }
 0x580   :  { %1145 = vrot.lane.b32.xlu1 %v1137_v47, %s3243_s25 }
 0x584   :  { %1217 = vrot.lane.b32.xlu2 %v1209_v22, %s3243_s25 }
 0x5c0   :  { %v1070_v49 = vpop.permute.xlu2 %1069 }
 0x5ce   :  { %v1144_v13 = vpop.permute.xlu2 %1143 }
 0x5d6   :  { %v998_v27 = vpop.permute.xlu0 %997  ;;  %v1216_v19 = vpop.permute.xlu2 %1215 }
 0x5da   :  { %v1000_v9 = vpop.permute.xlu1 %999 }
 0x5db   :  { %v1004_v17 = vmul.f32 %v1000_v9, %v998_v27  ;;  %v4783_v9 = vld [vmem:[%s5786_s4 + $0xe0] sm:$0xff] }
 0x5dd   :  { %v4723_v25 = vadd.f32 %v1004_v17, %v1003_v16 }
 0x5de   :  { %v1072_v40 = vpop.permute.xlu0 %1071 }
 0x5df   :  { %2792 = vtanh.f32 %v4723_v25  ;;  %v1076_v57 = vmul.f32 %v1072_v40, %v1070_v49  ;;  %v4777_v49 = vld [vmem:[%s5786_s4 + $0x60] sm:$0xff]  ;;  %v4789_v40 = vld [vmem:[%s5786_s4 + $0x58] sm:$0xff] }
 0x5e1   :  { %v4727_v5 = vadd.f32 %v1076_v57, %v1075_v28  ;;  %v4803_v28 = vld [vmem:[%s5786_s4 + $0x50] sm:$0xff] }
 0x5e2   :  { %v1142_v11 = vpop.permute.xlu1 %1141 }
 0x5e3   :  { %v1148_v21 = vmul.f32 %v1144_v13, %v1142_v11  ;;  %2794 = vtanh.f32 %v4727_v5  ;;  %v4795_v13 = vld [vmem:[%s5786_s4 + $0xd8] sm:$0xff]  ;;  %v4809_v11 = vld [vmem:[%s5786_s4 + $0xd0] sm:$0xff] }
 0x5e5   :  { %v2793_v2 = vpop.eup %2792  ;;  %v4731_v12 = vadd.f32 %v1148_v21, %v1147_v38  ;;  %v4821_v38 = vld [vmem:[%s5786_s4 + $0xc8] sm:$0xff] }
 0x5e6   :  { %v1002_v30 = vpop.permute.xlu0 %1001 }
 0x5e7   :  { %v1007_v32 = vmul.f32 %v2793_v2, %v1002_v30  ;;  %2796 = vtanh.f32 %v4731_v12  ;;  %v1218_v2 = vpop.permute.xlu2 %1217  ;;  %v4829_v30 = vld [vmem:[%s5786_s4 + $0x40] sm:$0xff] }
 0x5e9   :  { %1241 = vmatmul.f32.vlgmr.msra.gmra.mxu1 %v1007_v32  ;;  %1294 = vmatmul.f32.vlgmr.msra.gmra.mxu2 %v1007_v32  ;;  %v2795_v10 = vpop.eup %2794  ;;  %v4835_v32 = vld [vmem:[%s5786_s4 + $0xc0] sm:$0xff] }
 0x5ea   :  { %v1214_v46 = vpop.permute.xlu1 %1213  ;;  %1548 = vmatpush.msra.mxu1 %v4736_v15  ;;  %1568 = vmatpush.msra.mxu2 %v4742_v51 }
 0x5eb   :  { %v1220_v47 = vmul.f32 %v1216_v19, %v1214_v46  ;;  %v4862_v19 = vld [vmem:[%s5786_s4 + $0xb0] sm:$0xff]  ;;  %v4949_v46 = vld [vmem:[#allocation5 + $0x78] sm:$0xff] }
 0x5ec   :  { %1549 = vmatpush.msra.mxu1 %v4750_v8  ;;  %1569 = vmatpush.msra.mxu2 %v4756_v63 }
 0x5ed   :  { %v4759_v1 = vadd.f32 %v1220_v47, %v1219_v44  ;;  %v2797_v16 = vpop.eup %2796  ;;  %v4960_v44 = vld [vmem:[#allocation5 + $0xf0] sm:$0xff]  ;;  %v4965_v47 = vld [vmem:[#allocation5 + $0x68] sm:$0xff] }
 0x5ee   :  { %v1074_v22 = vpop.permute.xlu0 %1073  ;;  %1550 = vmatpush.msra.mxu1 %v4764_v20  ;;  %1570 = vmatpush.msra.mxu2 %v4770_v18 }
 0x5ef   :  { %2798 = vtanh.f32 %v4759_v1  ;;  %v1079_v27 = vmul.f32 %v2795_v10, %v1074_v22  ;;  %v4968_v10 = vld [vmem:[#allocation5 + $0xe8] sm:$0xff]  ;;  %v5016_v22 = vld [vmem:[#allocation5 + $0xb8] sm:$0xff] }
 0x5f0   :  { %1551 = vmatpush.msra.mxu1 %v4777_v49  ;;  %1571 = vmatpush.msra.mxu2 %v4783_v9  ;;  %6080 = vst [vmem:[#allocation15_spill] sm:$0xff] %v4968_v10 }
 0x5f1   :  { %1314 = vmatmul.f32.vlgmr.msra.gmra.mxu3 %v1079_v27  ;;  %1366 = vmatmul.f32.vlgmr.msra.gmra.mxu0 %v1079_v27  ;;  %6092 = vst [vmem:[#allocation29_spill] sm:$0xff] %v5016_v22  ;;  %v5022_v27 = vld [vmem:[#allocation5 + $0x30] sm:$0xff] }
 0x5f2   :  { %v1146_v17 = vpop.permute.xlu1 %1145  ;;  %1552 = vmatpush.msra.mxu1 %v4789_v40  ;;  %1572 = vmatpush.msra.mxu2 %v4795_v13  ;;  %6093 = vst [vmem:[#allocation44_spill] sm:$0xff] %v5022_v27 }
 0x5f3   :  { %v1151_v57 = vmul.f32 %v2797_v16, %v1146_v17  ;;  %1620 = vmatpush.msra.mxu3 %v4534_v52  ;;  %1640 = vmatpush.msra.mxu0 %v4537_v53  ;;  %v4815_v53 = vld [vmem:[%s5786_s4 + $0x48] sm:$0xff]  ;;  %v5025_v16 = vld [vmem:[#allocation5 + $0xb0] sm:$0xff] }
 0x5f4   :  { %1553 = vmatpush.msra.mxu1 %v4803_v28  ;;  %1573 = vmatpush.msra.mxu2 %v4809_v11  ;;  %6094 = vst [vmem:[#allocation27_spill] sm:$0xff] %v5025_v16  ;;  %v3045_v17 = vld [vmem:[%s5784_s2 + $0x68] sm:$0xff] }
 0x5f5   :  { %v2799_v21 = vpop.eup %2798  ;;  %1386 = vmatmul.f32.vlgmr.msrb.gmra.mxu1 %v1151_v57  ;;  %1438 = vmatmul.f32.vlgmr.msrb.gmra.mxu2 %v1151_v57  ;;  %v5031_v57 = vld [vmem:[#allocation5 + $0x28] sm:$0xff] }
 0x5f6   :  { %v1223_v52 = vmul.f32 %v2799_v21, %v1218_v2  ;;  %1554 = vmatpush.msra.mxu1 %v4815_v53  ;;  %1574 = vmatpush.msra.mxu2 %v4821_v38  ;;  %6095 = vst [vmem:[#allocation31_spill] sm:$0xff] %v5031_v57  ;;  %v5034_v21 = vld [vmem:[#allocation5 + $0xa8] sm:$0xff]  ;;  %v3048_v2 = vld [vmem:[%s5784_s2 + $0x60] sm:$0xff] }
 0x5f7   :  { %1621 = vmatpush.msra.mxu3 %v4544_v54  ;;  %1641 = vmatpush.msra.mxu0 %v4547_v56  ;;  %v4842_v54 = vld [vmem:[%s5786_s4 + $0x38] sm:$0xff]  ;;  %6096 = vst [vmem:[#allocation45_spill] sm:$0xff] %v5034_v21 }
 0x5f8   :  { %1555 = vmatpush.msra.mxu1 %v4829_v30  ;;  %1575 = vmatpush.msra.mxu2 %v4835_v32  ;;  %v4848_v56 = vld [vmem:[%s5786_s4 + $0xb8] sm:$0xff] }
 0x5f9   :  { %1458 = vmatmul.f32.vlgmr.msrb.gmra.mxu3 %v1223_v52  ;;  %1642 = vmatpush.msra.mxu0 %v4552_v14  ;;  %v4856_v14 = vld [vmem:[%s5786_s4 + $0x30] sm:$0xff]  ;;  %v5040_v52 = vld [vmem:[#allocation5 + $0x20] sm:$0xff] }
 0x5fa   :  { %1556 = vmatpush.msra.mxu1 %v4842_v54  ;;  %1576 = vmatpush.msra.mxu2 %v4848_v56  ;;  %6097 = vst [vmem:[#allocation28_spill] sm:$0xff] %v5040_v52 }
 0x5fb   :  { %1622 = vmatpush.msra.mxu3 %v4557_v0  ;;  %1643 = vmatpush.msra.mxu0 %v4560_v58  ;;  %v4870_v0 = vld [vmem:[%s5786_s4 + $0x28] sm:$0xff] }
 0x5fc   :  { %1557 = vmatpush.msra.mxu1 %v4856_v14  ;;  %1577 = vmatpush.msra.mxu2 %v4862_v19  ;;  %v4876_v58 = vld [vmem:[%s5786_s4 + $0xa8] sm:$0xff] }
 0x5fd   :  { %1623 = vmatpush.msra.mxu3 %v4565_v60  ;;  %1644 = vmatpush.msra.mxu0 %v4568_v4  ;;  %v4884_v60 = vld [vmem:[%s5786_s4 + $0x20] sm:$0xff] }
 0x5fe   :  { %1558 = vmatpush.msra.mxu1 %v4870_v0  ;;  %1578 = vmatpush.msra.mxu2 %v4876_v58  ;;  %v4890_v4 = vld [vmem:[%s5786_s4 + $0xa0] sm:$0xff] }
 0x5ff   :  { %1624 = vmatpush.msra.mxu3 %v4573_v61  ;;  %1645 = vmatpush.msra.mxu0 %v4576_v62  ;;  %v4898_v61 = vld [vmem:[%s5786_s4 + $0x18] sm:$0xff] }
 0x600   :  { %1559 = vmatpush.msra.mxu1 %v4884_v60  ;;  %1579 = vmatpush.msra.mxu2 %v4890_v4  ;;  %v4904_v62 = vld [vmem:[%s5786_s4 + $0x98] sm:$0xff] }
 0x601   :  { %1625 = vmatpush.msra.mxu3 %v4581_v24  ;;  %1646 = vmatpush.msra.mxu0 %v4584_v6  ;;  %v4912_v24 = vld [vmem:[%s5786_s4 + $0x10] sm:$0xff] }
 0x602   :  { %1560 = vmatpush.msra.mxu1 %v4898_v61  ;;  %1580 = vmatpush.msra.mxu2 %v4904_v62  ;;  %v4918_v6 = vld [vmem:[%s5786_s4 + $0x90] sm:$0xff] }
 0x603   :  { %1626 = vmatpush.msra.mxu3 %v4589_v35  ;;  %1647 = vmatpush.msra.mxu0 %v4592_v34  ;;  %v4926_v35 = vld [vmem:[%s5786_s4 + $0x8] sm:$0xff] }
 0x604   :  { %1561 = vmatpush.msra.mxu1 %v4912_v24  ;;  %1581 = vmatpush.msra.mxu2 %v4918_v6  ;;  %v4932_v34 = vld [vmem:[%s5786_s4 + $0x88] sm:$0xff] }
 0x605   :  { %1627 = vmatpush.msra.mxu3 %v4597_v29  ;;  %1648 = vmatpush.msra.mxu0 %v4600_v26  ;;  %v4940_v29 = vld [vmem:[%s5786_s4] sm:$0xff] }
 0x606   :  { %1562 = vmatpush.msra.mxu1 %v4926_v35  ;;  %1582 = vmatpush.msra.mxu2 %v4932_v34  ;;  %v4946_v26 = vld [vmem:[%s5786_s4 + $0x80] sm:$0xff] }
 0x607   :  { %1628 = vmatpush.msra.mxu3 %v4605_v33  ;;  %1649 = vmatpush.msra.mxu0 %v4608_v31  ;;  %v4952_v33 = vld [vmem:[#allocation5 + $0xf8] sm:$0xff]  ;;  %v4957_v31 = vld [vmem:[#allocation5 + $0x70] sm:$0xff] }
 0x608   :  { %1563 = vmatpush.msra.mxu1 %v4940_v29  ;;  %1583 = vmatpush.msra.mxu2 %v4946_v26 }
 0x609   :  { %1629 = vmatpush.msra.mxu3 %v4615_v37  ;;  %1650 = vmatpush.msra.mxu0 %v4618_v36  ;;  %v4973_v37 = vld [vmem:[#allocation5 + $0x60] sm:$0xff] }
 0x60a   :  { %1692 = vmatpush.msrb.mxu1 %v4949_v46  ;;  %1712 = vmatpush.msrb.mxu2 %v4952_v33  ;;  %6081 = vst [vmem:[#allocation16_spill] sm:$0xff] %v4973_v37  ;;  %v4976_v36 = vld [vmem:[#allocation5 + $0xe0] sm:$0xff] }
 0x60b   :  { %1630 = vmatpush.msra.mxu3 %v4623_v42  ;;  %1651 = vmatpush.msra.mxu0 %v4626_v41  ;;  %6082 = vst [vmem:[#allocation19_spill] sm:$0xff] %v4976_v36  ;;  %v4981_v42 = vld [vmem:[#allocation5 + $0x58] sm:$0xff] }
 0x60c   :  { %1693 = vmatpush.msrb.mxu1 %v4957_v31  ;;  %1713 = vmatpush.msrb.mxu2 %v4960_v44  ;;  %6083 = vst [vmem:[#allocation17_spill] sm:$0xff] %v4981_v42  ;;  %v4984_v41 = vld [vmem:[#allocation5 + $0xd8] sm:$0xff] }
 0x60d   :  { %1631 = vmatpush.msra.mxu3 %v4631_v45  ;;  %1652 = vmatpush.msra.mxu0 %v4634_v43  ;;  %6084 = vst [vmem:[#allocation21_spill] sm:$0xff] %v4984_v41  ;;  %v4989_v45 = vld [vmem:[#allocation5 + $0x50] sm:$0xff] }
 0x60e   :  { %1694 = vmatpush.msrb.mxu1 %v4965_v47  ;;  %1714 = vmatpush.msrb.mxu2 %v4968_v10  ;;  %6085 = vst [vmem:[#allocation18_spill] sm:$0xff] %v4989_v45  ;;  %v4992_v43 = vld [vmem:[#allocation5 + $0xd0] sm:$0xff] }
 0x60f   :  { %1632 = vmatpush.msra.mxu3 %v4639_v48  ;;  %1653 = vmatpush.msra.mxu0 %v4642_v23  ;;  %6086 = vst [vmem:[#allocation23_spill] sm:$0xff] %v4992_v43  ;;  %v4997_v48 = vld [vmem:[#allocation5 + $0x48] sm:$0xff] }
 0x610   :  { %1695 = vmatpush.msrb.mxu1 %v4973_v37  ;;  %1715 = vmatpush.msrb.mxu2 %v4976_v36  ;;  %6087 = vst [vmem:[#allocation20_spill] sm:$0xff] %v4997_v48  ;;  %v5000_v23 = vld [vmem:[#allocation5 + $0xc8] sm:$0xff] }
 0x611   :  { %1633 = vmatpush.msra.mxu3 %v4647_v55  ;;  %1654 = vmatpush.msra.mxu0 %v4650_v50  ;;  %6088 = vst [vmem:[#allocation25_spill] sm:$0xff] %v5000_v23  ;;  %v5004_v55 = vld [vmem:[#allocation5 + $0x40] sm:$0xff] }
 0x612   :  { %1696 = vmatpush.msrb.mxu1 %v4981_v42  ;;  %1716 = vmatpush.msrb.mxu2 %v4984_v41  ;;  %6089 = vst [vmem:[#allocation22_spill] sm:$0xff] %v5004_v55  ;;  %v5007_v50 = vld [vmem:[#allocation5 + $0xc0] sm:$0xff] }
 0x613   :  { %1634 = vmatpush.msra.mxu3 %v4655_v3  ;;  %1655 = vmatpush.msra.mxu0 %v4658_v39  ;;  %6090 = vst [vmem:[#allocation26_spill] sm:$0xff] %v5007_v50  ;;  %v3039_v3 = vld [vmem:[%s5784_s2 + $0x78] sm:$0xff] }
 0x614   :  { %1697 = vmatpush.msrb.mxu1 %v4989_v45  ;;  %1717 = vmatpush.msrb.mxu2 %v4992_v43  ;;  %v5013_v39 = vld [vmem:[#allocation5 + $0x38] sm:$0xff] }
 0x615   :  { %1635 = vmatpush.msra.mxu3 %v4663_v7  ;;  %6091 = vst [vmem:[#allocation24_spill] sm:$0xff] %v5013_v39  ;;  %v3042_v7 = vld [vmem:[%s5784_s2 + $0x70] sm:$0xff] }
 0x616   :  { %1698 = vmatpush.msrb.mxu1 %v4997_v48  ;;  %1718 = vmatpush.msrb.mxu2 %v5000_v23 }
 0x617   :  { %1765 = vmatpush.msrb.mxu3 %v3039_v3  ;;  %v5043_v3 = vld [vmem:[#allocation5 + $0xa0] sm:$0xff] }
 0x618   :  { %1699 = vmatpush.msrb.mxu1 %v5004_v55  ;;  %1719 = vmatpush.msrb.mxu2 %v5007_v50  ;;  %6098 = vst [vmem:[#allocation33_spill] sm:$0xff] %v5043_v3 }
 0x619   :  { %1766 = vmatpush.msrb.mxu3 %v3042_v7  ;;  %v3051_v7 = vld [vmem:[%s5784_s2 + $0x58] sm:$0xff] }
 0x61a   :  { %1700 = vmatpush.msrb.mxu1 %v5013_v39  ;;  %1720 = vmatpush.msrb.mxu2 %v5016_v22 }
 0x61b   :  { %1767 = vmatpush.msrb.mxu3 %v3045_v17  ;;  %v5049_v17 = vld [vmem:[#allocation5 + $0x18] sm:$0xff] }
 0x61c   :  { %1701 = vmatpush.msrb.mxu1 %v5022_v27  ;;  %1721 = vmatpush.msrb.mxu2 %v5025_v16  ;;  %6099 = vst [vmem:[#allocation46_spill] sm:$0xff] %v5049_v17 }
 0x61d   :  { %1768 = vmatpush.msrb.mxu3 %v3048_v2  ;;  %v3054_v2 = vld [vmem:[%s5784_s2 + $0x50] sm:$0xff] }
 0x61e   :  { %1702 = vmatpush.msrb.mxu1 %v5031_v57  ;;  %1722 = vmatpush.msrb.mxu2 %v5034_v21  ;;  %v5052_v21 = vld [vmem:[#allocation5 + $0x98] sm:$0xff] }
 0x61f   :  { %1769 = vmatpush.msrb.mxu3 %v3051_v7  ;;  %6100 = vst [vmem:[#allocation30_spill] sm:$0xff] %v5052_v21  ;;  %v3057_v7 = vld [vmem:[%s5784_s2 + $0x48] sm:$0xff] }
 0x620   :  { %1703 = vmatpush.msrb.mxu1 %v5040_v52  ;;  %1723 = vmatpush.msrb.mxu2 %v5043_v3  ;;  %v5058_v52 = vld [vmem:[#allocation5 + $0x10] sm:$0xff] }
 0x621   :  { %1770 = vmatpush.msrb.mxu3 %v3054_v2  ;;  %6101 = vst [vmem:[#allocation35_spill] sm:$0xff] %v5058_v52  ;;  %v5061_v3 = vld [vmem:[#allocation5 + $0x90] sm:$0xff]  ;;  %v3060_v2 = vld [vmem:[%s5784_s2 + $0x40] sm:$0xff] }
 0x622   :  { %1704 = vmatpush.msrb.mxu1 %v5049_v17  ;;  %1724 = vmatpush.msrb.mxu2 %v5052_v21  ;;  %6102 = vst [vmem:[#allocation47_spill] sm:$0xff] %v5061_v3  ;;  %v5067_v17 = vld [vmem:[#allocation5 + $0x8] sm:$0xff] }
 0x623   :  { %1771 = vmatpush.msrb.mxu3 %v3057_v7  ;;  %6103 = vst [vmem:[#allocation32_spill] sm:$0xff] %v5067_v17  ;;  %v5070_v21 = vld [vmem:[#allocation5 + $0x88] sm:$0xff]  ;;  %v3063_v7 = vld [vmem:[%s5784_s2 + $0x38] sm:$0xff] }
 0x624   :  { %1705 = vmatpush.msrb.mxu1 %v5058_v52  ;;  %1725 = vmatpush.msrb.mxu2 %v5061_v3  ;;  %6104 = vst [vmem:[#allocation37_spill] sm:$0xff] %v5070_v21  ;;  %v5076_v52 = vld [vmem:[#allocation5] sm:$0xff] }
 0x625   :  { %1772 = vmatpush.msrb.mxu3 %v3060_v2  ;;  %6105 = vst [vmem:[#allocation48_spill] sm:$0xff] %v5076_v52  ;;  %v5079_v3 = vld [vmem:[#allocation5 + $0x80] sm:$0xff]  ;;  %v3065_v2 = vld [vmem:[%s5784_s2 + $0x28] sm:$0xff] }
 0x626   :  { %1706 = vmatpush.msrb.mxu1 %v5067_v17  ;;  %1726 = vmatpush.msrb.mxu2 %v5070_v21  ;;  %6106 = vst [vmem:[#allocation34_spill] sm:$0xff] %v5079_v3  ;;  %v3064_v21 = vld [vmem:[%s5784_s2 + $0x30] sm:$0xff] }
 0x627   :  { %1773 = vmatpush.msrb.mxu3 %v3063_v7  ;;  %v3068_v7 = vld [vmem:[%s5784_s2 + $0x10] sm:$0xff] }
 0x628   :  { %1707 = vmatpush.msrb.mxu1 %v5076_v52  ;;  %1727 = vmatpush.msrb.mxu2 %v5079_v3  ;;  %v3066_v52 = vld [vmem:[%s5784_s2 + $0x20] sm:$0xff]  ;;  %v3067_v3 = vld [vmem:[%s5784_s2 + $0x18] sm:$0xff] }
 0x629   :  { %1774 = vmatpush.msrb.mxu3 %v3064_v21  ;;  %v3069_v21 = vld [vmem:[%s5784_s2 + $0x8] sm:$0xff] }
 0x62b   :  { %1775 = vmatpush.msrb.mxu3 %v3065_v2  ;;  %v3070_v2 = vld [vmem:[%s5784_s2] sm:$0xff] }
 0x62d   :  { %1776 = vmatpush.msrb.mxu3 %v3066_v52  ;;  %v5109_v52 = vld [vmem:[%s5785_s3] ss:$0 sm:$0xff] }
 0x62e   :  { %6107 = vst [vmem:[#allocation39_spill] sm:$0xff] %v5109_v52 }
 0x62f   :  { %1777 = vmatpush.msrb.mxu3 %v3067_v3  ;;  %v6108_v3 = vld [vmem:[#allocation12_spill] sm:$0xff] }
 0x630   :  { %v166_v17 = vadd.f32 %v5109_v52, %v6108_v3 }
 0x631   :  { %1778 = vmatpush.msrb.mxu3 %v3068_v7 }
 0x633   :  { %1779 = vmatpush.msrb.mxu3 %v3069_v21 }
 0x635   :  { %1780 = vmatpush.msrb.mxu3 %v3070_v2  ;;  %v5117_v2 = vld [vmem:[%s5787_s5] ss:$0 sm:$0xff] }
 0x636   :  { %6109 = vst [vmem:[#allocation49_spill] sm:$0xff] %v5117_v2 }
 0x666   :  { %v1242_v57 = vpop.f32.mrf.mxu1 }
 0x667   :  { %v1245_v7 = vadd.f32 %v1242_v57, %v166_v17 }
 0x669   :  { %v2664_v16 = vmul.f32 -1.442695, %v1245_v7 }
 0x66b   :  { %2800 = vpow2.f32 %v2664_v16 }
 0x66c   :  { %v1295_v22 = vpop.f32.mrf.mxu2 }
 0x66d   :  { %v1296_v23 = vadd.f32 %v5117_v2, %v1295_v22 }
 0x66e   :  { %v1367_v27 = vpop.f32.mrf.mxu0 }
 0x66f   :  { %v1368_v39 = vadd.f32 %v4706_v59, %v1367_v27  ;;  %v5123_v59 = vld [vmem:[%s5791_s9] ss:$0 sm:$0xff] }
 0x670   :  { %6110 = vst [vmem:[#allocation36_spill] sm:$0xff] %v5123_v59 }
 0x671   :  { %v2801_v21 = vpop.eup %2800 }
 0x672   :  { %v1249_v50 = vadd.f32 1.0, %v2801_v21  ;;  %v1387_v55 = vpop.f32.mrf.mxu1 }
 0x673   :  { %v1388_v48 = vadd.f32 %v1387_v55, %v1368_v39 }
 0x674   :  { %2802 = vrcp.f32 %v1249_v50  ;;  %v1315_v3 = vpop.f32.mrf.mxu3  ;;  %vm1255_vm10 = vweird.f32 %v1249_v50 }
 0x675   :  { %v2668_v57 = vmul.f32 -1.442695, %v1388_v48  ;;  %v1316_v17 = vadd.f32 %v1315_v3, %v1296_v23  ;;  %v1261_v48 = vand.u32 2147483648, %v1249_v50 }
 0x677   :  { %2804 = vpow2.f32 %v2668_v57  ;;  %v2666_v16 = vmul.f32 -1.442695, %v1316_v17  ;;  %v1259_v17 = vand.u32 2147483647, %v1249_v50 }
 0x678   :  { %v1439_v7 = vpop.f32.mrf.mxu2 }
 0x679   :  { %2806 = vpow2.f32 %v2666_v16  ;;  %v1440_v27 = vadd.f32 %v5123_v59, %v1439_v7  ;;  %v1262_v7 = vor.u32 1.1754944e-38, %v1261_v48  ;;  %vm1260_vm12 = vcmp.eq.f32.partialorder %v1259_v17, 8.507059e+37 }
 0x67a   :  { %v2803_v52 = vpop.eup %2802 }
 0x67b   :  { %v1251_v21 = vmul.f32 %v2803_v52, %v1249_v50  ;;  %vm1256_vm9 = vweird.f32 %v2803_v52 }
 0x67c   :  { %v1459_v43 = vpop.f32.mrf.mxu3  ;;  %vm1257_vm11 = vmor %vm1255_vm10, %vm1256_vm9 }
 0x67d   :  { %v2805_v22 = vpop.eup %2804  ;;  %v1460_v55 = vadd.f32 %v1459_v43, %v1440_v27  ;;  %v1252_v39 = vsub.f32 1.0, %v1251_v21 }
 0x67e   :  { %v1393_v2 = vadd.f32 1.0, %v2805_v22 }
 0x67f   :  { %v2807_v23 = vpop.eup %2806  ;;  %v2670_v3 = vmul.f32 -1.442695, %v1460_v55  ;;  %v1253_v57 = vmul.f32 %v2803_v52, %v1252_v39 }
 0x680   :  { %2808 = vrcp.f32 %v1393_v2  ;;  %v1321_v16 = vadd.f32 1.0, %v2807_v23  ;;  %vm1399_vm14 = vweird.f32 %v1393_v2 }
 0x681   :  { %2810 = vpow2.f32 %v2670_v3  ;;  %v1254_v45 = vadd.f32 %v2803_v52, %v1253_v57 }
 0x682   :  { %2812 = vrcp.f32 %v1321_v16  ;;  %v1333_v57 = vand.u32 2147483648, %v1321_v16  ;;  %v1331_v42 = vand.u32 2147483647, %v1321_v16  ;;  %vm1327_vm2 = vweird.f32 %v1321_v16 }
 0x683   :  { %v1258_v59 = vsel %vm1257_vm11, %v2803_v52, %v1254_v45  ;;  %v1405_v45 = vand.u32 2147483648, %v1393_v2 }
 0x684   :  { %v5126_v41 = vsel %vm1260_vm12, %v1262_v7, %v1258_v59  ;;  %v1403_v59 = vand.u32 2147483647, %v1393_v2  ;;  %v1334_v37 = vor.u32 1.1754944e-38, %v1333_v57  ;;  %vm1332_vm4 = vcmp.eq.f32.partialorder %v1331_v42, 8.507059e+37 }
 0x685   :  { %1267 = vrot.lane.b32.xlu0 %v5126_v41, %s3244_s26  ;;  %v1265_v43 = vmul.f32 2.0, %v5126_v41 }
 0x686   :  { %v2809_v27 = vpop.eup %2808  ;;  %vm1404_vm1 = vcmp.eq.f32.partialorder %v1403_v59, 8.507059e+37 }
 0x687   :  { %v2811_v21 = vpop.eup %2810  ;;  %v2665_v22 = vadd.f32 -1.0, %v1265_v43  ;;  %v1395_v55 = vmul.f32 %v2809_v27, %v1393_v2  ;;  %vm1400_vm13 = vweird.f32 %v2809_v27  ;;  %v1406_v43 = vor.u32 1.1754944e-38, %v1405_v45 }
 0x688   :  { %v2813_v39 = vpop.eup %2812  ;;  %v1465_v23 = vadd.f32 1.0, %v2811_v21  ;;  %vm1401_vm0 = vmor %vm1399_vm14, %vm1400_vm13 }
 0x689   :  { %1269 = vrot.lane.b32.xlu1 %v2665_v22, %s3245_s27  ;;  %v1396_v50 = vsub.f32 1.0, %v1395_v55  ;;  %v1323_v3 = vmul.f32 %v2813_v39, %v1321_v16  ;;  %vm1328_vm15 = vweird.f32 %v2813_v39 }
 0x68a   :  { %2814 = vrcp.f32 %v1465_v23  ;;  %vm1329_vm3 = vmor %vm1327_vm2, %vm1328_vm15  ;;  %v1475_v10 = vand.u32 2147483647, %v1465_v23  ;;  %v1477_v45 = vand.u32 2147483648, %v1465_v23  ;;  %vm1471_vm6 = vweird.f32 %v1465_v23 }
 0x68b   :  { %v1397_v52 = vmul.f32 %v2809_v27, %v1396_v50  ;;  %v1324_v48 = vsub.f32 1.0, %v1323_v3 }
 0x68c   :  { %v1478_v16 = vor.u32 1.1754944e-38, %v1477_v45  ;;  %vm1476_vm8 = vcmp.eq.f32.partialorder %v1475_v10, 8.507059e+37 }
 0x68d   :  { %v1398_v17 = vadd.f32 %v2809_v27, %v1397_v52  ;;  %v1325_v7 = vmul.f32 %v2813_v39, %v1324_v48 }
 0x68f   :  { %v1402_v36 = vsel %vm1401_vm0, %v2809_v27, %v1398_v17  ;;  %v1326_v21 = vadd.f32 %v2813_v39, %v1325_v7 }
 0x690   :  { %v2815_v22 = vpop.eup %2814  ;;  %v1407_v55 = vsel %vm1404_vm1, %v1406_v43, %v1402_v36 }
 0x691   :  { %1411 = vrot.lane.b32.xlu1 %v1407_v55, %s3244_s26  ;;  %v1330_v50 = vsel %vm1329_vm3, %v2813_v39, %v1326_v21  ;;  %v1467_v2 = vmul.f32 %v2815_v22, %v1465_v23  ;;  %v1409_v59 = vmul.f32 2.0, %v1407_v55  ;;  %vm1472_vm5 = vweird.f32 %v2815_v22 }
 0x692   :  { %v1335_v3 = vsel %vm1332_vm4, %v1334_v37, %v1330_v50  ;;  %vm1473_vm7 = vmor %vm1471_vm6, %vm1472_vm5 }
 0x693   :  { %1339 = vrot.lane.b32.xlu2 %v1335_v3, %s3244_s26  ;;  %v1337_v52 = vmul.f32 2.0, %v1335_v3  ;;  %v1468_v48 = vsub.f32 1.0, %v1467_v2  ;;  %v2669_v39 = vadd.f32 -1.0, %v1409_v59 }
 0x695   :  { %v2667_v27 = vadd.f32 -1.0, %v1337_v52  ;;  %v1469_v17 = vmul.f32 %v2815_v22, %v1468_v48 }
 0x697   :  { %1341 = vrot.lane.b32.xlu0 %v2667_v27, %s3245_s27  ;;  %v1470_v36 = vadd.f32 %v2815_v22, %v1469_v17 }
 0x699   :  { %v1474_v42 = vsel %vm1473_vm7, %v2815_v22, %v1470_v36  ;;  %v1273_v22 = vmul.f32 %v5126_v41, %v4723_v25  ;;  %v1417_v25 = vmul.f32 %v1407_v55, %v4731_v12 }
 0x69a   :  { %v1479_v37 = vsel %vm1476_vm8, %v1478_v16, %v1474_v42 }
 0x69b   :  { %1413 = vrot.lane.b32.xlu2 %v2669_v39, %s3245_s27  ;;  %v1481_v57 = vmul.f32 2.0, %v1479_v37 }
 0x69d   :  { %v2671_v7 = vadd.f32 -1.0, %v1481_v57  ;;  %v5191_v57 = vld [vmem:[#allocation3 + $0xf0] sm:$0xff] }
 0x69f   :  { %1483 = vrot.lane.b32.xlu0 %v1479_v37, %s3244_s26  ;;  %1485 = vrot.lane.b32.xlu1 %v2671_v7, %s3245_s27  ;;  %v5196_v7 = vld [vmem:[#allocation3 + $0x68] sm:$0xff] }
 0x6a3   :  { %1271 = vrot.lane.b32.xlu2 %v5126_v41, %s3243_s25  ;;  %v1345_v41 = vmul.f32 %v1335_v3, %v4727_v5  ;;  %v1489_v5 = vmul.f32 %v1479_v37, %v4759_v1 }
 0x6a7   :  { %1343 = vrot.lane.b32.xlu0 %v1335_v3, %s3243_s25  ;;  %1415 = vrot.lane.b32.xlu1 %v1407_v55, %s3243_s25 }
 0x6ab   :  { %1487 = vrot.lane.b32.xlu2 %v1479_v37, %s3243_s25  ;;  %v5188_v37 = vld [vmem:[#allocation3 + $0x70] sm:$0xff] }
 0x6ed   :  { %v1340_v23 = vpop.permute.xlu2 %1339 }
 0x6f5   :  { %v1414_v21 = vpop.permute.xlu2 %1413 }
 0x6f7   :  { %v1268_v10 = vpop.permute.xlu0 %1267 }
 0x6fb   :  { %v1270_v43 = vpop.permute.xlu1 %1269 }
 0x6fc   :  { %v1274_v50 = vmul.f32 %v1270_v43, %v1268_v10  ;;  %v5212_v10 = vld [vmem:[#allocation3 + $0x58] sm:$0xff] }
 0x6fd   :  { %v1272_v48 = vpop.permute.xlu2 %1271  ;;  %v5216_v43 = vld [vmem:[#allocation3 + $0xd8] sm:$0xff] }
 0x6fe   :  { %v5145_v2 = vadd.f32 %v1274_v50, %v1273_v22  ;;  %v5238_v22 = vld [vmem:[#allocation3 + $0x40] sm:$0xff]  ;;  %v5246_v50 = vld [vmem:[#allocation3 + $0x38] sm:$0xff] }
 0x700   :  { %2816 = vtanh.f32 %v5145_v2 }
 0x703   :  { %v1412_v27 = vpop.permute.xlu1 %1411 }
 0x704   :  { %v1418_v17 = vmul.f32 %v1414_v21, %v1412_v27  ;;  %v5224_v21 = vld [vmem:[#allocation3 + $0xd0] sm:$0xff]  ;;  %v6114_v27 = vld [vmem:[#allocation17_spill] sm:$0xff] }
 0x706   :  { %v2817_v52 = vpop.eup %2816  ;;  %v5154_v16 = vadd.f32 %v1418_v17, %v1417_v25  ;;  %v6115_v17 = vld [vmem:[#allocation21_spill] sm:$0xff]  ;;  %v6116_v25 = vld [vmem:[#allocation18_spill] sm:$0xff] }
 0x707   :  { %v1277_v45 = vmul.f32 %v2817_v52, %v1272_v48  ;;  %v6112_v52 = vld [vmem:[#allocation16_spill] sm:$0xff]  ;;  %v5250_v48 = vld [vmem:[#allocation3 + $0xb8] sm:$0xff] }
 0x708   :  { %2818 = vtanh.f32 %v5154_v16 }
 0x709   :  { %v1342_v59 = vpop.permute.xlu0 %1341  ;;  %1511 = vmatmul.f32.vlgmr.msrb.gmra.mxu0 %v1277_v45  ;;  %1564 = vmatmul.f32.vlgmr.msra.gmra.mxu1 %v1277_v45  ;;  %v5254_v45 = vld [vmem:[#allocation3 + $0x30] sm:$0xff] }
 0x70a   :  { %1818 = vmatpush.msrb.mxu0 %v4736_v15  ;;  %1838 = vmatpush.msra.mxu1 %v4742_v51  ;;  %v1346_v36 = vmul.f32 %v1342_v59, %v1340_v23  ;;  %v5199_v23 = vld [vmem:[#allocation3 + $0xe8] sm:$0xff]  ;;  %v5258_v59 = vld [vmem:[#allocation3 + $0xb0] sm:$0xff] }
 0x70c   :  { %1819 = vmatpush.msrb.mxu0 %v4750_v8  ;;  %1839 = vmatpush.msra.mxu1 %v4756_v63  ;;  %v5158_v39 = vadd.f32 %v1346_v36, %v1345_v41  ;;  %v5262_v36 = vld [vmem:[#allocation3 + $0x28] sm:$0xff] }
 0x70d   :  { %v5266_v41 = vld [vmem:[#allocation3 + $0xa8] sm:$0xff] }
 0x70e   :  { %1820 = vmatpush.msrb.mxu0 %v4764_v20  ;;  %1840 = vmatpush.msra.mxu1 %v4770_v18  ;;  %2820 = vtanh.f32 %v5158_v39  ;;  %v2819_v18 = vpop.eup %2818 }
 0x710   :  { %1821 = vmatpush.msrb.mxu0 %v4777_v49  ;;  %1841 = vmatpush.msra.mxu1 %v4783_v9 }
 0x711   :  { %v1484_v51 = vpop.permute.xlu0 %1483  ;;  %v1486_v12 = vpop.permute.xlu1 %1485 }
 0x712   :  { %v1490_v55 = vmul.f32 %v1486_v12, %v1484_v51  ;;  %1822 = vmatpush.msrb.mxu0 %v4789_v40  ;;  %1842 = vmatpush.msra.mxu1 %v4795_v13  ;;  %v6117_v51 = vld [vmem:[#allocation23_spill] sm:$0xff]  ;;  %v5270_v12 = vld [vmem:[#allocation3 + $0x20] sm:$0xff] }
 0x714   :  { %1823 = vmatpush.msrb.mxu0 %v4803_v28  ;;  %1843 = vmatpush.msra.mxu1 %v4809_v11  ;;  %v5169_v63 = vadd.f32 %v1490_v55, %v1489_v5  ;;  %v2821_v9 = vpop.eup %2820  ;;  %v6118_v55 = vld [vmem:[#allocation20_spill] sm:$0xff]  ;;  %v5274_v5 = vld [vmem:[#allocation3 + $0xa0] sm:$0xff] }
 0x715   :  { %6119 = vst [vmem:[#allocation41_spill] sm:$0xff] %v5274_v5 }
 0x716   :  { %1824 = vmatpush.msrb.mxu0 %v4815_v53  ;;  %1844 = vmatpush.msra.mxu1 %v4821_v38  ;;  %2822 = vtanh.f32 %v5169_v63  ;;  %v5180_v38 = vld [vmem:[#allocation3 + $0x78] sm:$0xff] }
 0x718   :  { %1825 = vmatpush.msrb.mxu0 %v4829_v30  ;;  %1845 = vmatpush.msra.mxu1 %v4835_v32  ;;  %v5183_v32 = vld [vmem:[#allocation3 + $0xf8] sm:$0xff] }
 0x719   :  { %v1344_v13 = vpop.permute.xlu0 %1343  ;;  %v1416_v1 = vpop.permute.xlu1 %1415 }
 0x71a   :  { %v1349_v3 = vmul.f32 %v2821_v9, %v1344_v13  ;;  %v1421_v42 = vmul.f32 %v2819_v18, %v1416_v1  ;;  %1826 = vmatpush.msrb.mxu0 %v4842_v54  ;;  %1846 = vmatpush.msra.mxu1 %v4848_v56  ;;  %v1488_v56 = vpop.permute.xlu2 %1487  ;;  %v6120_v18 = vld [vmem:[#allocation25_spill] sm:$0xff]  ;;  %v6121_v13 = vld [vmem:[#allocation22_spill] sm:$0xff] }
 0x71b   :  { %v5278_v9 = vld [vmem:[#allocation3 + $0x18] sm:$0xff] }
 0x71c   :  { %1584 = vmatmul.f32.vlgmr.msra.gmra.mxu2 %v1349_v3  ;;  %1636 = vmatmul.f32.vlgmr.msra.gmra.mxu3 %v1349_v3  ;;  %v2823_v11 = vpop.eup %2822  ;;  %v5282_v1 = vld [vmem:[#allocation3 + $0x98] sm:$0xff]  ;;  %v6123_v3 = vld [vmem:[#allocation26_spill] sm:$0xff] }
 0x71d   :  { %1656 = vmatmul.f32.vlgmr.msra.gmra.mxu0 %v1421_v42  ;;  %1708 = vmatmul.f32.vlgmr.msrb.gmra.mxu1 %v1421_v42  ;;  %6122 = vst [vmem:[#allocation50_spill] sm:$0xff] %v5282_v1  ;;  %v5286_v42 = vld [vmem:[#allocation3 + $0x10] sm:$0xff] }
 0x71e   :  { %1827 = vmatpush.msrb.mxu0 %v4856_v14  ;;  %1847 = vmatpush.msra.mxu1 %v4862_v19  ;;  %v1493_v19 = vmul.f32 %v2823_v11, %v1488_v56  ;;  %v6124_v11 = vld [vmem:[#allocation24_spill] sm:$0xff] }
 0x71f   :  { %1890 = vmatpush.msra.mxu2 %v5180_v38  ;;  %1910 = vmatpush.msra.mxu3 %v5183_v32  ;;  %v5290_v56 = vld [vmem:[#allocation3 + $0x90] sm:$0xff] }
 0x720   :  { %1828 = vmatpush.msrb.mxu0 %v4870_v0  ;;  %1848 = vmatpush.msra.mxu1 %v4876_v58  ;;  %v5204_v58 = vld [vmem:[#allocation3 + $0x60] sm:$0xff]  ;;  %6125 = vst [vmem:[#allocation38_spill] sm:$0xff] %v5290_v56 }
 0x721   :  { %1891 = vmatpush.msra.mxu2 %v5188_v37  ;;  %1911 = vmatpush.msra.mxu3 %v5191_v57 }
 0x722   :  { %1829 = vmatpush.msrb.mxu0 %v4884_v60  ;;  %1849 = vmatpush.msra.mxu1 %v4890_v4  ;;  %v5208_v4 = vld [vmem:[#allocation3 + $0xe0] sm:$0xff] }
 0x723   :  { %1892 = vmatpush.msra.mxu2 %v5196_v7  ;;  %1912 = vmatpush.msra.mxu3 %v5199_v23 }
 0x724   :  { %1728 = vmatmul.f32.vlgmr.msrb.gmra.mxu2 %v1493_v19  ;;  %1830 = vmatpush.msrb.mxu0 %v4898_v61  ;;  %v6126_v19 = vld [vmem:[#allocation29_spill] sm:$0xff] }
 0x725   :  { %1850 = vmatpush.msra.mxu1 %v4904_v62  ;;  %1893 = vmatpush.msra.mxu2 %v5204_v58  ;;  %v5220_v62 = vld [vmem:[#allocation3 + $0x50] sm:$0xff] }
 0x726   :  { %1831 = vmatpush.msrb.mxu0 %v4912_v24  ;;  %1913 = vmatpush.msra.mxu3 %v5208_v4 }
 0x727   :  { %1851 = vmatpush.msra.mxu1 %v4918_v6  ;;  %1894 = vmatpush.msra.mxu2 %v5212_v10  ;;  %v5230_v6 = vld [vmem:[#allocation3 + $0x48] sm:$0xff] }
 0x728   :  { %1832 = vmatpush.msrb.mxu0 %v4926_v35  ;;  %1914 = vmatpush.msra.mxu3 %v5216_v43 }
 0x729   :  { %1852 = vmatpush.msra.mxu1 %v4932_v34  ;;  %1895 = vmatpush.msra.mxu2 %v5220_v62  ;;  %v5234_v34 = vld [vmem:[#allocation3 + $0xc8] sm:$0xff] }
 0x72a   :  { %1833 = vmatpush.msrb.mxu0 %v4940_v29  ;;  %1915 = vmatpush.msra.mxu3 %v5224_v21 }
 0x72b   :  { %1853 = vmatpush.msra.mxu1 %v4946_v26  ;;  %1896 = vmatpush.msra.mxu2 %v5230_v6  ;;  %v5242_v26 = vld [vmem:[#allocation3 + $0xc0] sm:$0xff] }
 0x72c   :  { %1962 = vmatpush.msra.mxu0 %v4949_v46  ;;  %1916 = vmatpush.msra.mxu3 %v5234_v34 }
 0x72d   :  { %1982 = vmatpush.msrb.mxu1 %v4952_v33  ;;  %1897 = vmatpush.msra.mxu2 %v5238_v22  ;;  %v6111_v33 = vld [vmem:[#allocation15_spill] sm:$0xff] }
 0x72e   :  { %1963 = vmatpush.msra.mxu0 %v4957_v31  ;;  %1917 = vmatpush.msra.mxu3 %v5242_v26 }
 0x72f   :  { %1983 = vmatpush.msrb.mxu1 %v4960_v44  ;;  %1898 = vmatpush.msra.mxu2 %v5246_v50  ;;  %v6113_v44 = vld [vmem:[#allocation19_spill] sm:$0xff] }
 0x730   :  { %1964 = vmatpush.msra.mxu0 %v4965_v47  ;;  %1918 = vmatpush.msra.mxu3 %v5250_v48 }
 0x731   :  { %1984 = vmatpush.msrb.mxu1 %v6111_v33  ;;  %1899 = vmatpush.msra.mxu2 %v5254_v45  ;;  %v5294_v33 = vld [vmem:[#allocation3 + $0x8] sm:$0xff] }
 0x732   :  { %1965 = vmatpush.msra.mxu0 %v6112_v52  ;;  %1919 = vmatpush.msra.mxu3 %v5258_v59  ;;  %6127 = vst [vmem:[#allocation42_spill] sm:$0xff] %v5294_v33 }
 0x733   :  { %1985 = vmatpush.msrb.mxu1 %v6113_v44  ;;  %1900 = vmatpush.msra.mxu2 %v5262_v36  ;;  %v6128_v44 = vld [vmem:[#allocation44_spill] sm:$0xff] }
 0x734   :  { %1966 = vmatpush.msra.mxu0 %v6114_v27  ;;  %1920 = vmatpush.msra.mxu3 %v5266_v41 }
 0x735   :  { %1986 = vmatpush.msrb.mxu1 %v6115_v17  ;;  %1901 = vmatpush.msra.mxu2 %v5270_v12  ;;  %v5298_v17 = vld [vmem:[#allocation3 + $0x88] sm:$0xff] }
 0x736   :  { %1967 = vmatpush.msra.mxu0 %v6116_v25  ;;  %1921 = vmatpush.msra.mxu3 %v5274_v5  ;;  %6129 = vst [vmem:[#allocation51_spill] sm:$0xff] %v5298_v17  ;;  %v6136_v5 = vld [vmem:[#allocation33_spill] sm:$0xff] }
 0x737   :  { %1987 = vmatpush.msrb.mxu1 %v6117_v51  ;;  %1902 = vmatpush.msra.mxu2 %v5278_v9  ;;  %v6130_v51 = vld [vmem:[#allocation27_spill] sm:$0xff] }
 0x738   :  { %1968 = vmatpush.msra.mxu0 %v6118_v55  ;;  %1922 = vmatpush.msra.mxu3 %v5282_v1  ;;  %v6135_v1 = vld [vmem:[#allocation28_spill] sm:$0xff] }
 0x739   :  { %1988 = vmatpush.msrb.mxu1 %v6120_v18  ;;  %1903 = vmatpush.msra.mxu2 %v5286_v42  ;;  %v5302_v18 = vld [vmem:[#allocation3] sm:$0xff] }
 0x73a   :  { %1969 = vmatpush.msra.mxu0 %v6121_v13  ;;  %1923 = vmatpush.msra.mxu3 %v5290_v56  ;;  %6131 = vst [vmem:[#allocation40_spill] sm:$0xff] %v5302_v18  ;;  %v5306_v56 = vld [vmem:[#allocation3 + $0x80] sm:$0xff] }
 0x73b   :  { %1989 = vmatpush.msrb.mxu1 %v6123_v3  ;;  %1904 = vmatpush.msra.mxu2 %v5294_v33  ;;  %v6132_v3 = vld [vmem:[#allocation31_spill] sm:$0xff]  ;;  %6133 = vst [vmem:[#allocation43_spill] sm:$0xff] %v5306_v56 }
 0x73c   :  { %1970 = vmatpush.msra.mxu0 %v6124_v11  ;;  %1924 = vmatpush.msra.mxu3 %v5298_v17  ;;  %v6138_v17 = vld [vmem:[#allocation30_spill] sm:$0xff]  ;;  %v6140_v33 = vld [vmem:[#allocation47_spill] sm:$0xff] }
 0x73d   :  { %1990 = vmatpush.msrb.mxu1 %v6126_v19  ;;  %1905 = vmatpush.msra.mxu2 %v5302_v18  ;;  %v6134_v19 = vld [vmem:[#allocation45_spill] sm:$0xff]  ;;  %v6139_v18 = vld [vmem:[#allocation35_spill] sm:$0xff] }
 0x73e   :  { %1971 = vmatpush.msra.mxu0 %v6128_v44  ;;  %1925 = vmatpush.msra.mxu3 %v5306_v56 }
 0x73f   :  { %1991 = vmatpush.msrb.mxu1 %v6130_v51  ;;  %2034 = vmatpush.msrb.mxu2 %v4736_v15  ;;  %v6137_v51 = vld [vmem:[#allocation46_spill] sm:$0xff]  ;;  %v6142_v15 = vld [vmem:[#allocation37_spill] sm:$0xff] }
 0x740   :  { %1972 = vmatpush.msra.mxu0 %v6132_v3 }
 0x741   :  { %1992 = vmatpush.msrb.mxu1 %v6134_v19  ;;  %2035 = vmatpush.msrb.mxu2 %v4750_v8  ;;  %v6141_v19 = vld [vmem:[#allocation32_spill] sm:$0xff]  ;;  %v6144_v8 = vld [vmem:[#allocation34_spill] sm:$0xff] }
 0x742   :  { %1973 = vmatpush.msra.mxu0 %v6135_v1 }
 0x743   :  { %1993 = vmatpush.msrb.mxu1 %v6136_v5  ;;  %2036 = vmatpush.msrb.mxu2 %v4764_v20  ;;  %v6143_v5 = vld [vmem:[#allocation48_spill] sm:$0xff]  ;;  %v6145_v20 = vld [vmem:[#allocation13_spill] sm:$0xff] }
 0x744   :  { %1974 = vmatpush.msra.mxu0 %v6137_v51 }
 0x745   :  { %1994 = vmatpush.msrb.mxu1 %v6138_v17  ;;  %2037 = vmatpush.msrb.mxu2 %v4777_v49  ;;  %v6146_v49 = vld [vmem:[#allocation39_spill] sm:$0xff]  ;;  %v6147_v17 = vld [vmem:[#allocation49_spill] sm:$0xff] }
 0x746   :  { %1975 = vmatpush.msra.mxu0 %v6139_v18 }
 0x747   :  { %1995 = vmatpush.msrb.mxu1 %v6140_v33  ;;  %2038 = vmatpush.msrb.mxu2 %v4789_v40  ;;  %v169_v40 = vadd.f32 %v6146_v49, %v6145_v20  ;;  %v5342_v49 = vld [vmem:[%s5789_s7] ss:$0 sm:$0xff] }
 0x748   :  { %1976 = vmatpush.msra.mxu0 %v6141_v19  ;;  %6148 = vst [vmem:[#allocation52_spill] sm:$0xff] %v5342_v49 }
 0x749   :  { %1996 = vmatpush.msrb.mxu1 %v6142_v15  ;;  %2039 = vmatpush.msrb.mxu2 %v4803_v28 }
 0x74a   :  { %1977 = vmatpush.msra.mxu0 %v6143_v5 }
 0x74b   :  { %1997 = vmatpush.msrb.mxu1 %v6144_v8  ;;  %2040 = vmatpush.msrb.mxu2 %v4815_v53 }
 0x74d   :  { %2041 = vmatpush.msrb.mxu2 %v4829_v30 }
 0x74f   :  { %2042 = vmatpush.msrb.mxu2 %v4842_v54 }
 0x751   :  { %2043 = vmatpush.msrb.mxu2 %v4856_v14 }
 0x753   :  { %2044 = vmatpush.msrb.mxu2 %v4870_v0 }
 0x755   :  { %2045 = vmatpush.msrb.mxu2 %v4884_v60 }
 0x757   :  { %2046 = vmatpush.msrb.mxu2 %v4898_v61 }
 0x759   :  { %2047 = vmatpush.msrb.mxu2 %v4912_v24 }
 0x75b   :  { %2048 = vmatpush.msrb.mxu2 %v4926_v35 }
 0x75d   :  { %2049 = vmatpush.msrb.mxu2 %v4940_v29 }
 0x786   :  { %v1512_v28 = vpop.f32.mrf.mxu0  ;;  %v1565_v60 = vpop.f32.mrf.mxu1 }
 0x787   :  { %v1515_v53 = vadd.f32 %v1512_v28, %v169_v40  ;;  %v1566_v24 = vadd.f32 %v6147_v17, %v1565_v60 }
 0x789   :  { %v2672_v30 = vmul.f32 -1.442695, %v1515_v53 }
 0x78b   :  { %2824 = vpow2.f32 %v2672_v30 }
 0x791   :  { %v2825_v54 = vpop.eup %2824 }
 0x792   :  { %v1519_v14 = vadd.f32 1.0, %v2825_v54 }
 0x794   :  { %2826 = vrcp.f32 %v1519_v14  ;;  %v1531_v15 = vand.u32 2147483648, %v1519_v14  ;;  %v1529_v5 = vand.u32 2147483647, %v1519_v14  ;;  %vm1525_vm10 = vweird.f32 %v1519_v14 }
 0x796   :  { %v1532_v60 = vor.u32 1.1754944e-38, %v1531_v15  ;;  %vm1530_vm12 = vcmp.eq.f32.partialorder %v1529_v5, 8.507059e+37 }
 0x79a   :  { %v2827_v0 = vpop.eup %2826  ;;  %v1657_v28 = vpop.f32.mrf.mxu0 }
 0x79b   :  { %v1521_v33 = vmul.f32 %v2827_v0, %v1519_v14  ;;  %vm1526_vm9 = vweird.f32 %v2827_v0 }
 0x79c   :  { %vm1527_vm11 = vmor %vm1525_vm10, %vm1526_vm9 }
 0x79d   :  { %v1522_v61 = vsub.f32 1.0, %v1521_v33  ;;  %v1709_v33 = vpop.f32.mrf.mxu1 }
 0x79f   :  { %v1585_v35 = vpop.f32.mrf.mxu2  ;;  %v1637_v8 = vpop.f32.mrf.mxu3  ;;  %v1523_v29 = vmul.f32 %v2827_v0, %v1522_v61 }
 0x7a0   :  { %v1586_v20 = vadd.f32 %v1585_v35, %v1566_v24  ;;  %v1638_v40 = vadd.f32 %v5342_v49, %v1637_v8  ;;  %v6149_v8 = vld [vmem:[#allocation36_spill] sm:$0xff] }
 0x7a1   :  { %v1524_v53 = vadd.f32 %v2827_v0, %v1523_v29  ;;  %v1710_v49 = vadd.f32 %v6149_v8, %v1709_v33 }
 0x7a2   :  { %v2674_v30 = vmul.f32 -1.442695, %v1586_v20  ;;  %v1658_v54 = vadd.f32 %v1657_v28, %v1638_v40 }
 0x7a3   :  { %v1528_v17 = vsel %vm1527_vm11, %v2827_v0, %v1524_v53 }
 0x7a4   :  { %2828 = vpow2.f32 %v2674_v30  ;;  %v2676_v61 = vmul.f32 -1.442695, %v1658_v54  ;;  %v5345_v24 = vsel %vm1530_vm12, %v1532_v60, %v1528_v17 }
 0x7a5   :  { %1537 = vrot.lane.b32.xlu0 %v5345_v24, %s3244_s26  ;;  %v1535_v35 = vmul.f32 2.0, %v5345_v24 }
 0x7a6   :  { %2830 = vpow2.f32 %v2676_v61 }
 0x7a7   :  { %v1729_v14 = vpop.f32.mrf.mxu2  ;;  %v2673_v29 = vadd.f32 -1.0, %v1535_v35 }
 0x7a8   :  { %v1730_v20 = vadd.f32 %v1729_v14, %v1710_v49 }
 0x7a9   :  { %1539 = vrot.lane.b32.xlu1 %v2673_v29, %s3245_s27 }
 0x7aa   :  { %v2829_v15 = vpop.eup %2828  ;;  %v2678_v0 = vmul.f32 -1.442695, %v1730_v20 }
 0x7ab   :  { %v1591_v5 = vadd.f32 1.0, %v2829_v15 }
 0x7ac   :  { %v2831_v40 = vpop.eup %2830  ;;  %2832 = vpow2.f32 %v2678_v0 }
 0x7ad   :  { %2834 = vrcp.f32 %v1591_v5  ;;  %v1663_v28 = vadd.f32 1.0, %v2831_v40  ;;  %v1601_v35 = vand.u32 2147483647, %v1591_v5  ;;  %v1603_v49 = vand.u32 2147483648, %v1591_v5 }
 0x7ae   :  { %vm1597_vm14 = vweird.f32 %v1591_v5 }
 0x7af   :  { %2836 = vrcp.f32 %v1663_v28  ;;  %v1675_v29 = vand.u32 2147483648, %v1663_v28  ;;  %v1673_v0 = vand.u32 2147483647, %v1663_v28  ;;  %vm1602_vm1 = vcmp.eq.f32.partialorder %v1601_v35, 8.507059e+37 }
 0x7b0   :  { %vm1669_vm2 = vweird.f32 %v1663_v28 }
 0x7b1   :  { %v1676_v51 = vor.u32 1.1754944e-38, %v1675_v29  ;;  %vm1674_vm4 = vcmp.eq.f32.partialorder %v1673_v0, 8.507059e+37 }
 0x7b2   :  { %v2833_v53 = vpop.eup %2832 }
 0x7b3   :  { %v2835_v30 = vpop.eup %2834  ;;  %v1735_v54 = vadd.f32 1.0, %v2833_v53  ;;  %v1604_v53 = vor.u32 1.1754944e-38, %v1603_v49 }
 0x7b4   :  { %v1593_v60 = vmul.f32 %v2835_v30, %v1591_v5  ;;  %vm1598_vm13 = vweird.f32 %v2835_v30 }
 0x7b5   :  { %v2837_v17 = vpop.eup %2836  ;;  %2838 = vrcp.f32 %v1735_v54  ;;  %vm1599_vm0 = vmor %vm1597_vm14, %vm1598_vm13  ;;  %v1747_v1 = vand.u32 2147483648, %v1735_v54  ;;  %vm1741_vm6 = vweird.f32 %v1735_v54 }
 0x7b6   :  { %v1594_v33 = vsub.f32 1.0, %v1593_v60  ;;  %v1665_v61 = vmul.f32 %v2837_v17, %v1663_v28  ;;  %vm1670_vm15 = vweird.f32 %v2837_v17 }
 0x7b7   :  { %vm1671_vm3 = vmor %vm1669_vm2, %vm1670_vm15  ;;  %v1748_v28 = vor.u32 1.1754944e-38, %v1747_v1 }
 0x7b8   :  { %v1595_v8 = vmul.f32 %v2835_v30, %v1594_v33  ;;  %v1666_v14 = vsub.f32 1.0, %v1665_v61 }
 0x7ba   :  { %v1596_v20 = vadd.f32 %v2835_v30, %v1595_v8  ;;  %v1667_v15 = vmul.f32 %v2837_v17, %v1666_v14  ;;  %v1745_v14 = vand.u32 2147483647, %v1735_v54 }
 0x7bb   :  { %v2839_v40 = vpop.eup %2838 }
 0x7bc   :  { %v1600_v56 = vsel %vm1599_vm0, %v2835_v30, %v1596_v20  ;;  %v1668_v19 = vadd.f32 %v2837_v17, %v1667_v15  ;;  %v1737_v60 = vmul.f32 %v2839_v40, %v1735_v54  ;;  %vm1742_vm5 = vweird.f32 %v2839_v40 }
 0x7bd   :  { %v1605_v18 = vsel %vm1602_vm1, %v1604_v53, %v1600_v56  ;;  %vm1743_vm7 = vmor %vm1741_vm6, %vm1742_vm5  ;;  %vm1746_vm8 = vcmp.eq.f32.partialorder %v1745_v14, 8.507059e+37 }
 0x7be   :  { %1609 = vrot.lane.b32.xlu2 %v1605_v18, %s3244_s26  ;;  %v1672_v33 = vsel %vm1671_vm3, %v2837_v17, %v1668_v19  ;;  %v1607_v5 = vmul.f32 2.0, %v1605_v18  ;;  %v1738_v61 = vsub.f32 1.0, %v1737_v60 }
 0x7bf   :  { %v1677_v8 = vsel %vm1674_vm4, %v1676_v51, %v1672_v33 }
 0x7c0   :  { %1681 = vrot.lane.b32.xlu1 %v1677_v8, %s3244_s26  ;;  %v2675_v35 = vadd.f32 -1.0, %v1607_v5  ;;  %v1679_v49 = vmul.f32 2.0, %v1677_v8  ;;  %v1739_v30 = vmul.f32 %v2839_v40, %v1738_v61 }
 0x7c2   :  { %1611 = vrot.lane.b32.xlu0 %v2675_v35, %s3245_s27  ;;  %v1740_v56 = vadd.f32 %v2839_v40, %v1739_v30  ;;  %v2677_v29 = vadd.f32 -1.0, %v1679_v49  ;;  %v1615_v35 = vmul.f32 %v1605_v18, %v5158_v39  ;;  %v1687_v49 = vmul.f32 %v1677_v8, %v5154_v16  ;;  %v3107_v16 = vld [vmem:[%s5786_s4 + $0xf8] sm:$0xff] }
 0x7c4   :  { %v1744_v19 = vsel %vm1743_vm7, %v2839_v40, %v1740_v56  ;;  %v1543_v40 = vmul.f32 %v5345_v24, %v5145_v2 }
 0x7c5   :  { %v1749_v17 = vsel %vm1746_vm8, %v1748_v28, %v1744_v19 }
 0x7c6   :  { %1683 = vrot.lane.b32.xlu2 %v2677_v29, %s3245_s27  ;;  %v1751_v51 = vmul.f32 2.0, %v1749_v17 }
 0x7c8   :  { %1753 = vrot.lane.b32.xlu1 %v1749_v17, %s3244_s26  ;;  %v2679_v20 = vadd.f32 -1.0, %v1751_v51 }
 0x7ca   :  { %1541 = vrot.lane.b32.xlu0 %v5345_v24, %s3243_s25 }
 0x7ce   :  { %1755 = vrot.lane.b32.xlu2 %v2679_v20, %s3245_s27  ;;  %v1759_v20 = vmul.f32 %v1749_v17, %v5169_v63 }
 0x7d0   :  { %1685 = vrot.lane.b32.xlu1 %v1677_v8, %s3243_s25 }
 0x7d2   :  { %1613 = vrot.lane.b32.xlu0 %v1605_v18, %s3243_s25  ;;  %v3108_v18 = vld [vmem:[%s5786_s4 + $0xf0] sm:$0xff] }
 0x7d6   :  { %1757 = vrot.lane.b32.xlu2 %v1749_v17, %s3243_s25 }
 0x817   :  { %v1538_v15 = vpop.permute.xlu0 %1537 }
 0x818   :  { %v1610_v1 = vpop.permute.xlu2 %1609 }
 0x81b   :  { %v1540_v54 = vpop.permute.xlu1 %1539 }
 0x81c   :  { %v1544_v0 = vmul.f32 %v1540_v54, %v1538_v15 }
 0x81e   :  { %v5365_v60 = vadd.f32 %v1544_v0, %v1543_v40  ;;  %v3110_v40 = vld [vmem:[%s5786_s4 + $0xe0] sm:$0xff] }
 0x820   :  { %v1684_v53 = vpop.permute.xlu2 %1683  ;;  %2840 = vtanh.f32 %v5365_v60 }
 0x826   :  { %v2841_v2 = vpop.eup %2840 }
 0x828   :  { %v1756_v28 = vpop.permute.xlu2 %1755 }
 0x832   :  { %v1682_v33 = vpop.permute.xlu1 %1681 }
 0x833   :  { %v1688_v14 = vmul.f32 %v1684_v53, %v1682_v33  ;;  %v3111_v53 = vld [vmem:[%s5786_s4 + $0xd8] sm:$0xff] }
 0x834   :  { %v1612_v5 = vpop.permute.xlu0 %1611 }
 0x835   :  { %v1616_v61 = vmul.f32 %v1612_v5, %v1610_v1  ;;  %v5372_v29 = vadd.f32 %v1688_v14, %v1687_v49  ;;  %v3109_v1 = vld [vmem:[%s5786_s4 + $0xe8] sm:$0xff]  ;;  %v3112_v5 = vld [vmem:[%s5786_s4 + $0xd0] sm:$0xff]  ;;  %v6150_v49 = vld [vmem:[#allocation42_spill] sm:$0xff] }
 0x837   :  { %v5370_v30 = vadd.f32 %v1616_v61, %v1615_v35  ;;  %v1758_v61 = vpop.permute.xlu2 %1757  ;;  %v3113_v35 = vld [vmem:[%s5786_s4 + $0xc8] sm:$0xff] }
 0x839   :  { %2842 = vtanh.f32 %v5370_v30 }
 0x83a   :  { %v1754_v56 = vpop.permute.xlu1 %1753  ;;  %2844 = vtanh.f32 %v5372_v29 }
 0x83b   :  { %v1760_v24 = vmul.f32 %v1756_v28, %v1754_v56  ;;  %v5465_v56 = vld [vmem:[#allocation5 + $0xf8] sm:$0xff]  ;;  %v6152_v28 = vld [vmem:[#allocation28_spill] sm:$0xff] }
 0x83c   :  { %v1542_v19 = vpop.permute.xlu0 %1541 }
 0x83d   :  { %v1547_v51 = vmul.f32 %v2841_v2, %v1542_v19  ;;  %v5377_v39 = vadd.f32 %v1760_v24, %v1759_v20  ;;  %v6153_v2 = vld [vmem:[#allocation40_spill] sm:$0xff]  ;;  %v6155_v19 = vld [vmem:[#allocation46_spill] sm:$0xff] }
 0x83e   :  { %v5471_v24 = vld [vmem:[#allocation5 + $0xf0] sm:$0xff]  ;;  %v6156_v20 = vld [vmem:[#allocation38_spill] sm:$0xff] }
 0x83f   :  { %1781 = vmatmul.f32.vlgmr.msrb.gmra.mxu3 %v1547_v51  ;;  %1834 = vmatmul.f32.vlgmr.msrb.gmra.mxu0 %v1547_v51  ;;  %v2843_v8 = vpop.eup %2842  ;;  %2846 = vtanh.f32 %v5377_v39  ;;  %v5477_v51 = vld [vmem:[#allocation5 + $0xe8] sm:$0xff] }
 0x840   :  { %2054 = vmatpush.msrb.mxu3 %v3107_v16  ;;  %2106 = vmatpush.msrb.mxu0 %v5180_v38  ;;  %v2845_v54 = vpop.eup %2844  ;;  %v6157_v16 = vld [vmem:[#allocation35_spill] sm:$0xff] }
 0x842   :  { %2055 = vmatpush.msrb.mxu3 %v3108_v18  ;;  %2107 = vmatpush.msrb.mxu0 %v5188_v37  ;;  %v1686_v63 = vpop.permute.xlu1 %1685  ;;  %v5483_v18 = vld [vmem:[#allocation5 + $0xe0] sm:$0xff] }
 0x843   :  { %v1691_v0 = vmul.f32 %v2845_v54, %v1686_v63  ;;  %v6158_v63 = vld [vmem:[#allocation51_spill] sm:$0xff] }
 0x844   :  { %v1614_v17 = vpop.permute.xlu0 %1613  ;;  %2056 = vmatpush.msrb.mxu3 %v3109_v1  ;;  %2108 = vmatpush.msrb.mxu0 %v5196_v7  ;;  %v6161_v1 = vld [vmem:[#allocation48_spill] sm:$0xff]  ;;  %v5500_v54 = vld [vmem:[#allocation5 + $0xc8] sm:$0xff] }
 0x845   :  { %v1619_v15 = vmul.f32 %v2843_v8, %v1614_v17  ;;  %v2847_v33 = vpop.eup %2846  ;;  %v6159_v8 = vld [vmem:[#allocation32_spill] sm:$0xff]  ;;  %v6160_v17 = vld [vmem:[#allocation43_spill] sm:$0xff] }
 0x846   :  { %2057 = vmatpush.msrb.mxu3 %v3110_v40  ;;  %2109 = vmatpush.msrb.mxu0 %v5204_v58  ;;  %v1763_v14 = vmul.f32 %v2847_v33, %v1758_v61  ;;  %v6163_v40 = vld [vmem:[#allocation52_spill] sm:$0xff] }
 0x847   :  { %1854 = vmatmul.f32.vlgmr.msra.gmra.mxu1 %v1619_v15  ;;  %1906 = vmatmul.f32.vlgmr.msra.gmra.mxu2 %v1619_v15  ;;  %v5569_v15 = vld [vmem:[%s5791_s9] ss:$0 sm:$0xff] }
 0x848   :  { %1926 = vmatmul.f32.vlgmr.msra.gmra.mxu3 %v1691_v0  ;;  %1978 = vmatmul.f32.vlgmr.msra.gmra.mxu0 %v1691_v0 }
 0x849   :  { %2058 = vmatpush.msrb.mxu3 %v3111_v53  ;;  %2126 = vmatpush.msra.mxu1 %v5183_v32 }
 0x84a   :  { %2178 = vmatpush.msra.mxu2 %v4949_v46  ;;  %2110 = vmatpush.msrb.mxu0 %v5212_v10  ;;  %v3114_v46 = vld [vmem:[%s5786_s4 + $0xc0] sm:$0xff] }
 0x84b   :  { %2059 = vmatpush.msrb.mxu3 %v3112_v5  ;;  %2127 = vmatpush.msra.mxu1 %v5191_v57 }
 0x84c   :  { %2179 = vmatpush.msra.mxu2 %v4957_v31  ;;  %2111 = vmatpush.msrb.mxu0 %v5220_v62  ;;  %v3115_v31 = vld [vmem:[%s5786_s4 + $0xb8] sm:$0xff] }
 0x84d   :  { %2060 = vmatpush.msrb.mxu3 %v3113_v35  ;;  %2128 = vmatpush.msra.mxu1 %v5199_v23 }
 0x84e   :  { %2180 = vmatpush.msra.mxu2 %v4965_v47  ;;  %2112 = vmatpush.msrb.mxu0 %v5230_v6  ;;  %v3116_v47 = vld [vmem:[%s5786_s4 + $0xb0] sm:$0xff] }
 0x84f   :  { %1998 = vmatmul.f32.vlgmr.msrb.gmra.mxu1 %v1763_v14  ;;  %2061 = vmatpush.msrb.mxu3 %v3114_v46 }
 0x850   :  { %2129 = vmatpush.msra.mxu1 %v5208_v4  ;;  %2181 = vmatpush.msra.mxu2 %v6112_v52  ;;  %v3117_v52 = vld [vmem:[%s5786_s4 + $0xa8] sm:$0xff] }
 0x851   :  { %2062 = vmatpush.msrb.mxu3 %v3115_v31  ;;  %2113 = vmatpush.msrb.mxu0 %v5238_v22 }
 0x852   :  { %2130 = vmatpush.msra.mxu1 %v5216_v43  ;;  %2182 = vmatpush.msra.mxu2 %v6114_v27  ;;  %v3118_v27 = vld [vmem:[%s5786_s4 + $0xa0] sm:$0xff] }
 0x853   :  { %2063 = vmatpush.msrb.mxu3 %v3116_v47  ;;  %2114 = vmatpush.msrb.mxu0 %v5246_v50 }
 0x854   :  { %2131 = vmatpush.msra.mxu1 %v5224_v21  ;;  %2183 = vmatpush.msra.mxu2 %v6116_v25  ;;  %v3119_v25 = vld [vmem:[%s5786_s4 + $0x98] sm:$0xff] }
 0x855   :  { %2064 = vmatpush.msrb.mxu3 %v3117_v52  ;;  %2115 = vmatpush.msrb.mxu0 %v5254_v45 }
 0x856   :  { %2132 = vmatpush.msra.mxu1 %v5234_v34  ;;  %2184 = vmatpush.msra.mxu2 %v6118_v55  ;;  %v3120_v55 = vld [vmem:[%s5786_s4 + $0x90] sm:$0xff] }
 0x857   :  { %2065 = vmatpush.msrb.mxu3 %v3118_v27  ;;  %2116 = vmatpush.msrb.mxu0 %v5262_v36 }
 0x858   :  { %2133 = vmatpush.msra.mxu1 %v5242_v26  ;;  %2185 = vmatpush.msra.mxu2 %v6121_v13  ;;  %v3121_v13 = vld [vmem:[%s5786_s4 + $0x88] sm:$0xff] }
 0x859   :  { %2066 = vmatpush.msrb.mxu3 %v3119_v25  ;;  %2117 = vmatpush.msrb.mxu0 %v5270_v12 }
 0x85a   :  { %2134 = vmatpush.msra.mxu1 %v5250_v48  ;;  %2186 = vmatpush.msra.mxu2 %v6124_v11  ;;  %v3122_v11 = vld [vmem:[%s5786_s4 + $0x80] sm:$0xff] }
 0x85b   :  { %2067 = vmatpush.msrb.mxu3 %v3120_v55  ;;  %2118 = vmatpush.msrb.mxu0 %v5278_v9 }
 0x85c   :  { %2135 = vmatpush.msra.mxu1 %v5258_v59  ;;  %2187 = vmatpush.msra.mxu2 %v6128_v44  ;;  %v6151_v44 = vld [vmem:[#allocation41_spill] sm:$0xff] }
 0x85d   :  { %2068 = vmatpush.msrb.mxu3 %v3121_v13  ;;  %2119 = vmatpush.msrb.mxu0 %v5286_v42 }
 0x85e   :  { %2136 = vmatpush.msra.mxu1 %v5266_v41  ;;  %2188 = vmatpush.msra.mxu2 %v6132_v3  ;;  %v6154_v3 = vld [vmem:[#allocation50_spill] sm:$0xff] }
 0x85f   :  { %2069 = vmatpush.msrb.mxu3 %v3122_v11  ;;  %2120 = vmatpush.msrb.mxu0 %v6150_v49 }
 0x860   :  { %2137 = vmatpush.msra.mxu1 %v6151_v44  ;;  %2189 = vmatpush.msra.mxu2 %v6152_v28 }
 0x861   :  { %2198 = vmatpush.msra.mxu3 %v5465_v56  ;;  %2121 = vmatpush.msrb.mxu0 %v6153_v2 }
 0x862   :  { %2138 = vmatpush.msra.mxu1 %v6154_v3  ;;  %2190 = vmatpush.msra.mxu2 %v6155_v19 }
 0x863   :  { %2199 = vmatpush.msra.mxu3 %v5471_v24  ;;  %2250 = vmatpush.msra.mxu0 %v5180_v38  ;;  %v5489_v38 = vld [vmem:[#allocation5 + $0xd8] sm:$0xff] }
 0x864   :  { %2139 = vmatpush.msra.mxu1 %v6156_v20  ;;  %2191 = vmatpush.msra.mxu2 %v6157_v16 }
 0x865   :  { %2200 = vmatpush.msra.mxu3 %v5477_v51  ;;  %2251 = vmatpush.msra.mxu0 %v5188_v37  ;;  %v5495_v37 = vld [vmem:[#allocation5 + $0xd0] sm:$0xff] }
 0x866   :  { %2140 = vmatpush.msra.mxu1 %v6158_v63  ;;  %2192 = vmatpush.msra.mxu2 %v6159_v8 }
 0x867   :  { %2201 = vmatpush.msra.mxu3 %v5483_v18  ;;  %2252 = vmatpush.msra.mxu0 %v5196_v7  ;;  %v5505_v7 = vld [vmem:[#allocation5 + $0xc0] sm:$0xff] }
 0x868   :  { %2141 = vmatpush.msra.mxu1 %v6160_v17  ;;  %2193 = vmatpush.msra.mxu2 %v6161_v1 }
 0x869   :  { %2202 = vmatpush.msra.mxu3 %v5489_v38  ;;  %2253 = vmatpush.msra.mxu0 %v5204_v58  ;;  %v5525_v58 = vld [vmem:[#allocation5 + $0xa0] sm:$0xff] }
 0x86a   :  { %2270 = vmatpush.msrb.mxu1 %v5183_v32  ;;  %v5510_v32 = vld [vmem:[#allocation5 + $0xb8] sm:$0xff] }
 0x86b   :  { %2203 = vmatpush.msra.mxu3 %v5495_v37  ;;  %2254 = vmatpush.msra.mxu0 %v5212_v10  ;;  %v5535_v10 = vld [vmem:[#allocation5 + $0x90] sm:$0xff] }
 0x86c   :  { %2271 = vmatpush.msrb.mxu1 %v5191_v57  ;;  %v5515_v57 = vld [vmem:[#allocation5 + $0xb0] sm:$0xff] }
 0x86d   :  { %2204 = vmatpush.msra.mxu3 %v5500_v54  ;;  %2255 = vmatpush.msra.mxu0 %v5220_v62  ;;  %v5545_v62 = vld [vmem:[#allocation5 + $0x80] sm:$0xff] }
 0x86e   :  { %2272 = vmatpush.msrb.mxu1 %v5199_v23  ;;  %v5520_v23 = vld [vmem:[#allocation5 + $0xa8] sm:$0xff] }
 0x86f   :  { %2205 = vmatpush.msra.mxu3 %v5505_v7  ;;  %2256 = vmatpush.msra.mxu0 %v5230_v6  ;;  %v3139_v6 = vld [vmem:[%s5785_s3] ss:$0 sm:$0xff] }
 0x870   :  { %2273 = vmatpush.msrb.mxu1 %v5208_v4  ;;  %v5530_v4 = vld [vmem:[#allocation5 + $0x98] sm:$0xff] }
 0x871   :  { %2206 = vmatpush.msra.mxu3 %v5510_v32  ;;  %2257 = vmatpush.msra.mxu0 %v5238_v22 }
 0x872   :  { %2274 = vmatpush.msrb.mxu1 %v5216_v43  ;;  %v5540_v43 = vld [vmem:[#allocation5 + $0x88] sm:$0xff] }
 0x873   :  { %2207 = vmatpush.msra.mxu3 %v5515_v57  ;;  %2258 = vmatpush.msra.mxu0 %v5246_v50  ;;  %v5563_v50 = vld [vmem:[%s5787_s5] ss:$0 sm:$0xff] }
 0x874   :  { %2275 = vmatpush.msrb.mxu1 %v5224_v21 }
 0x875   :  { %2208 = vmatpush.msra.mxu3 %v5520_v23  ;;  %2259 = vmatpush.msra.mxu0 %v5254_v45 }
 0x876   :  { %2276 = vmatpush.msrb.mxu1 %v5234_v34  ;;  %v6162_v34 = vld [vmem:[#allocation14_spill] sm:$0xff] }
 0x877   :  { %2209 = vmatpush.msra.mxu3 %v5525_v58  ;;  %2260 = vmatpush.msra.mxu0 %v5262_v36  ;;  %v172_v22 = vadd.f32 %v3139_v6, %v6162_v34 }
 0x878   :  { %2277 = vmatpush.msrb.mxu1 %v5242_v26 }
 0x879   :  { %2210 = vmatpush.msra.mxu3 %v5530_v4  ;;  %2261 = vmatpush.msra.mxu0 %v5270_v12 }
 0x87a   :  { %2278 = vmatpush.msrb.mxu1 %v5250_v48 }
 0x87b   :  { %2211 = vmatpush.msra.mxu3 %v5535_v10  ;;  %2262 = vmatpush.msra.mxu0 %v5278_v9 }
 0x87c   :  { %2279 = vmatpush.msrb.mxu1 %v5258_v59 }
 0x87d   :  { %2212 = vmatpush.msra.mxu3 %v5540_v43  ;;  %2263 = vmatpush.msra.mxu0 %v5286_v42 }
 0x87e   :  { %2280 = vmatpush.msrb.mxu1 %v5266_v41 }
 0x87f   :  { %2213 = vmatpush.msra.mxu3 %v5545_v62  ;;  %2264 = vmatpush.msra.mxu0 %v6150_v49 }
 0x880   :  { %2281 = vmatpush.msrb.mxu1 %v6151_v44 }
 0x881   :  { %2265 = vmatpush.msra.mxu0 %v6153_v2 }
 0x882   :  { %2282 = vmatpush.msrb.mxu1 %v6154_v3 }
 0x884   :  { %2283 = vmatpush.msrb.mxu1 %v6156_v20 }
 0x886   :  { %2284 = vmatpush.msrb.mxu1 %v6158_v63 }
 0x888   :  { %2285 = vmatpush.msrb.mxu1 %v6160_v17 }
 0x8bc   :  { %v1835_v21 = vpop.f32.mrf.mxu0 }
 0x8bd   :  { %v1836_v48 = vadd.f32 %v5563_v50, %v1835_v21 }
 0x8c2   :  { %v1782_v26 = vpop.f32.mrf.mxu3 }
 0x8c3   :  { %v1785_v45 = vadd.f32 %v1782_v26, %v172_v22 }
 0x8c4   :  { %v1855_v59 = vpop.f32.mrf.mxu1 }
 0x8c5   :  { %v2680_v36 = vmul.f32 -1.442695, %v1785_v45  ;;  %v1856_v41 = vadd.f32 %v1855_v59, %v1836_v48  ;;  %v1979_v9 = vpop.f32.mrf.mxu0 }
 0x8c6   :  { %v1980_v0 = vadd.f32 %v5569_v15, %v1979_v9 }
 0x8c7   :  { %2848 = vpow2.f32 %v2680_v36  ;;  %v2682_v12 = vmul.f32 -1.442695, %v1856_v41 }
 0x8c9   :  { %2850 = vpow2.f32 %v2682_v12 }
 0x8ca   :  { %v1907_v42 = vpop.f32.mrf.mxu2 }
 0x8cb   :  { %v1908_v53 = vadd.f32 %v6163_v40, %v1907_v42  ;;  %v1927_v33 = vpop.f32.mrf.mxu3 }
 0x8cc   :  { %v1999_v5 = vpop.f32.mrf.mxu1 }
 0x8cd   :  { %v2849_v61 = vpop.eup %2848  ;;  %v1928_v14 = vadd.f32 %v1927_v33, %v1908_v53  ;;  %v2000_v35 = vadd.f32 %v1999_v5, %v1980_v0 }
 0x8ce   :  { %v1789_v46 = vadd.f32 1.0, %v2849_v61 }
 0x8cf   :  { %v2851_v31 = vpop.eup %2850  ;;  %v2684_v47 = vmul.f32 -1.442695, %v1928_v14  ;;  %v2686_v52 = vmul.f32 -1.442695, %v2000_v35 }
 0x8d0   :  { %2852 = vrcp.f32 %v1789_v46  ;;  %v1861_v27 = vadd.f32 1.0, %v2851_v31  ;;  %v1801_v19 = vand.u32 2147483648, %v1789_v46  ;;  %v1799_v16 = vand.u32 2147483647, %v1789_v46 }
 0x8d1   :  { %2854 = vpow2.f32 %v2684_v47  ;;  %vm1795_vm10 = vweird.f32 %v1789_v46 }
 0x8d2   :  { %2856 = vrcp.f32 %v1861_v27  ;;  %v1873_v8 = vand.u32 2147483648, %v1861_v27  ;;  %v1871_v21 = vand.u32 2147483647, %v1861_v27  ;;  %v1802_v6 = vor.u32 1.1754944e-38, %v1801_v19 }
 0x8d3   :  { %2858 = vpow2.f32 %v2686_v52  ;;  %vm1800_vm13 = vcmp.eq.f32.partialorder %v1799_v16, 8.507059e+37  ;;  %vm1867_vm14 = vweird.f32 %v1861_v27 }
 0x8d4   :  { %v1874_v45 = vor.u32 1.1754944e-38, %v1873_v8  ;;  %vm1872_vm0 = vcmp.eq.f32.partialorder %v1871_v21, 8.507059e+37 }
 0x8d6   :  { %v2853_v25 = vpop.eup %2852 }
 0x8d7   :  { %v2855_v55 = vpop.eup %2854  ;;  %v1791_v13 = vmul.f32 %v2853_v25, %v1789_v46  ;;  %vm1796_vm9 = vweird.f32 %v2853_v25 }
 0x8d8   :  { %v2857_v11 = vpop.eup %2856  ;;  %v1933_v49 = vadd.f32 1.0, %v2855_v55  ;;  %vm1797_vm12 = vmor %vm1795_vm10, %vm1796_vm9 }
 0x8d9   :  { %v2859_v44 = vpop.eup %2858  ;;  %v1792_v28 = vsub.f32 1.0, %v1791_v13  ;;  %v1863_v2 = vmul.f32 %v2857_v11, %v1861_v27  ;;  %vm1868_vm11 = vweird.f32 %v2857_v11 }
 0x8da   :  { %2860 = vrcp.f32 %v1933_v49  ;;  %v2005_v3 = vadd.f32 1.0, %v2859_v44  ;;  %vm1869_vm15 = vmor %vm1867_vm14, %vm1868_vm11  ;;  %v1945_v5 = vand.u32 2147483648, %v1933_v49  ;;  %v1943_v14 = vand.u32 2147483647, %v1933_v49 }
 0x8db   :  { %v1793_v20 = vmul.f32 %v2853_v25, %v1792_v28  ;;  %v1864_v63 = vsub.f32 1.0, %v1863_v2  ;;  %vm1939_vm2 = vweird.f32 %v1933_v49 }
 0x8dc   :  { %2862 = vrcp.f32 %v2005_v3  ;;  %v2015_v46 = vand.u32 2147483647, %v2005_v3  ;;  %v2017_v31 = vand.u32 2147483648, %v2005_v3  ;;  %vm1944_vm5 = vcmp.eq.f32.partialorder %v1943_v14, 8.507059e+37 }
 0x8dd   :  { %v1794_v17 = vadd.f32 %v2853_v25, %v1793_v20  ;;  %v1865_v1 = vmul.f32 %v2857_v11, %v1864_v63  ;;  %vm2011_vm6 = vweird.f32 %v2005_v3 }
 0x8de   :  { %v2018_v44 = vor.u32 1.1754944e-38, %v2017_v31  ;;  %vm2016_vm8 = vcmp.eq.f32.partialorder %v2015_v46, 8.507059e+37  ;;  %v3145_v31 = vld [vmem:[#allocation5 + $0x60] sm:$0xff] }
 0x8df   :  { %v1798_v34 = vsel %vm1797_vm12, %v2853_v25, %v1794_v17  ;;  %v1866_v22 = vadd.f32 %v2857_v11, %v1865_v1  ;;  %v1946_v25 = vor.u32 1.1754944e-38, %v1945_v5  ;;  %v3143_v5 = vld [vmem:[#allocation5 + $0x70] sm:$0xff] }
 0x8e0   :  { %v2861_v26 = vpop.eup %2860  ;;  %v1803_v48 = vsel %vm1800_vm13, %v1802_v6, %v1798_v34 }
 0x8e1   :  { %1807 = vrot.lane.b32.xlu0 %v1803_v48, %s3244_s26  ;;  %v1870_v59 = vsel %vm1869_vm15, %v2857_v11, %v1866_v22  ;;  %v1805_v36 = vmul.f32 2.0, %v1803_v48  ;;  %v1935_v41 = vmul.f32 %v2861_v26, %v1933_v49  ;;  %vm1940_vm1 = vweird.f32 %v2861_v26 }
 0x8e2   :  { %v2863_v12 = vpop.eup %2862  ;;  %v1875_v9 = vsel %vm1872_vm0, %v1874_v45, %v1870_v59  ;;  %vm1941_vm4 = vmor %vm1939_vm2, %vm1940_vm1  ;;  %v1813_v1 = vmul.f32 %v1803_v48, %v5365_v60 }
 0x8e3   :  { %1879 = vrot.lane.b32.xlu2 %v1875_v9, %s3244_s26  ;;  %v2681_v42 = vadd.f32 -1.0, %v1805_v36  ;;  %v1877_v0 = vmul.f32 2.0, %v1875_v9  ;;  %v1936_v53 = vsub.f32 1.0, %v1935_v41  ;;  %v2007_v33 = vmul.f32 %v2863_v12, %v2005_v3 }
 0x8e4   :  { %vm2012_vm3 = vweird.f32 %v2863_v12 }
 0x8e5   :  { %1809 = vrot.lane.b32.xlu1 %v2681_v42, %s3245_s27  ;;  %v1937_v61 = vmul.f32 %v2861_v26, %v1936_v53  ;;  %v2008_v35 = vsub.f32 1.0, %v2007_v33  ;;  %v2683_v47 = vadd.f32 -1.0, %v1877_v0  ;;  %vm2013_vm7 = vmor %vm2011_vm6, %vm2012_vm3 }
 0x8e7   :  { %v1938_v52 = vadd.f32 %v2861_v26, %v1937_v61  ;;  %v2009_v27 = vmul.f32 %v2863_v12, %v2008_v35 }
 0x8e9   :  { %1881 = vrot.lane.b32.xlu0 %v2683_v47, %s3245_s27  ;;  %v1942_v55 = vsel %vm1941_vm4, %v2861_v26, %v1938_v52  ;;  %v2010_v13 = vadd.f32 %v2863_v12, %v2009_v27  ;;  %v1885_v26 = vmul.f32 %v1875_v9, %v5370_v30  ;;  %v3146_v52 = vld [vmem:[#allocation5 + $0x58] sm:$0xff] }
 0x8ea   :  { %v1947_v11 = vsel %vm1944_vm5, %v1946_v25, %v1942_v55  ;;  %v3147_v25 = vld [vmem:[#allocation5 + $0x50] sm:$0xff] }
 0x8eb   :  { %v1949_v28 = vmul.f32 2.0, %v1947_v11  ;;  %v2014_v2 = vsel %vm2013_vm7, %v2863_v12, %v2010_v13  ;;  %v1957_v42 = vmul.f32 %v1947_v11, %v5372_v29  ;;  %v3144_v29 = vld [vmem:[#allocation5 + $0x68] sm:$0xff] }
 0x8ec   :  { %v2019_v49 = vsel %vm2016_vm8, %v2018_v44, %v2014_v2  ;;  %v3148_v44 = vld [vmem:[#allocation5 + $0x48] sm:$0xff]  ;;  %v3150_v2 = vld [vmem:[#allocation5 + $0x38] sm:$0xff] }
 0x8ed   :  { %1951 = vrot.lane.b32.xlu1 %v1947_v11, %s3244_s26  ;;  %v2685_v19 = vadd.f32 -1.0, %v1949_v28  ;;  %v2021_v20 = vmul.f32 2.0, %v2019_v49  ;;  %v2029_v30 = vmul.f32 %v2019_v49, %v5377_v39  ;;  %v3149_v28 = vld [vmem:[#allocation5 + $0x40] sm:$0xff] }
 0x8ef   :  { %1953 = vrot.lane.b32.xlu2 %v2685_v19, %s3245_s27  ;;  %v2687_v16 = vadd.f32 -1.0, %v2021_v20  ;;  %v3153_v19 = vld [vmem:[#allocation5 + $0x20] sm:$0xff] }
 0x8f1   :  { %2023 = vrot.lane.b32.xlu0 %v2019_v49, %s3244_s26 }
 0x8f5   :  { %2025 = vrot.lane.b32.xlu1 %v2687_v16, %s3245_s27 }
 0x8f7   :  { %1811 = vrot.lane.b32.xlu2 %v1803_v48, %s3243_s25  ;;  %v3142_v48 = vld [vmem:[#allocation5 + $0x78] sm:$0xff] }
 0x8f9   :  { %1883 = vrot.lane.b32.xlu0 %v1875_v9, %s3243_s25 }
 0x8fd   :  { %1955 = vrot.lane.b32.xlu1 %v1947_v11, %s3243_s25 }
 0x8ff   :  { %2027 = vrot.lane.b32.xlu2 %v2019_v49, %s3243_s25  ;;  %v3151_v49 = vld [vmem:[#allocation5 + $0x30] sm:$0xff] }
 0x93d   :  { %v1880_v3 = vpop.permute.xlu2 %1879 }
 0x949   :  { %v1954_v17 = vpop.permute.xlu2 %1953 }
 0x951   :  { %v1812_v12 = vpop.permute.xlu2 %1811 }
 0x953   :  { %v1808_v63 = vpop.permute.xlu0 %1807 }
 0x957   :  { %v1810_v8 = vpop.permute.xlu1 %1809 }
 0x958   :  { %v1814_v21 = vmul.f32 %v1810_v8, %v1808_v63 }
 0x959   :  { %v2028_v13 = vpop.permute.xlu2 %2027 }
 0x95a   :  { %v1815_v6 = vadd.f32 %v1814_v21, %v1813_v1 }
 0x95b   :  { %v1882_v34 = vpop.permute.xlu0 %1881 }
 0x95c   :  { %2864 = vtanh.f32 %v1815_v6  ;;  %v1886_v22 = vmul.f32 %v1882_v34, %v1880_v3 }
 0x95e   :  { %v5587_v59 = vadd.f32 %v1886_v22, %v1885_v26 }
 0x95f   :  { %v1952_v45 = vpop.permute.xlu1 %1951 }
 0x960   :  { %v1958_v36 = vmul.f32 %v1954_v17, %v1952_v45  ;;  %2866 = vtanh.f32 %v5587_v59 }
 0x962   :  { %v2865_v41 = vpop.eup %2864  ;;  %v5591_v60 = vadd.f32 %v1958_v36, %v1957_v42 }
 0x963   :  { %v2024_v0 = vpop.permute.xlu0 %2023  ;;  %v1817_v53 = vmul.f32 %v2865_v41, %v1812_v12 }
 0x964   :  { %2868 = vtanh.f32 %v5591_v60 }
 0x965   :  { %2050 = vmatmul.f32.vlgmr.msrb.gmra.mxu2 %v1817_v53 }
 0x966   :  { %2322 = vmatpush.msrb.mxu2 %v3142_v48  ;;  %v2867_v14 = vpop.eup %2866 }
 0x967   :  { %v2026_v33 = vpop.permute.xlu1 %2025 }
 0x968   :  { %v2030_v9 = vmul.f32 %v2026_v33, %v2024_v0  ;;  %2323 = vmatpush.msrb.mxu2 %v3143_v5 }
 0x96a   :  { %v5595_v61 = vadd.f32 %v2030_v9, %v2029_v30  ;;  %2324 = vmatpush.msrb.mxu2 %v3144_v29  ;;  %v2869_v47 = vpop.eup %2868 }
 0x96b   :  { %v1884_v35 = vpop.permute.xlu0 %1883 }
 0x96c   :  { %2870 = vtanh.f32 %v5595_v61  ;;  %v1889_v46 = vmul.f32 %v2867_v14, %v1884_v35  ;;  %2325 = vmatpush.msrb.mxu2 %v3145_v31 }
 0x96e   :  { %2070 = vmatmul.f32.vlgmr.msrb.gmra.mxu3 %v1889_v46  ;;  %2122 = vmatmul.f32.vlgmr.msrb.gmra.mxu0 %v1889_v46 }
 0x96f   :  { %v1956_v39 = vpop.permute.xlu1 %1955  ;;  %2342 = vmatpush.msrb.mxu3 %v5465_v56  ;;  %2326 = vmatpush.msrb.mxu2 %v3146_v52 }
 0x970   :  { %v1961_v27 = vmul.f32 %v2869_v47, %v1956_v39  ;;  %2394 = vmatpush.msrb.mxu0 %v3142_v48 }
 0x971   :  { %2343 = vmatpush.msrb.mxu3 %v5471_v24  ;;  %2327 = vmatpush.msrb.mxu2 %v3147_v25 }
 0x972   :  { %v2871_v55 = vpop.eup %2870  ;;  %2142 = vmatmul.f32.vlgmr.msra.gmra.mxu1 %v1961_v27  ;;  %2194 = vmatmul.f32.vlgmr.msra.gmra.mxu2 %v1961_v27 }
 0x973   :  { %v2033_v11 = vmul.f32 %v2871_v55, %v2028_v13  ;;  %2344 = vmatpush.msrb.mxu3 %v5477_v51  ;;  %2328 = vmatpush.msrb.mxu2 %v3148_v44 }
 0x974   :  { %2395 = vmatpush.msrb.mxu0 %v3143_v5  ;;  %2414 = vmatpush.msra.mxu1 %v5465_v56  ;;  %v3152_v56 = vld [vmem:[#allocation5 + $0x28] sm:$0xff] }
 0x975   :  { %2345 = vmatpush.msrb.mxu3 %v5483_v18  ;;  %2329 = vmatpush.msrb.mxu2 %v3149_v28 }
 0x976   :  { %2214 = vmatmul.f32.vlgmr.msra.gmra.mxu3 %v2033_v11  ;;  %2396 = vmatpush.msrb.mxu0 %v3144_v29 }
 0x977   :  { %2346 = vmatpush.msrb.mxu3 %v5489_v38  ;;  %2330 = vmatpush.msrb.mxu2 %v3150_v2 }
 0x978   :  { %2397 = vmatpush.msrb.mxu0 %v3145_v31  ;;  %2415 = vmatpush.msra.mxu1 %v5471_v24  ;;  %v3154_v24 = vld [vmem:[#allocation5 + $0x18] sm:$0xff] }
 0x979   :  { %2347 = vmatpush.msrb.mxu3 %v5495_v37  ;;  %2331 = vmatpush.msrb.mxu2 %v3151_v49 }
 0x97a   :  { %2398 = vmatpush.msrb.mxu0 %v3146_v52  ;;  %2416 = vmatpush.msra.mxu1 %v5477_v51  ;;  %v3155_v51 = vld [vmem:[#allocation5 + $0x10] sm:$0xff] }
 0x97b   :  { %2348 = vmatpush.msrb.mxu3 %v5500_v54  ;;  %2332 = vmatpush.msrb.mxu2 %v3152_v56 }
 0x97c   :  { %2399 = vmatpush.msrb.mxu0 %v3147_v25  ;;  %2417 = vmatpush.msra.mxu1 %v5483_v18  ;;  %v3156_v18 = vld [vmem:[#allocation5 + $0x8] sm:$0xff] }
 0x97d   :  { %2349 = vmatpush.msrb.mxu3 %v5505_v7  ;;  %2333 = vmatpush.msrb.mxu2 %v3153_v19 }
 0x97e   :  { %2400 = vmatpush.msrb.mxu0 %v3148_v44  ;;  %2418 = vmatpush.msra.mxu1 %v5489_v38  ;;  %v3157_v38 = vld [vmem:[#allocation5] sm:$0xff] }
 0x97f   :  { %2350 = vmatpush.msrb.mxu3 %v5510_v32  ;;  %2334 = vmatpush.msrb.mxu2 %v3154_v24 }
 0x980   :  { %2401 = vmatpush.msrb.mxu0 %v3149_v28  ;;  %2419 = vmatpush.msra.mxu1 %v5495_v37 }
 0x981   :  { %2351 = vmatpush.msrb.mxu3 %v5515_v57  ;;  %2335 = vmatpush.msrb.mxu2 %v3155_v51 }
 0x982   :  { %2402 = vmatpush.msrb.mxu0 %v3150_v2  ;;  %2420 = vmatpush.msra.mxu1 %v5500_v54 }
 0x983   :  { %2352 = vmatpush.msrb.mxu3 %v5520_v23  ;;  %2336 = vmatpush.msrb.mxu2 %v3156_v18 }
 0x984   :  { %2403 = vmatpush.msrb.mxu0 %v3151_v49  ;;  %2421 = vmatpush.msra.mxu1 %v5505_v7 }
 0x985   :  { %2353 = vmatpush.msrb.mxu3 %v5525_v58  ;;  %2337 = vmatpush.msrb.mxu2 %v3157_v38 }
 0x986   :  { %2404 = vmatpush.msrb.mxu0 %v3152_v56  ;;  %2422 = vmatpush.msra.mxu1 %v5510_v32 }
 0x987   :  { %2354 = vmatpush.msrb.mxu3 %v5530_v4 }
 0x988   :  { %2405 = vmatpush.msrb.mxu0 %v3153_v19  ;;  %2423 = vmatpush.msra.mxu1 %v5515_v57 }
 0x989   :  { %2355 = vmatpush.msrb.mxu3 %v5535_v10 }
 0x98a   :  { %2406 = vmatpush.msrb.mxu0 %v3154_v24  ;;  %2424 = vmatpush.msra.mxu1 %v5520_v23 }
 0x98b   :  { %2356 = vmatpush.msrb.mxu3 %v5540_v43 }
 0x98c   :  { %2407 = vmatpush.msrb.mxu0 %v3155_v51  ;;  %2425 = vmatpush.msra.mxu1 %v5525_v58 }
 0x98d   :  { %2357 = vmatpush.msrb.mxu3 %v5545_v62 }
 0x98e   :  { %2408 = vmatpush.msrb.mxu0 %v3156_v18  ;;  %2426 = vmatpush.msra.mxu1 %v5530_v4 }
 0x990   :  { %2409 = vmatpush.msrb.mxu0 %v3157_v38  ;;  %2427 = vmatpush.msra.mxu1 %v5535_v10 }
 0x992   :  { %2428 = vmatpush.msra.mxu1 %v5540_v43 }
 0x994   :  { %2429 = vmatpush.msra.mxu1 %v5545_v62 }
 0x9e8   :  { %v2051_v54 = vpop.f32.mrf.mxu2 }
 0x9e9   :  { %v2052_v57 = vadd.f32 %v5563_v50, %v2051_v54 }
 0x9eb   :  { %v2123_v37 = vpop.f32.mrf.mxu0 }
 0x9ec   :  { %v2124_v7 = vadd.f32 %v6163_v40, %v2123_v37 }
 0x9ef   :  { %v2143_v32 = vpop.f32.mrf.mxu1 }
 0x9f0   :  { %v2144_v23 = vadd.f32 %v2143_v32, %v2124_v7 }
 0x9f1   :  { %v2071_v58 = vpop.f32.mrf.mxu3 }
 0x9f2   :  { %v2690_v20 = vmul.f32 -1.442695, %v2144_v23  ;;  %v2072_v16 = vadd.f32 %v2071_v58, %v2052_v57 }
 0x9f4   :  { %2872 = vpow2.f32 %v2690_v20  ;;  %v2688_v4 = vmul.f32 -1.442695, %v2072_v16 }
 0x9f5   :  { %v2195_v3 = vpop.f32.mrf.mxu2 }
 0x9f6   :  { %2874 = vpow2.f32 %v2688_v4  ;;  %v2196_v10 = vadd.f32 %v5569_v15, %v2195_v3 }
 0x9f9   :  { %v2215_v43 = vpop.f32.mrf.mxu3 }
 0x9fa   :  { %v2873_v63 = vpop.eup %2872  ;;  %v2216_v62 = vadd.f32 %v2215_v43, %v2196_v10 }
 0x9fb   :  { %v2149_v8 = vadd.f32 1.0, %v2873_v63 }
 0x9fc   :  { %v2875_v17 = vpop.eup %2874  ;;  %v2692_v1 = vmul.f32 -1.442695, %v2216_v62 }
 0x9fd   :  { %2876 = vrcp.f32 %v2149_v8  ;;  %v2077_v40 = vadd.f32 1.0, %v2875_v17  ;;  %v2161_v36 = vand.u32 2147483648, %v2149_v8  ;;  %v2159_v12 = vand.u32 2147483647, %v2149_v8 }
 0x9fe   :  { %2878 = vpow2.f32 %v2692_v1  ;;  %vm2155_vm10 = vweird.f32 %v2149_v8 }
 0x9ff   :  { %2880 = vrcp.f32 %v2077_v40  ;;  %v2162_v53 = vor.u32 1.1754944e-38, %v2161_v36  ;;  %vm2160_vm12 = vcmp.eq.f32.partialorder %v2159_v12, 8.507059e+37  ;;  %vm2083_vm14 = vweird.f32 %v2077_v40 }
 0xa00   :  { %v2089_v47 = vand.u32 2147483648, %v2077_v40  ;;  %v2087_v27 = vand.u32 2147483647, %v2077_v40 }
 0xa02   :  { %v2090_v11 = vor.u32 1.1754944e-38, %v2089_v47  ;;  %vm2088_vm4 = vcmp.eq.f32.partialorder %v2087_v27, 8.507059e+37 }
 0xa03   :  { %v2877_v50 = vpop.eup %2876 }
 0xa04   :  { %v2879_v21 = vpop.eup %2878  ;;  %v2151_v6 = vmul.f32 %v2877_v50, %v2149_v8  ;;  %vm2156_vm9 = vweird.f32 %v2877_v50 }
 0xa05   :  { %v2881_v34 = vpop.eup %2880  ;;  %v2221_v22 = vadd.f32 1.0, %v2879_v21  ;;  %vm2157_vm11 = vmor %vm2155_vm10, %vm2156_vm9 }
 0xa06   :  { %v2152_v26 = vsub.f32 1.0, %v2151_v6  ;;  %v2079_v45 = vmul.f32 %v2881_v34, %v2077_v40  ;;  %vm2084_vm13 = vweird.f32 %v2881_v34 }
 0xa07   :  { %2882 = vrcp.f32 %v2221_v22  ;;  %v2233_v31 = vand.u32 2147483648, %v2221_v22  ;;  %v2231_v52 = vand.u32 2147483647, %v2221_v22  ;;  %vm2085_vm0 = vmor %vm2083_vm14, %vm2084_vm13  ;;  %vm2227_vm1 = vweird.f32 %v2221_v22 }
 0xa08   :  { %v2153_v41 = vmul.f32 %v2877_v50, %v2152_v26  ;;  %v2080_v42 = vsub.f32 1.0, %v2079_v45 }
 0xa09   :  { %v2234_v13 = vor.u32 1.1754944e-38, %v2233_v31  ;;  %vm2232_vm3 = vcmp.eq.f32.partialorder %v2231_v52, 8.507059e+37 }
 0xa0a   :  { %v2154_v0 = vadd.f32 %v2877_v50, %v2153_v41  ;;  %v2081_v33 = vmul.f32 %v2881_v34, %v2080_v42 }
 0xa0c   :  { %v2158_v48 = vsel %vm2157_vm11, %v2877_v50, %v2154_v0  ;;  %v2082_v46 = vadd.f32 %v2881_v34, %v2081_v33  ;;  %v3158_v50 = vld [vmem:[%s5789_s7] ss:$0 sm:$0xff] }
 0xa0d   :  { %v2883_v30 = vpop.eup %2882  ;;  %v2163_v9 = vsel %vm2160_vm12, %v2162_v53, %v2158_v48 }
 0xa0e   :  { %2167 = vrot.lane.b32.xlu0 %v2163_v9, %s3244_s26  ;;  %v2165_v5 = vmul.f32 2.0, %v2163_v9  ;;  %v2223_v29 = vmul.f32 %v2883_v30, %v2221_v22  ;;  %vm2228_vm15 = vweird.f32 %v2883_v30  ;;  %v2086_v55 = vsel %vm2085_vm0, %v2881_v34, %v2082_v46 }
 0xa0f   :  { %vm2229_vm2 = vmor %vm2227_vm1, %vm2228_vm15  ;;  %v2091_v2 = vsel %vm2088_vm4, %v2090_v11, %v2086_v55  ;;  %v2173_v54 = vmul.f32 %v2163_v9, %v5591_v60  ;;  %vm2620_vm1 = vcmask 80896  }
 0xa10   :  { %v2691_v14 = vadd.f32 -1.0, %v2165_v5  ;;  %v2224_v35 = vsub.f32 1.0, %v2223_v29  ;;  %v2093_v19 = vmul.f32 2.0, %v2091_v2  ;;  %v2101_v23 = vmul.f32 %v2091_v2, %v5587_v59 }
 0xa12   :  { %2169 = vrot.lane.b32.xlu1 %v2691_v14, %s3245_s27  ;;  %v2225_v39 = vmul.f32 %v2883_v30, %v2224_v35  ;;  %v2689_v24 = vadd.f32 -1.0, %v2093_v19 }
 0xa14   :  { %v2226_v25 = vadd.f32 %v2883_v30, %v2225_v39 }
 0xa16   :  { %v2230_v44 = vsel %vm2229_vm2, %v2883_v30, %v2226_v25 }
 0xa17   :  { %v2235_v28 = vsel %vm2232_vm3, %v2234_v13, %v2230_v44 }
 0xa18   :  { %2239 = vrot.lane.b32.xlu2 %v2235_v28, %s3244_s26  ;;  %v2237_v49 = vmul.f32 2.0, %v2235_v28  ;;  %v2245_v4 = vmul.f32 %v2235_v28, %v5595_v61 }
 0xa1a   :  { %2095 = vrot.lane.b32.xlu1 %v2091_v2, %s3244_s26  ;;  %v2693_v56 = vadd.f32 -1.0, %v2237_v49 }
 0xa1c   :  { %2241 = vrot.lane.b32.xlu0 %v2693_v56, %s3245_s27 }
 0xa20   :  { %2097 = vrot.lane.b32.xlu2 %v2689_v24, %s3245_s27 }
 0xa22   :  { %2243 = vrot.lane.b32.xlu1 %v2235_v28, %s3243_s25 }
 0xa24   :  { %2171 = vrot.lane.b32.xlu0 %v2163_v9, %s3243_s25 }
 0xa28   :  { %2099 = vrot.lane.b32.xlu2 %v2091_v2, %s3243_s25 }
 0xa72   :  { %v2240_v51 = vpop.permute.xlu2 %2239 }
 0xa7a   :  { %v2098_v7 = vpop.permute.xlu2 %2097 }
 0xa80   :  { %v2168_v38 = vpop.permute.xlu0 %2167 }
 0xa82   :  { %v2100_v62 = vpop.permute.xlu2 %2099 }
 0xa84   :  { %v2170_v18 = vpop.permute.xlu1 %2169 }
 0xa85   :  { %v2174_v37 = vmul.f32 %v2170_v18, %v2168_v38 }
 0xa87   :  { %v5643_v32 = vadd.f32 %v2174_v37, %v2173_v54 }
 0xa89   :  { %2884 = vtanh.f32 %v5643_v32 }
 0xa8c   :  { %v2096_v57 = vpop.permute.xlu1 %2095 }
 0xa8d   :  { %v2102_v58 = vmul.f32 %v2098_v7, %v2096_v57 }
 0xa8e   :  { %v2242_v20 = vpop.permute.xlu0 %2241 }
 0xa8f   :  { %v2103_v16 = vadd.f32 %v2102_v58, %v2101_v23  ;;  %v2246_v3 = vmul.f32 %v2242_v20, %v2240_v51  ;;  %v2885_v60 = vpop.eup %2884 }
 0xa91   :  { %2886 = vtanh.f32 %v2103_v16  ;;  %v5648_v10 = vadd.f32 %v2246_v3, %v2245_v4 }
 0xa93   :  { %2888 = vtanh.f32 %v5648_v10 }
 0xa94   :  { %v2244_v1 = vpop.permute.xlu1 %2243 }
 0xa96   :  { %v2172_v43 = vpop.permute.xlu0 %2171 }
 0xa97   :  { %v2887_v63 = vpop.eup %2886  ;;  %v2177_v8 = vmul.f32 %v2885_v60, %v2172_v43 }
 0xa98   :  { %v2105_v17 = vmul.f32 %v2887_v63, %v2100_v62 }
 0xa99   :  { %v2889_v59 = vpop.eup %2888  ;;  %2286 = vmatmul.f32.vlgmr.msrb.gmra.mxu1 %v2177_v8  ;;  %2338 = vmatmul.f32.vlgmr.msrb.gmra.mxu2 %v2177_v8 }
 0xa9a   :  { %v2249_v40 = vmul.f32 %v2889_v59, %v2244_v1  ;;  %2266 = vmatmul.f32.vlgmr.msra.gmra.mxu0 %v2105_v17 }
 0xa9c   :  { %2358 = vmatmul.f32.vlgmr.msrb.gmra.mxu3 %v2249_v40 }
 0xb16   :  { %v2287_v6 = vpop.f32.mrf.mxu1 }
 0xb17   :  { %v2267_v61 = vpop.f32.mrf.mxu0 }
 0xb18   :  { %v2268_v21 = vadd.f32 %v3158_v50, %v2267_v61 }
 0xb1a   :  { %v2288_v34 = vadd.f32 %v2287_v6, %v2268_v21 }
 0xb1c   :  { %v2694_v22 = vmul.f32 -1.442695, %v2288_v34  ;;  %v2339_v26 = vpop.f32.mrf.mxu2 }
 0xb1d   :  { %v2340_v45 = vadd.f32 %v5569_v15, %v2339_v26 }
 0xb1e   :  { %2890 = vpow2.f32 %v2694_v22 }
 0xb1f   :  { %v2359_v36 = vpop.f32.mrf.mxu3 }
 0xb20   :  { %v2360_v41 = vadd.f32 %v2359_v36, %v2340_v45 }
 0xb22   :  { %v2696_v12 = vmul.f32 -1.442695, %v2360_v41 }
 0xb24   :  { %v2891_v42 = vpop.eup %2890  ;;  %2892 = vpow2.f32 %v2696_v12  ;;  %v2496_v12 = vld [vmem:[#allocation7 + $0xf0] sm:$0xff] }
 0xb25   :  { %v2293_v0 = vadd.f32 1.0, %v2891_v42  ;;  %v2497_v42 = vld [vmem:[#allocation7 + $0xf8] sm:$0xff]  ;;  %2504 = vmatpush.msra.mxu2 %v2496_v12  ;;  %v2562_v12 = vld [vmem:[%s5794_s12 + $0x90] sm:$0xff] }
 0xb26   :  { %2524 = vmatpush.msra.mxu3 %v2497_v42 }
 0xb27   :  { %2894 = vrcp.f32 %v2293_v0  ;;  %v2305_v5 = vand.u32 2147483648, %v2293_v0  ;;  %v2303_v14 = vand.u32 2147483647, %v2293_v0  ;;  %vm2299_vm6 = vweird.f32 %v2293_v0 }
 0xb29   :  { %v2306_v47 = vor.u32 1.1754944e-38, %v2305_v5  ;;  %vm2304_vm8 = vcmp.eq.f32.partialorder %v2303_v14, 8.507059e+37  ;;  %v2488_v5 = vld [vmem:[#allocation7 + $0xb0] sm:$0xff]  ;;  %v2486_v14 = vld [vmem:[#allocation7 + $0xa0] sm:$0xff] }
 0xb2a   :  { %v2893_v53 = vpop.eup %2892 }
 0xb2b   :  { %v2365_v48 = vadd.f32 1.0, %v2893_v53  ;;  %v2495_v53 = vld [vmem:[#allocation7 + $0xe8] sm:$0xff] }
 0xb2c   :  { %2525 = vmatpush.msra.mxu3 %v2495_v53 }
 0xb2d   :  { %v2895_v33 = vpop.eup %2894  ;;  %2896 = vrcp.f32 %v2365_v48  ;;  %v2377_v25 = vand.u32 2147483648, %v2365_v48  ;;  %v2375_v11 = vand.u32 2147483647, %v2365_v48  ;;  %vm2371_vm10 = vweird.f32 %v2365_v48 }
 0xb2e   :  { %v2295_v30 = vmul.f32 %v2895_v33, %v2293_v0  ;;  %vm2300_vm5 = vweird.f32 %v2895_v33  ;;  %v2494_v0 = vld [vmem:[#allocation7 + $0xe0] sm:$0xff] }
 0xb2f   :  { %vm2301_vm7 = vmor %vm2299_vm6, %vm2300_vm5  ;;  %v2378_v2 = vor.u32 1.1754944e-38, %v2377_v25  ;;  %vm2376_vm12 = vcmp.eq.f32.partialorder %v2375_v11, 8.507059e+37  ;;  %2505 = vmatpush.msra.mxu2 %v2494_v0  ;;  %v2478_v25 = vld [vmem:[#allocation7 + $0x60] sm:$0xff]  ;;  %v2477_v11 = vld [vmem:[#allocation7 + $0x58] sm:$0xff] }
 0xb30   :  { %v2296_v9 = vsub.f32 1.0, %v2295_v30  ;;  %v2490_v30 = vld [vmem:[#allocation7 + $0xc0] sm:$0xff] }
 0xb32   :  { %v2297_v29 = vmul.f32 %v2895_v33, %v2296_v9  ;;  %v2491_v9 = vld [vmem:[#allocation7 + $0xc8] sm:$0xff] }
 0xb33   :  { %v2897_v35 = vpop.eup %2896 }
 0xb34   :  { %v2298_v46 = vadd.f32 %v2895_v33, %v2297_v29  ;;  %v2367_v31 = vmul.f32 %v2897_v35, %v2365_v48  ;;  %vm2372_vm9 = vweird.f32 %v2897_v35  ;;  %v2492_v48 = vld [vmem:[#allocation7 + $0xd0] sm:$0xff]  ;;  %v2489_v29 = vld [vmem:[#allocation7 + $0xb8] sm:$0xff] }
 0xb35   :  { %vm2373_vm11 = vmor %vm2371_vm10, %vm2372_vm9  ;;  %2506 = vmatpush.msra.mxu2 %v2492_v48  ;;  %v2545_v48 = vld [vmem:[%s5794_s12 + $0x8] sm:$0xff] }
 0xb36   :  { %v2302_v39 = vsel %vm2301_vm7, %v2895_v33, %v2298_v46  ;;  %v2368_v52 = vsub.f32 1.0, %v2367_v31  ;;  %v2493_v33 = vld [vmem:[#allocation7 + $0xd8] sm:$0xff]  ;;  %v2484_v46 = vld [vmem:[#allocation7 + $0x90] sm:$0xff] }
 0xb37   :  { %v2307_v27 = vsel %vm2304_vm8, %v2306_v47, %v2302_v39  ;;  %2526 = vmatpush.msra.mxu3 %v2493_v33  ;;  %2507 = vmatpush.msra.mxu2 %v2490_v30  ;;  %v2485_v31 = vld [vmem:[#allocation7 + $0x98] sm:$0xff]  ;;  %v2482_v47 = vld [vmem:[#allocation7 + $0x80] sm:$0xff]  ;;  %v2483_v39 = vld [vmem:[#allocation7 + $0x88] sm:$0xff] }
 0xb38   :  { %2311 = vrot.lane.b32.xlu0 %v2307_v27, %s3244_s26  ;;  %v2309_v55 = vmul.f32 2.0, %v2307_v27  ;;  %v2369_v13 = vmul.f32 %v2897_v35, %v2368_v52  ;;  %v2317_v38 = vmul.f32 %v2307_v27, %v5643_v32  ;;  %v2480_v52 = vld [vmem:[#allocation7 + $0x70] sm:$0xff]  ;;  %v2561_v33 = vld [vmem:[%s5794_s12 + $0x88] sm:$0xff]  ;;  %v2544_v30 = vld [vmem:[%s5794_s12] sm:$0xff] }
 0xb39   :  { %2527 = vmatpush.msra.mxu3 %v2491_v9  ;;  %2508 = vmatpush.msra.mxu2 %v2488_v5  ;;  %v2560_v9 = vld [vmem:[%s5794_s12 + $0x80] sm:$0xff] }
 0xb3a   :  { %v2695_v44 = vadd.f32 -1.0, %v2309_v55  ;;  %v2370_v28 = vadd.f32 %v2897_v35, %v2369_v13  ;;  %v2479_v55 = vld [vmem:[#allocation7 + $0x68] sm:$0xff]  ;;  %v2476_v13 = vld [vmem:[#allocation7 + $0x50] sm:$0xff]  ;;  %v2498_v5 = vld [vmem:[%s5793_s11] sm:$0x3] }
 0xb3b   :  { %2528 = vmatpush.msra.mxu3 %v2489_v29  ;;  %2509 = vmatpush.msra.mxu2 %v2486_v14  ;;  %v2500_v29 = vperm.slane %v2498_v5, 0  ;;  %v2501_v14 = vperm.slane %v2498_v5, 1 }
 0xb3c   :  { %2313 = vrot.lane.b32.xlu1 %v2695_v44, %s3245_s27  ;;  %v2374_v49 = vsel %vm2373_vm11, %v2897_v35, %v2370_v28  ;;  %v2487_v35 = vld [vmem:[#allocation7 + $0xa8] sm:$0xff]  ;;  %v2474_v44 = vld [vmem:[#allocation7 + $0x40] sm:$0xff] }
 0xb3d   :  { %v2379_v56 = vsel %vm2376_vm12, %v2378_v2, %v2374_v49  ;;  %2529 = vmatpush.msra.mxu3 %v2487_v35  ;;  %2510 = vmatpush.msra.mxu2 %v2484_v46  ;;  %v2475_v28 = vld [vmem:[#allocation7 + $0x48] sm:$0xff]  ;;  %v2472_v2 = vld [vmem:[#allocation7 + $0x30] sm:$0xff]  ;;  %v2473_v49 = vld [vmem:[#allocation7 + $0x38] sm:$0xff] }
 0xb3e   :  { %2383 = vrot.lane.b32.xlu2 %v2379_v56, %s3244_s26  ;;  %v2381_v19 = vmul.f32 2.0, %v2379_v56  ;;  %v2389_v23 = vmul.f32 %v2379_v56, %v5648_v10 }
 0xb3f   :  { %2530 = vmatpush.msra.mxu3 %v2485_v31  ;;  %2511 = vmatpush.msra.mxu2 %v2482_v47 }
 0xb40   :  { %v2697_v24 = vadd.f32 -1.0, %v2381_v19  ;;  %v2471_v19 = vld [vmem:[#allocation7 + $0x28] sm:$0xff] }
 0xb41   :  { %2531 = vmatpush.msra.mxu3 %v2483_v39  ;;  %2512 = vmatpush.msra.mxu2 %v2480_v52  ;;  %v2715_v39 = vld [vmem:[%s5795_s13] ss:$0 sm:$0xff] }
 0xb42   :  { %2385 = vrot.lane.b32.xlu0 %v2697_v24, %s3245_s27  ;;  %v2468_v24 = vld [vmem:[#allocation7 + $0x10] sm:$0xff] }
 0xb43   :  { %2513 = vmatpush.msra.mxu2 %v2478_v25 }
 0xb44   :  { %2315 = vrot.lane.b32.xlu1 %v2307_v27, %s3243_s25  ;;  %v2481_v27 = vld [vmem:[#allocation7 + $0x78] sm:$0xff] }
 0xb45   :  { %2532 = vmatpush.msra.mxu3 %v2481_v27  ;;  %2514 = vmatpush.msra.mxu2 %v2476_v13 }
 0xb46   :  { %2387 = vrot.lane.b32.xlu2 %v2379_v56, %s3243_s25  ;;  %v2470_v56 = vld [vmem:[#allocation7 + $0x20] sm:$0xff] }
 0xb47   :  { %2533 = vmatpush.msra.mxu3 %v2479_v55  ;;  %2515 = vmatpush.msra.mxu2 %v2474_v44 }
 0xb49   :  { %2534 = vmatpush.msra.mxu3 %v2477_v11  ;;  %2516 = vmatpush.msra.mxu2 %v2472_v2 }
 0xb4b   :  { %2535 = vmatpush.msra.mxu3 %v2475_v28  ;;  %2517 = vmatpush.msra.mxu2 %v2470_v56 }
 0xb4d   :  { %2536 = vmatpush.msra.mxu3 %v2473_v49  ;;  %2518 = vmatpush.msra.mxu2 %v2468_v24 }
 0xb4f   :  { %2537 = vmatpush.msra.mxu3 %v2471_v19 }
 0xb98   :  { %v2384_v7 = vpop.permute.xlu2 %2383 }
 0xba0   :  { %v2388_v43 = vpop.permute.xlu2 %2387 }
 0xbaa   :  { %v2312_v51 = vpop.permute.xlu0 %2311 }
 0xbae   :  { %v2314_v18 = vpop.permute.xlu1 %2313 }
 0xbaf   :  { %v2318_v37 = vmul.f32 %v2314_v18, %v2312_v51  ;;  %v2469_v51 = vld [vmem:[#allocation7 + $0x18] sm:$0xff]  ;;  %v2466_v18 = vld [vmem:[#allocation7] sm:$0xff] }
 0xbb0   :  { %2538 = vmatpush.msra.mxu3 %v2469_v51  ;;  %2519 = vmatpush.msra.mxu2 %v2466_v18 }
 0xbb1   :  { %v2319_v54 = vadd.f32 %v2318_v37, %v2317_v38  ;;  %v2467_v38 = vld [vmem:[#allocation7 + $0x8] sm:$0xff]  ;;  %v2559_v37 = vld [vmem:[%s5794_s12 + $0x78] sm:$0xff] }
 0xbb2   :  { %2580 = vmatpush.msra.mxu0 %v2559_v37  ;;  %2539 = vmatpush.msra.mxu3 %v2467_v38 }
 0xbb3   :  { %2898 = vtanh.f32 %v2319_v54  ;;  %v2575_v54 = vld [vmem:[%s5794_s12 + $0xf8] sm:$0xff] }
 0xbb4   :  { %v2386_v57 = vpop.permute.xlu0 %2385  ;;  %2600 = vmatpush.msrb.mxu1 %v2575_v54 }
 0xbb5   :  { %v2390_v58 = vmul.f32 %v2386_v57, %v2384_v7  ;;  %v2558_v7 = vld [vmem:[%s5794_s12 + $0x70] sm:$0xff] }
 0xbb6   :  { %v2316_v4 = vpop.permute.xlu1 %2315  ;;  %v2574_v57 = vld [vmem:[%s5794_s12 + $0xf0] sm:$0xff]  ;;  %2581 = vmatpush.msra.mxu0 %v2558_v7 }
 0xbb7   :  { %v5663_v20 = vadd.f32 %v2390_v58, %v2389_v23  ;;  %v2557_v23 = vld [vmem:[%s5794_s12 + $0x68] sm:$0xff]  ;;  %2601 = vmatpush.msrb.mxu1 %v2574_v57 }
 0xbb8   :  { %v2573_v58 = vld [vmem:[%s5794_s12 + $0xe8] sm:$0xff]  ;;  %2582 = vmatpush.msra.mxu0 %v2557_v23 }
 0xbb9   :  { %v2899_v16 = vpop.eup %2898  ;;  %2900 = vtanh.f32 %v5663_v20  ;;  %2602 = vmatpush.msrb.mxu1 %v2573_v58 }
 0xbba   :  { %v2321_v3 = vmul.f32 %v2899_v16, %v2316_v4  ;;  %v2556_v16 = vld [vmem:[%s5794_s12 + $0x60] sm:$0xff] }
 0xbbb   :  { %v2572_v4 = vld [vmem:[%s5794_s12 + $0xe0] sm:$0xff]  ;;  %2583 = vmatpush.msra.mxu0 %v2556_v16 }
 0xbbc   :  { %2410 = vmatmul.f32.vlgmr.msrb.gmra.mxu0 %v2321_v3  ;;  %v2555_v3 = vld [vmem:[%s5794_s12 + $0x58] sm:$0xff]  ;;  %2603 = vmatpush.msrb.mxu1 %v2572_v4 }
 0xbbd   :  { %2584 = vmatpush.msra.mxu0 %v2555_v3 }
 0xbbf   :  { %v2901_v60 = vpop.eup %2900 }
 0xbc0   :  { %v2393_v63 = vmul.f32 %v2901_v60, %v2388_v43  ;;  %v2571_v60 = vld [vmem:[%s5794_s12 + $0xd8] sm:$0xff]  ;;  %v2554_v43 = vld [vmem:[%s5794_s12 + $0x50] sm:$0xff] }
 0xbc1   :  { %2604 = vmatpush.msrb.mxu1 %v2571_v60  ;;  %2585 = vmatpush.msra.mxu0 %v2554_v43 }
 0xbc2   :  { %2430 = vmatmul.f32.vlgmr.msra.gmra.mxu1 %v2393_v63  ;;  %v2570_v63 = vld [vmem:[%s5794_s12 + $0xd0] sm:$0xff] }
 0xbc3   :  { %2605 = vmatpush.msrb.mxu1 %v2570_v63 }
 0xc39   :  { %v2411_v32 = vpop.f32.mrf.mxu0 }
 0xc3a   :  { %v2412_v62 = vadd.f32 %v5569_v15, %v2411_v32  ;;  %v2553_v32 = vld [vmem:[%s5794_s12 + $0x48] sm:$0xff] }
 0xc3b   :  { %2586 = vmatpush.msra.mxu0 %v2553_v32 }
 0xc3f   :  { %v2431_v8 = vpop.f32.mrf.mxu1 }
 0xc40   :  { %v2432_v17 = vadd.f32 %v2431_v8, %v2412_v62  ;;  %v2569_v62 = vld [vmem:[%s5794_s12 + $0xc8] sm:$0xff]  ;;  %v2552_v8 = vld [vmem:[%s5794_s12 + $0x40] sm:$0xff] }
 0xc41   :  { %2606 = vmatpush.msrb.mxu1 %v2569_v62  ;;  %2587 = vmatpush.msra.mxu0 %v2552_v8 }
 0xc42   :  { %v2698_v59 = vmul.f32 -1.442695, %v2432_v17  ;;  %v2568_v17 = vld [vmem:[%s5794_s12 + $0xc0] sm:$0xff] }
 0xc43   :  { %2607 = vmatpush.msrb.mxu1 %v2568_v17 }
 0xc44   :  { %2902 = vpow2.f32 %v2698_v59  ;;  %v2551_v59 = vld [vmem:[%s5794_s12 + $0x38] sm:$0xff] }
 0xc45   :  { %2588 = vmatpush.msra.mxu0 %v2551_v59 }
 0xc4a   :  { %v2903_v10 = vpop.eup %2902 }
 0xc4b   :  { %v2437_v1 = vadd.f32 1.0, %v2903_v10  ;;  %v2567_v10 = vld [vmem:[%s5794_s12 + $0xb8] sm:$0xff] }
 0xc4c   :  { %2608 = vmatpush.msrb.mxu1 %v2567_v10 }
 0xc4d   :  { %2904 = vrcp.f32 %v2437_v1  ;;  %v2449_v21 = vand.u32 2147483648, %v2437_v1  ;;  %v2447_v34 = vand.u32 2147483647, %v2437_v1  ;;  %vm2443_vm14 = vweird.f32 %v2437_v1 }
 0xc4f   :  { %v2450_v26 = vor.u32 1.1754944e-38, %v2449_v21  ;;  %vm2448_vm0 = vcmp.eq.f32.partialorder %v2447_v34, 8.507059e+37  ;;  %v2549_v21 = vld [vmem:[%s5794_s12 + $0x28] sm:$0xff] }
 0xc53   :  { %v2905_v40 = vpop.eup %2904 }
 0xc54   :  { %v2439_v61 = vmul.f32 %v2905_v40, %v2437_v1  ;;  %vm2444_vm13 = vweird.f32 %v2905_v40  ;;  %v2550_v1 = vld [vmem:[%s5794_s12 + $0x30] sm:$0xff] }
 0xc55   :  { %vm2445_vm15 = vmor %vm2443_vm14, %vm2444_vm13  ;;  %2589 = vmatpush.msra.mxu0 %v2550_v1 }
 0xc56   :  { %v2440_v50 = vsub.f32 1.0, %v2439_v61 }
 0xc57   :  { %2590 = vmatpush.msra.mxu0 %v2549_v21 }
 0xc58   :  { %v2441_v6 = vmul.f32 %v2905_v40, %v2440_v50 }
 0xc5a   :  { %v2442_v22 = vadd.f32 %v2905_v40, %v2441_v6  ;;  %v2565_v6 = vld [vmem:[%s5794_s12 + $0xa8] sm:$0xff] }
 0xc5c   :  { %v2446_v45 = vsel %vm2445_vm15, %v2905_v40, %v2442_v22  ;;  %v2566_v40 = vld [vmem:[%s5794_s12 + $0xb0] sm:$0xff] }
 0xc5d   :  { %v5667_v15 = vsel %vm2448_vm0, %v2450_v26, %v2446_v45  ;;  %2609 = vmatpush.msrb.mxu1 %v2566_v40  ;;  %v2548_v26 = vld [vmem:[%s5794_s12 + $0x20] sm:$0xff] }
 0xc5e   :  { %2459 = vrot.lane.b32.xlu2 %v5667_v15, %s3243_s25  ;;  %2455 = vrot.lane.b32.xlu0 %v5667_v15, %s3244_s26  ;;  %v2453_v36 = vmul.f32 2.0, %v5667_v15  ;;  %v2461_v34 = vmul.f32 %v5667_v15, %v5663_v20  ;;  %v2564_v45 = vld [vmem:[%s5794_s12 + $0xa0] sm:$0xff]  ;;  %v2563_v20 = vld [vmem:[%s5794_s12 + $0x98] sm:$0xff] }
 0xc5f   :  { %2610 = vmatpush.msrb.mxu1 %v2565_v6  ;;  %2591 = vmatpush.msra.mxu0 %v2548_v26  ;;  %v2546_v15 = vld [vmem:[%s5794_s12 + $0x10] sm:$0xff] }
 0xc60   :  { %v2699_v41 = vadd.f32 -1.0, %v2453_v36 }
 0xc61   :  { %2611 = vmatpush.msrb.mxu1 %v2564_v45 }
 0xc62   :  { %2457 = vrot.lane.b32.xlu1 %v2699_v41, %s3245_s27  ;;  %v2547_v41 = vld [vmem:[%s5794_s12 + $0x18] sm:$0xff] }
 0xc63   :  { %2592 = vmatpush.msra.mxu0 %v2547_v41  ;;  %2612 = vmatpush.msrb.mxu1 %v2563_v20 }
 0xc65   :  { %2593 = vmatpush.msra.mxu0 %v2546_v15  ;;  %2613 = vmatpush.msrb.mxu1 %v2562_v12 }
 0xc67   :  { %2594 = vmatpush.msra.mxu0 %v2545_v48  ;;  %2614 = vmatpush.msrb.mxu1 %v2561_v33 }
 0xc69   :  { %2595 = vmatpush.msra.mxu0 %v2544_v30  ;;  %2615 = vmatpush.msrb.mxu1 %v2560_v9 }
 0xcb8   :  { %v2460_v0 = vpop.permute.xlu2 %2459 }
 0xcd0   :  { %v2456_v61 = vpop.permute.xlu0 %2455 }
 0xcd4   :  { %v2458_v50 = vpop.permute.xlu1 %2457 }
 0xcd5   :  { %v2462_v22 = vmul.f32 %v2458_v50, %v2456_v61 }
 0xcd7   :  { %v2463_v36 = vadd.f32 %v2462_v22, %v2461_v34 }
 0xcd9   :  { %2906 = vtanh.f32 %v2463_v36 }
 0xcdf   :  { %v2907_v42 = vpop.eup %2906 }
 0xce0   :  { %v2465_v53 = vmul.f32 %v2907_v42, %v2460_v0 }
 0xce2   :  { %2520 = vmatmul.f32.vlgmr.msra.gmra.mxu2 %v2465_v53  ;;  %2540 = vmatmul.f32.vlgmr.msra.gmra.mxu3 %v2465_v53 }
 0xd65   :  { %v2521_v35 = vpop.f32.mrf.mxu2  ;;  %v2541_v46 = vpop.f32.mrf.mxu3 }
 0xd66   :  { %v2522_v31 = vadd.f32 %v2521_v35, %v2500_v29  ;;  %v2542_v47 = vadd.f32 %v2541_v46, %v2501_v14 }
 0xd68   :  { %2596 = vmatmul.f32.vlgmr.msra.gmra.mxu0 %v2522_v31  ;;  %2616 = vmatmul.f32.vlgmr.msrb.gmra.mxu1 %v2542_v47 }
 0xde5   :  { %v2597_v52 = vpop.f32.mrf.mxu0  ;;  %v2617_v25 = vpop.f32.mrf.mxu1 }
 0xde6   :  { %v2598_v27 = vadd.f32 %v2715_v39, %v2597_v52 }
 0xde8   :  { %v2618_v55 = vadd.f32 %v2617_v25, %v2598_v27 }
 0xdea   :  { %2621 = vst.msk [vmem:[%s5796_s14] sm:$0xff] %vm2620_vm1, %v2618_v55 }
 0xdeb   :  { %2626 = vsyncpa [#allocation4], 1 }
 0xdec   :  { %2627 = vsyncpa [#allocation6], 1 }

</bundles_post_ra>
